<compile_context>
chip_gen: v5e
topology: v5e:2x2
jax: 0.10.0
libtpu: 0.0.40
codegen_flags: <defaults>
</compile_context>

<pallas_src>
from functools import partial

import numpy as np
import jax
import jax.numpy as jnp
from jax.experimental import pallas as pl
from jax.experimental.pallas import tpu as pltpu


# ---------------------------------------------------------------------------
# Host-side helpers: PyTorch-exact 1-D interpolation matrices.
# ---------------------------------------------------------------------------
def _interp_matrix_1d(in_size: int, out_size: int, mode: str) -> np.ndarray:
    """Row-stochastic (out_size, in_size) matrix reproducing F.interpolate semantics."""
    idx = np.arange(out_size)
    scale = in_size / out_size
    A = np.zeros((out_size, in_size), dtype=np.float32)
    if mode == "nearest":
        src = np.floor(idx * scale).astype(np.int64)
        src = np.minimum(src, in_size - 1)
        A[idx, src] = 1.0
    elif mode == "bilinear":
        # PyTorch align_corners=False: src = (i+0.5)*scale - 0.5, clamped at 0.
        src = (idx + 0.5) * scale - 0.5
        src = np.clip(src, 0.0, None)
        i0 = np.minimum(np.floor(src).astype(np.int64), in_size - 1)
        i1 = np.minimum(i0 + 1, in_size - 1)
        frac = (src - i0).astype(np.float32)
        A[idx, i0] += (1.0 - frac)
        A[idx, i1] += frac
    else:
        raise ValueError(f"unsupported mode: {mode}")
    return A


# ---------------------------------------------------------------------------
# Pallas kernel (single invocation, all batches folded onto sublanes):
#   x_ref   : (N*C_in,  H*W)            rows = (n, c), lanes = h*W+w   (free NCHW reshape)
#   wbd_ref : (N*C_out, N*C_in)         block-diagonal 1x1-conv weight
#   kt_ref  : (H*W,     Hout*Wout)      kron(Ah, Aw)^T -- fused 2-D interpolation
#   b_ref   : (N*C_out, 1)              per-sublane bias column (broadcast over lanes)
#   o_ref   : (N*C_out, Hout*Wout)      rows = (n, o), lanes = p*Wout+q (free NCHW reshape)
# ---------------------------------------------------------------------------
def _upsampler_kernel(x_ref, wbd_ref, kt_ref, b_ref, o_ref, *, precision):
    # Cast x on the VPU (has slack) instead of a host-side pre-cast HBM round trip.
    x = x_ref[...].astype(wbd_ref.dtype)                                   # (N*C_in, HW)
    # 1x1 conv first: tiny matmul on the small pre-upsample spatial extent.
    z = jnp.dot(wbd_ref[...], x,
                preferred_element_type=jnp.float32, precision=precision)   # (N*C_out, HW)
    # Fused bilinear upsampling: one MXU matmul, contraction depth K = H*W (=256 here).
    y = jnp.dot(z.astype(kt_ref.dtype), kt_ref[...],
                preferred_element_type=jnp.float32, precision=precision)   # (N*C_out, HWo)
    o_ref[...] = (y + b_ref[...]).astype(o_ref.dtype)


def upsampler_forward(x_nchw, weight, bias, scale_factor=2, mode="bilinear",
                      compute_dtype=jnp.bfloat16):
    """x_nchw: (N, C_in, H, W).  weight: (C_out, C_in).  bias: (C_out,)."""
    N, C_in, H, W = x_nchw.shape
    C_out = weight.shape[0]
    Hout, Wout = H * scale_factor, W * scale_factor
    HW, HWo = H * W, Hout * Wout

    # Fused 2-D interpolation matrix: kron(Ah, Aw)[(p*Wout+q),(h*W+w)] = Ah[p,h]*Aw[q,w].
    Ah = _interp_matrix_1d(H, Hout, mode)                          # (Hout, H)
    Aw = _interp_matrix_1d(W, Wout, mode)                          # (Wout, W)
    kt = jnp.asarray(np.kron(Ah, Aw).T, dtype=compute_dtype)       # (HW, HWo)

    # Block-diagonal conv weight folds the batch axis into sublanes -> single grid step.
    wbd = jnp.kron(jnp.eye(N, dtype=jnp.float32),
                   jnp.asarray(weight, jnp.float32)).astype(compute_dtype)  # (N*C_out, N*C_in)
    bias_col = jnp.tile(jnp.asarray(bias, jnp.float32), N).reshape(N * C_out, 1)

    # Free reshape of NCHW; native dtype (the bf16 cast happens inside the kernel).
    x2d = x_nchw.reshape(N * C_in, HW)

    precision = (jax.lax.Precision.HIGHEST
                 if jnp.dtype(compute_dtype) == jnp.float32 else None)

    out = pl.pallas_call(
        partial(_upsampler_kernel, precision=precision),
        out_shape=jax.ShapeDtypeStruct((N * C_out, HWo), x_nchw.dtype),
        grid_spec=pltpu.PrefetchScalarGridSpec(
            num_scalar_prefetch=0,
            grid=(1,),                       # single invocation: all batches in one step
            in_specs=[
                pl.BlockSpec((N * C_in, HW), lambda i: (0, 0)),
                pl.BlockSpec((N * C_out, N * C_in), lambda i: (0, 0)),
                pl.BlockSpec((HW, HWo), lambda i: (0, 0)),
                pl.BlockSpec((N * C_out, 1), lambda i: (0, 0)),
            ],
            out_specs=pl.BlockSpec((N * C_out, HWo), lambda i: (0, 0)),
        ),
        compiler_params=pltpu.CompilerParams(dimension_semantics=("arbitrary",)),
    )(x2d, wbd, kt, bias_col)

    # (N*C_out, Hout*Wout) is already NCHW memory layout -> free reshape.
    return out.reshape(N, C_out, Hout, Wout)


# ---------------------------------------------------------------------------
# Pure-JAX reference (PyTorch semantics), full precision.
# ---------------------------------------------------------------------------
def _reference_forward(x_nchw, weight, bias, scale_factor, mode):
    N, C_in, H, W = x_nchw.shape
    Hout, Wout = H * scale_factor, W * scale_factor
    Ah = jnp.asarray(_interp_matrix_1d(H, Hout, mode))
    Aw = jnp.asarray(_interp_matrix_1d(W, Wout, mode))
    hp = jax.lax.Precision.HIGHEST
    u = jnp.einsum("ph,nchw,qw->ncpq", Ah, x_nchw, Aw, precision=hp)
    y = jnp.einsum("oc,ncpq->nopq", weight, u, precision=hp) + bias[None, :, None, None]
    return y


if __name__ == "__main__":
    # Module config: Upsampler(scale_factor=2, in_channels=4, out_channels=8, dim=2, mode='bilinear')
    N, C_IN, C_OUT, H, W = 2, 4, 8, 16, 16
    SCALE, MODE = 2, "bilinear"

    key = jax.random.PRNGKey(0)
    kx, kw, kb = jax.random.split(key, 3)
    x = jax.random.normal(kx, (N, C_IN, H, W), dtype=jnp.float32)
    # Synthetic Conv2d(4, 8, 1) parameters ((C_out, C_in, 1, 1) -> (C_out, C_in)).
    weight = jax.random.normal(kw, (C_OUT, C_IN), dtype=jnp.float32) * 0.1
    bias = jax.random.normal(kb, (C_OUT,), dtype=jnp.float32) * 0.1

    y_ref = jax.block_until_ready(_reference_forward(x, weight, bias, SCALE, MODE))

    # f32 compute path: tight numerical check against the PyTorch-semantics reference.
    y32 = jax.block_until_ready(
        upsampler_forward(x, weight, bias, SCALE, MODE, compute_dtype=jnp.float32))
    assert y32.shape == (N, C_OUT, H * SCALE, W * SCALE), y32.shape
    np.testing.assert_allclose(np.asarray(y32), np.asarray(y_ref), rtol=1e-5, atol=1e-5)

    # bf16 compute path (default; native MXU dtype on all generations).
    y16 = jax.block_until_ready(
        upsampler_forward(x, weight, bias, SCALE, MODE, compute_dtype=jnp.bfloat16))
    assert y16.shape == (N, C_OUT, H * SCALE, W * SCALE), y16.shape
    np.testing.assert_allclose(np.asarray(y16), np.asarray(y_ref), rtol=5e-2, atol=5e-2)

    print("KERNEL_OK")
</pallas_src>

<mosaic_0001>
module attributes {stable_mosaic.version = 11 : i64} {
  func.func @_upsampler_kernel(%arg0: i32, %arg1: memref<8x256xf32, #tpu.memory_space<vmem>>, %arg2: memref<16x8xf32, #tpu.memory_space<vmem>>, %arg3: memref<256x1024xf32, #tpu.memory_space<vmem>>, %arg4: memref<16x1xf32, #tpu.memory_space<vmem>>, %arg5: memref<16x1024xf32, #tpu.memory_space<vmem>>) attributes {dimension_semantics = [#tpu.dimension_semantics<arbitrary>], iteration_bounds = array<i64: 1>, scalar_prefetch = 0 : i64, scratch_operands = 0 : i64, tpu.core_type = #tpu.core_type<tc>, window_params = [{pipeline_mode = #tpu.pipeline_mode<synchronous>, transform_indices = @transform_0, window_bounds = array<i64: 8, 256>}, {pipeline_mode = #tpu.pipeline_mode<synchronous>, transform_indices = @transform_1, window_bounds = array<i64: 16, 8>}, {pipeline_mode = #tpu.pipeline_mode<synchronous>, transform_indices = @transform_2, window_bounds = array<i64: 256, 1024>}, {pipeline_mode = #tpu.pipeline_mode<synchronous>, transform_indices = @transform_3, window_bounds = array<i64: 16, 1>}, {pipeline_mode = #tpu.pipeline_mode<synchronous>, transform_indices = @transform_4, window_bounds = array<i64: 16, 1024>}]} {
    %c0 = arith.constant 0 : index
    %c0_0 = arith.constant 0 : index
    %0 = vector.load %arg1[%c0, %c0_0] : memref<8x256xf32, #tpu.memory_space<vmem>>, vector<8x256xf32>
    %c0_1 = arith.constant 0 : index
    %c0_2 = arith.constant 0 : index
    %1 = vector.load %arg2[%c0_1, %c0_2] : memref<16x8xf32, #tpu.memory_space<vmem>>, vector<16x8xf32>
    %cst = arith.constant dense<0.000000e+00> : vector<16x256xf32>
    %2 = tpu.matmul %1, %0, %cst {dimension_numbers = #tpu.dot_dimension_numbers<[1], [0], [0], [1], [0, 0, 1, 1], [], []>, precision = #tpu.contract_precision<fp32>} : vector<16x8xf32>, vector<8x256xf32>, vector<16x256xf32> -> vector<16x256xf32>
    %c0_3 = arith.constant 0 : index
    %c0_4 = arith.constant 0 : index
    %3 = vector.load %arg3[%c0_3, %c0_4] : memref<256x1024xf32, #tpu.memory_space<vmem>>, vector<256x1024xf32>
    %cst_5 = arith.constant dense<0.000000e+00> : vector<16x1024xf32>
    %4 = tpu.matmul %2, %3, %cst_5 {dimension_numbers = #tpu.dot_dimension_numbers<[1], [0], [0], [1], [0, 0, 1, 1], [], []>, precision = #tpu.contract_precision<fp32>} : vector<16x256xf32>, vector<256x1024xf32>, vector<16x1024xf32> -> vector<16x1024xf32>
    %c0_6 = arith.constant 0 : index
    %c0_7 = arith.constant 0 : index
    %5 = vector.load %arg4[%c0_6, %c0_7] : memref<16x1xf32, #tpu.memory_space<vmem>>, vector<16x1xf32>
    %6 = vector.broadcast %5 : vector<16x1xf32> to vector<16x1024xf32>
    %7 = arith.addf %4, %6 : vector<16x1024xf32>
    %c0_8 = arith.constant 0 : index
    %c0_9 = arith.constant 0 : index
    %8 = vector.load %arg5[%c0_8, %c0_9] : memref<16x1024xf32, #tpu.memory_space<vmem>>, vector<16x1024xf32>
    tpu.vector_store %arg5[%c0_8, %c0_9], %7 {strides = array<i32>} : memref<16x1024xf32, #tpu.memory_space<vmem>>, vector<16x1024xf32>,
    return
  }
  func.func @transform_0(%arg0: i32) -> (i32, i32) {
    %c0_i32 = arith.constant 0 : i32
    %c0_i32_0 = arith.constant 0 : i32
    %c0_i32_1 = arith.constant 0 : i32
    return %c0_i32, %c0_i32_0 : i32, i32
  }
  func.func @transform_1(%arg0: i32) -> (i32, i32) {
    %c0_i32 = arith.constant 0 : i32
    %c0_i32_0 = arith.constant 0 : i32
    %c0_i32_1 = arith.constant 0 : i32
    return %c0_i32, %c0_i32_0 : i32, i32
  }
  func.func @transform_2(%arg0: i32) -> (i32, i32) {
    %c0_i32 = arith.constant 0 : i32
    %c0_i32_0 = arith.constant 0 : i32
    %c0_i32_1 = arith.constant 0 : i32
    return %c0_i32, %c0_i32_0 : i32, i32
  }
  func.func @transform_3(%arg0: i32) -> (i32, i32) {
    %c0_i32 = arith.constant 0 : i32
    %c0_i32_0 = arith.constant 0 : i32
    %c0_i32_1 = arith.constant 0 : i32
    return %c0_i32, %c0_i32_0 : i32, i32
  }
  func.func @transform_4(%arg0: i32) -> (i32, i32) {
    %c0_i32 = arith.constant 0 : i32
    %c0_i32_0 = arith.constant 0 : i32
    %c0_i32_1 = arith.constant 0 : i32
    return %c0_i32, %c0_i32_0 : i32, i32
  }
}

</mosaic_0001>

<bundles_post_ra>
// kernel: tpu_custom_call.1
= control target key start
LH: loop header
LB: loop body
LE: loop exit
PB: predicated region body
PF: predicated region fallthrough
CT: control target
= control target key end

     0   :  { %9 = vsyncpa [#allocation3], 0  ;;  %s10999_s0 = inlined_call_operand.vmem [shape: f32[8,256], index: 0, kind: input, shape index: {}]   ;;  %s11000_s1 = inlined_call_operand.vmem [shape: f32[16,8], index: 1, kind: input, shape index: {}]   ;;  %s11001_s2 = inlined_call_operand.hbm [shape: f32[256,1024], index: 2, kind: input, shape index: {}]   ;;  %s11002_s3 = inlined_call_operand.vmem [shape: f32[16,1], index: 3, kind: input, shape index: {}]   ;;  %s11003_s4 = inlined_call_operand.hbm [shape: f32[16,1024], index: 4, kind: output, shape index: {}]  }
   0x1   :  { %10 = vsyncpa [#allocation4], 0  ;;  %s19_s17 = sshll.u32 %s11001_s2, 4  ;;  %s6712_s18 = smov [#allocation2]   ;;  %s20_s17 = int_to_ptr.hbm [resolvable:$true] %s19_s17 }
   0x2   :  { %s21_s19 = sshll.u32 %s6712_s18, 4  ;;  %s6713_s20 = smov 1024   ;;  %s22_s19 = int_to_ptr.vmem [resolvable:$true] %s21_s19 }
   0x3   :  { %s6714_s21 = smov 64  }
   0x4   :  { %27 = dma.hbm_to_vmem [thread:$0]  %s20_s17, 32768, %s22_s19, [#allocation3], %s6713_s20, %s6713_s20, %s6714_s21  }
   0x5   :  { %6708 = dma.done.wait [#allocation3], 32768  }
   0x6   :  { %6709 = vsyncadd [#allocation3], 4294934528  ;;  %vm38_vm0 = vcmask 64512   ;;  %v34_v0 = vld [vmem:[%s10999_s0] sm:$0xff]  ;;  %v37_v2 = vld [vmem:[%s11000_s1 + $0x8] sm:$0xff]  ;;  %s6641_s8 = sshll.u32 %s11003_s4, 4  ;;  %s6642_s8 = int_to_ptr.hbm [resolvable:$true] %s6641_s8 }
   0x7   :  { %v36_v1 = vld [vmem:[%s11000_s1] sm:$0xff]  ;;  %v60_v3 = vand.u32 4294901760, %v34_v0  ;;  %v43_v5 = vsel %vm38_vm0, %v37_v2, 0  ;;  %v35_v6 = vld [vmem:[%s10999_s0 + $0x8] sm:$0xff] }
   0x8   :  { %v40_v4 = vsel %vm38_vm0, %v36_v1, 0  ;;  %v6762_v8 = vand.u32 4294901760, %v43_v5  ;;  %v237_v9 = vand.u32 4294901760, %v35_v6  ;;  %v519_v26 = vld [vmem:[#allocation2 + $0x3c0] sm:$0xff] }
   0x9   :  { %v6760_v7 = vand.u32 4294901760, %v40_v4  ;;  %v95_v10 = vsub.f32 %v34_v0, %v60_v3  ;;  %154 = vmatpush.msra.mxu3 %v60_v3  ;;  %61 = vmatpush.msra.mxu0 %v60_v3  ;;  %v511_v27 = vld [vmem:[#allocation2 + $0x380] sm:$0xff]  ;;  %v6786_v29 = vand.u32 4294901760, %v519_v26 }
   0xa   :  { %v6768_v12 = vsub.f32 %v43_v5, %v6762_v8  ;;  %v272_v13 = vsub.f32 %v35_v6, %v237_v9  ;;  %v503_v28 = vld [vmem:[#allocation2 + $0x340] sm:$0xff]  ;;  %v6788_v30 = vand.u32 4294901760, %v511_v27 }
   0xb   :  { %v6765_v11 = vsub.f32 %v40_v4, %v6760_v7  ;;  %126 = vmatpush.msra.mxu2 %v95_v10  ;;  %v96_v14 = vand.u32 4294901760, %v95_v10  ;;  %v6790_v31 = vand.u32 4294901760, %v503_v28  ;;  %v495_v32 = vld [vmem:[#allocation2 + $0x300] sm:$0xff]  ;;  %v6799_v40 = vsub.f32 %v519_v26, %v6786_v29 }
   0xc   :  { %v273_v16 = vand.u32 4294901760, %v272_v13  ;;  %v6778_v19 = vand.u32 4294901760, %v6768_v12  ;;  %v487_v33 = vld [vmem:[#allocation2 + $0x2c0] sm:$0xff]  ;;  %v6792_v35 = vand.u32 4294901760, %v495_v32  ;;  %v6802_v41 = vsub.f32 %v511_v27, %v6788_v30 }
   0xd   :  { %129 = vmatmul.f32.vlgmr.msra.gmra.mxu2 %v6765_v11  ;;  %v6772_v15 = vand.u32 4294901760, %v6765_v11  ;;  %v97_v17 = vsub.f32 %v95_v10, %v96_v14  ;;  %186 = vmatpush.msrb.mxu0 %v96_v14  ;;  %v479_v34 = vld [vmem:[#allocation2 + $0x280] sm:$0xff]  ;;  %v6794_v36 = vand.u32 4294901760, %v487_v33  ;;  %v6805_v42 = vsub.f32 %v503_v28, %v6790_v31 }
   0xe   :  { %238 = vmatpush.msrb.mxu2 %v237_v9  ;;  %v274_v20 = vsub.f32 %v272_v13, %v273_v16  ;;  %v73_v24 = vsub.f32 %v6768_v12, %v6778_v19  ;;  %v6796_v37 = vand.u32 4294901760, %v479_v34  ;;  %v471_v38 = vld [vmem:[#allocation2 + $0x240] sm:$0xff]  ;;  %v6811_v44 = vsub.f32 %v495_v32, %v6792_v35 }
   0xf   :  { %158 = vmatmul.f32.vlgmr.msra.gmra.mxu3 %v6772_v15  ;;  %v65_v18 = vsub.f32 %v6765_v11, %v6772_v15  ;;  %v98_v21 = vand.u32 4294901760, %v97_v17  ;;  %v463_v39 = vld [vmem:[#allocation2 + $0x200] sm:$0xff]  ;;  %v6807_v43 = vand.u32 4294901760, %v471_v38  ;;  %v6814_v45 = vsub.f32 %v487_v33, %v6794_v36 }
  0x10   :  { %363 = vmatpush.msra.mxu2 %v273_v16  ;;  %v275_v23 = vand.u32 4294901760, %v274_v20  ;;  %v74_v25 = vand.u32 4294901760, %v73_v24  ;;  %v6817_v46 = vsub.f32 %v479_v34, %v6796_v37  ;;  %v6819_v47 = vand.u32 4294901760, %v463_v39  ;;  %v455_v59 = vld [vmem:[#allocation2 + $0x1c0] sm:$0xff] }
  0x11   :  { %v66_v22 = vand.u32 4294901760, %v65_v18  ;;  %99 = vmatpush.msra.mxu1 %v98_v21  ;;  %v718_v48 = vand.u32 4294901760, %v6799_v40  ;;  %v724_v49 = vand.u32 4294901760, %v6802_v41  ;;  %v730_v50 = vand.u32 4294901760, %v6805_v42  ;;  %v447_v60 = vld [vmem:[#allocation2 + $0x180] sm:$0xff] }
  0x12   :  { %101 = vmatmul.f32.vlgmr.msra.gmra.mxu1 %v6760_v7  ;;  %276 = vmatpush.msrb.mxu3 %v275_v23  ;;  %v736_v51 = vand.u32 4294901760, %v6811_v44  ;;  %v742_v52 = vand.u32 4294901760, %v6814_v45  ;;  %v6829_v53 = vsub.f32 %v471_v38, %v6807_v43  ;;  %v748_v57 = vand.u32 4294901760, %v6817_v46  ;;  %v439_v61 = vld [vmem:[#allocation2 + $0x140] sm:$0xff] }
  0x13   :  { %67 = vmatmul.f32.vlgmr.msra.gmra.mxu0 %v66_v22  ;;  %212 = vmatpush.msrb.mxu1 %v60_v3  ;;  %v719_v54 = vsub.f32 %v6799_v40, %v718_v48  ;;  %v725_v55 = vsub.f32 %v6802_v41, %v724_v49  ;;  %v731_v56 = vsub.f32 %v6805_v42, %v730_v50  ;;  %v431_v3 = vld [vmem:[#allocation2 + $0x100] sm:$0xff]  ;;  %v6859_v5 = vand.u32 4294901760, %v455_v59 }
  0x14   :  { %303 = vmatpush.msra.mxu0 %v272_v13  ;;  %389 = vmatpush.msra.mxu3 %v237_v9  ;;  %v6846_v58 = vsub.f32 %v463_v39, %v6819_v47  ;;  %v737_v0 = vsub.f32 %v6811_v44, %v736_v51  ;;  %v743_v1 = vsub.f32 %v6814_v45, %v742_v52  ;;  %v754_v2 = vand.u32 4294901760, %v6829_v53  ;;  %v423_v14 = vld [vmem:[#allocation2 + $0xc0] sm:$0xff] }
  0x15   :  { %134 = vmatmul.f32.gmra.mxu2 %v6768_v12  ;;  %331 = vmatpush.msra.mxu1 %v237_v9  ;;  %v720_v62 = vand.u32 4294901760, %v719_v54  ;;  %v726_v63 = vand.u32 4294901760, %v725_v55  ;;  %v732_v4 = vand.u32 4294901760, %v731_v56  ;;  %v6861_v6 = vand.u32 4294901760, %v447_v60  ;;  %v407_v28 = vld [vmem:[#allocation2 + $0x40] sm:$0xff] }
  0x16   :  { %v6863_v9 = vand.u32 4294901760, %v439_v61  ;;  %v749_v10 = vsub.f32 %v6817_v46, %v748_v57  ;;  %v760_v13 = vand.u32 4294901760, %v6846_v58  ;;  %v738_v16 = vand.u32 4294901760, %v737_v0  ;;  %v399_v54 = vld [vmem:[#allocation2] sm:$0xff] }
  0x17   :  { %164 = vmatmul.f32.gmra.mxu3 %v6778_v19  ;;  %v6873_v17 = vsub.f32 %v455_v59, %v6859_v5  ;;  %v6876_v18 = vsub.f32 %v447_v60, %v6861_v6  ;;  %v6878_v20 = vand.u32 4294901760, %v431_v3  ;;  %v755_v21 = vsub.f32 %v6829_v53, %v754_v2 }
  0x18   :  { %v744_v23 = vand.u32 4294901760, %v743_v1  ;;  %v6890_v26 = vand.u32 4294901760, %v423_v14  ;;  %v761_v27 = vsub.f32 %v6846_v58, %v760_v13  ;;  %v750_v32 = vand.u32 4294901760, %v749_v10 }
  0x19   :  { %v766_v24 = vand.u32 4294901760, %v6873_v17  ;;  %v772_v33 = vand.u32 4294901760, %v6876_v18  ;;  %v6900_v34 = vsub.f32 %v431_v3, %v6878_v20  ;;  %v756_v39 = vand.u32 4294901760, %v755_v21 }
  0x1a   :  { %105 = vmatmul.f32.gmra.mxu1 %v6762_v8  ;;  %v6912_v59 = vsub.f32 %v423_v14, %v6890_v26  ;;  %v6914_v60 = vand.u32 4294901760, %v407_v28  ;;  %v6926_v1 = vand.u32 4294901760, %v399_v54  ;;  %v647_v14 = vld [vmem:[#allocation2 + $0x7c0] sm:$0xff] }
  0x1b   :  { %75 = vmatmul.f32.gmra.mxu0 %v74_v25  ;;  %v767_v55 = vsub.f32 %v6873_v17, %v766_v24 }
  0x1c   :  { %v6936_v10 = vsub.f32 %v407_v28, %v6914_v60 }
  0x1d   :  { %244 = vmatmul.f32.vlgmr.msrb.gmra.mxu2 %v66_v22  ;;  %v415_v22 = vld [vmem:[#allocation2 + $0x80] sm:$0xff] }
  0x1e   :  { %823 = vmatpush.msrb.mxu2 %v6799_v40  ;;  %v6902_v38 = vand.u32 4294901760, %v415_v22 }
  0x1f   :  { %278 = vmatmul.f32.vlgmr.msrb.gmra.mxu3 %v6760_v7 }
  0x20   :  { %881 = vmatpush.msrb.mxu3 %v6786_v29  ;;  %826 = vmatpush.msrb.mxu2 %v6802_v41  ;;  %v6924_v0 = vsub.f32 %v415_v22, %v6902_v38  ;;  %v607_v41 = vld [vmem:[#allocation2 + $0x680] sm:$0xff] }
  0x22   :  { %883 = vmatpush.msrb.mxu3 %v6788_v30  ;;  %214 = vmatmul.f32.vlgmr.msrb.gmra.mxu1 %v6760_v7  ;;  %v796_v22 = vand.u32 4294901760, %v6924_v0 }
  0x23   :  { %188 = vmatmul.f32.vlgmr.msrb.gmra.mxu0 %v6760_v7  ;;  %829 = vmatpush.msrb.mxu2 %v6805_v42 }
  0x24   :  { %668 = vmatpush.msrb.mxu0 %v6786_v29  ;;  %885 = vmatpush.msrb.mxu3 %v6790_v31 }
  0x25   :  { %252 = vmatmul.f32.gmra.mxu2 %v74_v25  ;;  %721 = vmatpush.msrb.mxu1 %v720_v62  ;;  %v6888_v25 = vsub.f32 %v439_v61, %v6863_v9  ;;  %v762_v61 = vand.u32 4294901760, %v761_v27  ;;  %v773_v62 = vsub.f32 %v6876_v18, %v772_v33  ;;  %v639_v27 = vld [vmem:[#allocation2 + $0x780] sm:$0xff] }
  0x26   :  { %832 = vmatpush.msrb.mxu2 %v6811_v44  ;;  %670 = vmatpush.msrb.mxu0 %v6788_v30  ;;  %v7080_v44 = vand.u32 4294901760, %v607_v41 }
  0x27   :  { %282 = vmatmul.f32.gmra.mxu3 %v6762_v8  ;;  %727 = vmatpush.msrb.mxu1 %v726_v63  ;;  %v778_v56 = vand.u32 4294901760, %v6888_v25  ;;  %v784_v63 = vand.u32 4294901760, %v6900_v34 }
  0x28   :  { %835 = vmatpush.msrb.mxu2 %v6814_v45  ;;  %887 = vmatpush.msrb.mxu3 %v6792_v35 }
  0x29   :  { %672 = vmatpush.msrb.mxu0 %v6790_v31  ;;  %733 = vmatpush.msrb.mxu1 %v732_v4  ;;  %v779_v3 = vsub.f32 %v6888_v25, %v778_v56  ;;  %v790_v4 = vand.u32 4294901760, %v6912_v59  ;;  %v785_v21 = vsub.f32 %v6900_v34, %v784_v63 }
  0x2a   :  { %838 = vmatpush.msrb.mxu2 %v6817_v46  ;;  %218 = vmatmul.f32.gmra.mxu1 %v6762_v8  ;;  %v599_v46 = vld [vmem:[#allocation2 + $0x640] sm:$0xff] }
  0x2b   :  { %192 = vmatmul.f32.gmra.mxu0 %v6762_v8  ;;  %739 = vmatpush.msrb.mxu1 %v738_v16  ;;  %v774_v16 = vand.u32 4294901760, %v773_v62  ;;  %v791_v28 = vsub.f32 %v6912_v59, %v790_v4 }
  0x2c   :  { %889 = vmatpush.msrb.mxu3 %v6794_v36  ;;  %674 = vmatpush.msrb.mxu0 %v6792_v35 }
  0x2d   :  { %365 = vmatmul.f32.vlgmr.msra.gmra.mxu2 %v6760_v7  ;;  %745 = vmatpush.msrb.mxu1 %v744_v23  ;;  %v6946_v23 = vsub.f32 %v399_v54, %v6926_v1  ;;  %v786_v54 = vand.u32 4294901760, %v785_v21  ;;  %v792_v62 = vand.u32 4294901760, %v791_v28 }
  0x2e   :  { %841 = vmatpush.msrb.mxu2 %v6829_v53  ;;  %676 = vmatpush.msrb.mxu0 %v6794_v36 }
  0x2f   :  { %391 = vmatmul.f32.vlgmr.msra.gmra.mxu3 %v6760_v7  ;;  %751 = vmatpush.msrb.mxu1 %v750_v32  ;;  %v768_v7 = vand.u32 4294901760, %v767_v55  ;;  %v802_v32 = vand.u32 4294901760, %v6936_v10  ;;  %v797_v55 = vsub.f32 %v6924_v0, %v796_v22 }
  0x30   :  { %891 = vmatpush.msrb.mxu3 %v6796_v37  ;;  %844 = vmatpush.msrb.mxu2 %v6846_v58 }
  0x31   :  { %678 = vmatpush.msrb.mxu0 %v6796_v37  ;;  %757 = vmatpush.msrb.mxu1 %v756_v39  ;;  %v6959_v39 = vand.u32 4294901760, %v639_v27 }
  0x32   :  { %893 = vmatpush.msrb.mxu3 %v6807_v43  ;;  %335 = vmatmul.f32.vlgmr.msra.gmra.mxu1 %v6772_v15  ;;  %v780_v15 = vand.u32 4294901760, %v779_v3 }
  0x33   :  { %306 = vmatmul.f32.vlgmr.msra.gmra.mxu0 %v6765_v11  ;;  %763 = vmatpush.msrb.mxu1 %v762_v61  ;;  %v6950_v11 = vand.u32 4294901760, %v647_v14  ;;  %v808_v61 = vand.u32 4294901760, %v6946_v23  ;;  %v6978_v3 = vsub.f32 %v639_v27, %v6959_v39 }
  0x34   :  { %847 = vmatpush.msrb.mxu2 %v6873_v17  ;;  %895 = vmatpush.msrb.mxu3 %v6819_v47 }
  0x35   :  { %369 = vmatmul.f32.gmra.mxu2 %v6762_v8  ;;  %769 = vmatpush.msrb.mxu1 %v768_v7  ;;  %v803_v7 = vsub.f32 %v6936_v10, %v802_v32 }
  0x36   :  { %680 = vmatpush.msrb.mxu0 %v6807_v43  ;;  %850 = vmatpush.msrb.mxu2 %v6876_v18 }
  0x37   :  { %395 = vmatmul.f32.gmra.mxu3 %v6762_v8  ;;  %775 = vmatpush.msrb.mxu1 %v774_v16  ;;  %v6969_v8 = vsub.f32 %v647_v14, %v6950_v11  ;;  %v798_v14 = vand.u32 4294901760, %v797_v55  ;;  %v809_v16 = vsub.f32 %v6946_v23, %v808_v61  ;;  %v631_v55 = vld [vmem:[#allocation2 + $0x740] sm:$0xff] }
  0x38   :  { %897 = vmatpush.msrb.mxu3 %v6859_v5  ;;  %682 = vmatpush.msrb.mxu0 %v6819_v47 }
  0x39   :  { %853 = vmatpush.msrb.mxu2 %v6888_v25  ;;  %781 = vmatpush.msrb.mxu1 %v780_v15  ;;  %v1090_v21 = vand.u32 4294901760, %v6969_v8  ;;  %v810_v27 = vand.u32 4294901760, %v809_v16 }
  0x3a   :  { %899 = vmatpush.msrb.mxu3 %v6861_v6  ;;  %341 = vmatmul.f32.gmra.mxu1 %v6778_v19  ;;  %v1096_v19 = vand.u32 4294901760, %v6978_v3 }
  0x3b   :  { %311 = vmatmul.f32.gmra.mxu0 %v6768_v12  ;;  %787 = vmatpush.msrb.mxu1 %v786_v54  ;;  %v804_v12 = vand.u32 4294901760, %v803_v7  ;;  %v1091_v15 = vsub.f32 %v6969_v8, %v1090_v21  ;;  %v7012_v7 = vand.u32 4294901760, %v631_v55 }
  0x3c   :  { %684 = vmatpush.msrb.mxu0 %v6859_v5  ;;  %856 = vmatpush.msrb.mxu2 %v6900_v34  ;;  %v1097_v28 = vsub.f32 %v6978_v3, %v1096_v19 }
  0x3d   :  { %901 = vmatpush.msrb.mxu3 %v6863_v9  ;;  %793 = vmatpush.msrb.mxu1 %v792_v62  ;;  %v1092_v54 = vand.u32 4294901760, %v1091_v15 }
  0x3e   :  { %686 = vmatpush.msrb.mxu0 %v6861_v6  ;;  %859 = vmatpush.msrb.mxu2 %v6912_v59  ;;  %v1098_v62 = vand.u32 4294901760, %v1097_v28 }
  0x3f   :  { %903 = vmatpush.msrb.mxu3 %v6878_v20  ;;  %799 = vmatpush.msrb.mxu1 %v798_v14  ;;  %v551_v14 = vld [vmem:[#allocation2 + $0x4c0] sm:$0xff] }
  0x40   :  { %688 = vmatpush.msrb.mxu0 %v6863_v9  ;;  %862 = vmatpush.msrb.mxu2 %v6924_v0 }
  0x41   :  { %905 = vmatpush.msrb.mxu3 %v6890_v26  ;;  %805 = vmatpush.msrb.mxu1 %v804_v12 }
  0x42   :  { %690 = vmatpush.msrb.mxu0 %v6878_v20  ;;  %865 = vmatpush.msrb.mxu2 %v6936_v10 }
  0x43   :  { %907 = vmatpush.msrb.mxu3 %v6902_v38  ;;  %811 = vmatpush.msrb.mxu1 %v810_v27  ;;  %v7147_v27 = vand.u32 4294901760, %v551_v14 }
  0x44   :  { %692 = vmatpush.msrb.mxu0 %v6890_v26  ;;  %868 = vmatpush.msrb.mxu2 %v6946_v23 }
  0x45   :  { %999 = vmatpush.msra.mxu1 %v6786_v29  ;;  %909 = vmatpush.msrb.mxu3 %v6914_v60  ;;  %v623_v29 = vld [vmem:[#allocation2 + $0x700] sm:$0xff] }
  0x46   :  { %1040 = vmatpush.msra.mxu2 %v6950_v11  ;;  %694 = vmatpush.msrb.mxu0 %v6902_v38 }
  0x47   :  { %1001 = vmatpush.msra.mxu1 %v6788_v30  ;;  %911 = vmatpush.msrb.mxu3 %v6926_v1  ;;  %v7059_v30 = vand.u32 4294901760, %v623_v29 }
  0x48   :  { %1042 = vmatpush.msra.mxu2 %v6959_v39  ;;  %696 = vmatpush.msrb.mxu0 %v6914_v60 }
  0x49   :  { %1003 = vmatpush.msra.mxu1 %v6790_v31  ;;  %1093 = vmatpush.msra.mxu3 %v1092_v54  ;;  %v7062_v31 = vsub.f32 %v631_v55, %v7012_v7  ;;  %v7071_v40 = vsub.f32 %v623_v29, %v7059_v30  ;;  %v543_v54 = vld [vmem:[#allocation2 + $0x480] sm:$0xff] }
  0x4a   :  { %1044 = vmatpush.msra.mxu2 %v7012_v7  ;;  %698 = vmatpush.msrb.mxu0 %v6926_v1  ;;  %v7160_v29 = vand.u32 4294901760, %v543_v54 }
  0x4b   :  { %1005 = vmatpush.msra.mxu1 %v6792_v35  ;;  %1099 = vmatpush.msra.mxu3 %v1098_v62  ;;  %v615_v35 = vld [vmem:[#allocation2 + $0x6c0] sm:$0xff] }
  0x4c   :  { %928 = vmatpush.msra.mxu0 %v718_v48  ;;  %1046 = vmatpush.msra.mxu2 %v7059_v30 }
  0x4d   :  { %1007 = vmatpush.msra.mxu1 %v6794_v36  ;;  %v1102_v36 = vand.u32 4294901760, %v7062_v31 }
  0x4e   :  { %932 = vmatpush.msra.mxu0 %v724_v49 }
  0x4f   :  { %1009 = vmatpush.msra.mxu1 %v6796_v37  ;;  %v7068_v37 = vand.u32 4294901760, %v615_v35  ;;  %v1103_v42 = vsub.f32 %v7062_v31, %v1102_v36 }
  0x50   :  { %936 = vmatpush.msra.mxu0 %v730_v50  ;;  %v7090_v50 = vand.u32 4294901760, %v599_v46 }
  0x51   :  { %1011 = vmatpush.msra.mxu1 %v6807_v43  ;;  %1048 = vmatpush.msra.mxu2 %v7068_v37  ;;  %v1108_v43 = vand.u32 4294901760, %v7071_v40  ;;  %v7083_v45 = vsub.f32 %v615_v35, %v7068_v37  ;;  %v7163_v35 = vsub.f32 %v551_v14, %v7147_v27 }
  0x52   :  { %940 = vmatpush.msra.mxu0 %v736_v51  ;;  %v7093_v51 = vsub.f32 %v607_v41, %v7080_v44 }
  0x53   :  { %1013 = vmatpush.msra.mxu1 %v6819_v47  ;;  %v1104_v47 = vand.u32 4294901760, %v1103_v42  ;;  %v1109_v48 = vsub.f32 %v7071_v40, %v1108_v43  ;;  %1050 = vmatpush.msra.mxu2 %v7080_v44  ;;  %v1114_v49 = vand.u32 4294901760, %v7083_v45  ;;  %v535_v42 = vld [vmem:[#allocation2 + $0x440] sm:$0xff] }
  0x54   :  { %944 = vmatpush.msra.mxu0 %v742_v52  ;;  %v591_v52 = vld [vmem:[#allocation2 + $0x600] sm:$0xff] }
  0x55   :  { %1015 = vmatpush.msra.mxu1 %v6859_v5  ;;  %1105 = vmatpush.msra.mxu3 %v1104_v47  ;;  %v1110_v53 = vand.u32 4294901760, %v1109_v48  ;;  %v7099_v58 = vand.u32 4294901760, %v591_v52  ;;  %v1120_v5 = vand.u32 4294901760, %v7093_v51  ;;  %v11007_v48 = vand.u32 4294901760, %v7163_v35 }
  0x56   :  { %948 = vmatpush.msra.mxu0 %v748_v57  ;;  %v1115_v57 = vsub.f32 %v7083_v45, %v1114_v49  ;;  %1052 = vmatpush.msra.mxu2 %v7090_v50 }
  0x57   :  { %1017 = vmatpush.msra.mxu1 %v6861_v6  ;;  %v583_v6 = vld [vmem:[#allocation2 + $0x5c0] sm:$0xff]  ;;  %1111 = vmatpush.msra.mxu3 %v1110_v53  ;;  %v7110_v18 = vsub.f32 %v591_v52, %v7099_v58  ;;  %v7170_v52 = vand.u32 4294901760, %v535_v42  ;;  %v7173_v53 = vsub.f32 %v543_v54, %v7160_v29 }
  0x58   :  { %952 = vmatpush.msra.mxu0 %v754_v2  ;;  %v7102_v2 = vsub.f32 %v599_v46, %v7090_v50  ;;  %1054 = vmatpush.msra.mxu2 %v7099_v58  ;;  %v7107_v17 = vand.u32 4294901760, %v583_v6 }
  0x59   :  { %1019 = vmatpush.msra.mxu1 %v6863_v9  ;;  %v1116_v9 = vand.u32 4294901760, %v1115_v57 }
  0x5a   :  { %956 = vmatpush.msra.mxu0 %v760_v13  ;;  %v1126_v13 = vand.u32 4294901760, %v7102_v2  ;;  %1056 = vmatpush.msra.mxu2 %v7107_v17  ;;  %v7123_v34 = vsub.f32 %v583_v6, %v7107_v17  ;;  %v1163_v6 = vsub.f32 %v7163_v35, %v11007_v48 }
  0x5b   :  { %1021 = vmatpush.msra.mxu1 %v6878_v20  ;;  %v1121_v20 = vsub.f32 %v7093_v51, %v1120_v5  ;;  %1117 = vmatpush.msra.mxu3 %v1116_v9  ;;  %v527_v9 = vld [vmem:[#allocation2 + $0x400] sm:$0xff] }
  0x5c   :  { %960 = vmatpush.msra.mxu0 %v766_v24  ;;  %v575_v24 = vld [vmem:[#allocation2 + $0x580] sm:$0xff]  ;;  %v1127_v25 = vsub.f32 %v7102_v2, %v1126_v13 }
  0x5d   :  { %1023 = vmatpush.msra.mxu1 %v6890_v26  ;;  %v1132_v26 = vand.u32 4294901760, %v7110_v18 }
  0x5e   :  { %964 = vmatpush.msra.mxu0 %v772_v33  ;;  %v7120_v33 = vand.u32 4294901760, %v575_v24  ;;  %v1128_v59 = vand.u32 4294901760, %v1127_v25  ;;  %v7183_v25 = vsub.f32 %v535_v42, %v7170_v52 }
  0x5f   :  { %1025 = vmatpush.msra.mxu1 %v6902_v38  ;;  %v1122_v38 = vand.u32 4294901760, %v1121_v20  ;;  %v11006_v20 = vand.u32 4294901760, %v7173_v53 }
  0x60   :  { %968 = vmatpush.msra.mxu0 %v778_v56  ;;  %v567_v56 = vld [vmem:[#allocation2 + $0x540] sm:$0xff]  ;;  %1058 = vmatpush.msra.mxu2 %v7120_v33 }
  0x61   :  { %1027 = vmatpush.msra.mxu1 %v6914_v60  ;;  %v1133_v60 = vsub.f32 %v7110_v18, %v1132_v26  ;;  %v7130_v0 = vand.u32 4294901760, %v567_v56  ;;  %1123 = vmatpush.msra.mxu3 %v1122_v38  ;;  %v1164_v38 = vand.u32 4294901760, %v1163_v6 }
  0x62   :  { %972 = vmatpush.msra.mxu0 %v784_v63  ;;  %v1138_v63 = vand.u32 4294901760, %v7123_v34 }
  0x63   :  { %1029 = vmatpush.msra.mxu1 %v6926_v1  ;;  %v7133_v1 = vsub.f32 %v575_v24, %v7120_v33  ;;  %v1134_v10 = vand.u32 4294901760, %v1133_v60  ;;  %1060 = vmatpush.msra.mxu2 %v7130_v0  ;;  %v7180_v24 = vand.u32 4294901760, %v527_v9 }
  0x64   :  { %976 = vmatpush.msra.mxu0 %v790_v4  ;;  %v559_v4 = vld [vmem:[#allocation2 + $0x500] sm:$0xff]  ;;  %1129 = vmatpush.msra.mxu3 %v1128_v59  ;;  %v11005_v59 = vand.u32 4294901760, %v7183_v25 }
  0x65   :  { %v7139_v23 = vand.u32 4294901760, %v559_v4  ;;  %v7191_v60 = vsub.f32 %v527_v9, %v7180_v24 }
  0x66   :  { %980 = vmatpush.msra.mxu0 %v796_v22  ;;  %v1139_v22 = vsub.f32 %v7123_v34, %v1138_v63  ;;  %1135 = vmatpush.msra.mxu3 %v1134_v10  ;;  %v1175_v10 = vsub.f32 %v7183_v25, %v11005_v59 }
  0x67   :  { %1062 = vmatpush.msra.mxu2 %v7139_v23  ;;  %v7150_v15 = vsub.f32 %v559_v4, %v7139_v23 }
  0x68   :  { %984 = vmatpush.msra.mxu0 %v802_v32  ;;  %v7142_v32 = vsub.f32 %v567_v56, %v7130_v0  ;;  %v1140_v16 = vand.u32 4294901760, %v1139_v22  ;;  %v1169_v56 = vsub.f32 %v7173_v53, %v11006_v20  ;;  %v11004_v22 = vand.u32 4294901760, %v7191_v60 }
  0x69   :  { %1064 = vmatpush.msra.mxu2 %v7147_v27  ;;  %v11008_v62 = vand.u32 4294901760, %v7150_v15  ;;  %v1176_v14 = vand.u32 4294901760, %v1175_v10 }
  0x6a   :  { %988 = vmatpush.msra.mxu0 %v808_v61  ;;  %v1144_v61 = vand.u32 4294901760, %v7133_v1  ;;  %v1150_v12 = vand.u32 4294901760, %v7142_v32  ;;  %1141 = vmatpush.msra.mxu3 %v1140_v16  ;;  %v1170_v4 = vand.u32 4294901760, %v1169_v56  ;;  %v1181_v16 = vsub.f32 %v7191_v60, %v11004_v22 }
  0x6b   :  { %v1157_v47 = vsub.f32 %v7150_v15, %v11008_v62  ;;  %1066 = vmatpush.msra.mxu2 %v7160_v29  ;;  %v6715_v56 = vmov 0  }
  0x6c   :  { %v1145_v28 = vsub.f32 %v7133_v1, %v1144_v61  ;;  %v1151_v55 = vsub.f32 %v7142_v32, %v1150_v12  ;;  %6659 = vset.pattern.permute.xlu0 %v6715_v56 }
  0x6d   :  { %v1158_v57 = vand.u32 4294901760, %v1157_v47  ;;  %1068 = vmatpush.msra.mxu2 %v7170_v52 }
  0x6e   :  { %v1146_v41 = vand.u32 4294901760, %v1145_v28  ;;  %v1152_v46 = vand.u32 4294901760, %v1151_v55  ;;  %v1182_v28 = vand.u32 4294901760, %v1181_v16 }
  0x6f   :  { %1070 = vmatpush.msra.mxu2 %v7180_v24 }
  0x70   :  { %1147 = vmatpush.msra.mxu3 %v1146_v41 }
  0x72   :  { %1153 = vmatpush.msra.mxu3 %v1152_v46 }
  0x74   :  { %1159 = vmatpush.msra.mxu3 %v1158_v57 }
  0x76   :  { %1165 = vmatpush.msra.mxu3 %v1164_v38 }
  0x78   :  { %1171 = vmatpush.msra.mxu3 %v1170_v4  ;;  %v655_v4 = vld [vmem:[%s11002_s3] sm:$0xff] }
  0x79   :  { %659 = vperm.xlu0 %6659, %v655_v4  }
  0x7a   :  { %1177 = vmatpush.msra.mxu3 %v1176_v14 }
  0x7c   :  { %1183 = vmatpush.msra.mxu3 %v1182_v28 }
  0x8f   :  { %v102_v55 = vpop.f32.mrf.mxu1 }
  0x90   :  { %v68_v54 = vpop.f32.mrf.mxu0  ;;  %v130_v41 = vpop.f32.mrf.mxu2 }
  0x91   :  { %v103_v46 = vadd.f32 %v102_v55, %v68_v54 }
  0x92   :  { %v159_v42 = vpop.f32.mrf.mxu3 }
  0x93   :  { %v131_v38 = vadd.f32 %v130_v41, %v103_v46 }
  0x95   :  { %v160_v10 = vadd.f32 %v159_v42, %v131_v38  ;;  %v656_v42 = vld [vmem:[%s11002_s3 + $0x8] sm:$0xff]  ;;  %s6716_s3 = smov [#allocation5]  }
  0x96   :  { %664 = vperm.xlu0 %6659, %v656_v42   ;;  %s6639_s5 = sshll.u32 %s6716_s3, 4  ;;  %s6640_s5 = int_to_ptr.vmem [resolvable:$true] %s6639_s5 }
  0x97   :  { %v106_v57 = vpop.f32.mrf.mxu1 }
  0x98   :  { %v76_v47 = vpop.f32.mrf.mxu0  ;;  %v135_v6 = vpop.f32.mrf.mxu2 }
  0x99   :  { %v107_v14 = vadd.f32 %v106_v57, %v76_v47 }
  0x9a   :  { %v165_v9 = vpop.f32.mrf.mxu3 }
  0x9b   :  { %v136_v54 = vadd.f32 %v135_v6, %v107_v14 }
  0x9d   :  { %v166_v62 = vadd.f32 %v165_v9, %v136_v54 }
  0x9f   :  { %v215_v28 = vpop.f32.mrf.mxu1 }
  0xa0   :  { %v189_v16 = vpop.f32.mrf.mxu0  ;;  %v245_v59 = vpop.f32.mrf.mxu2 }
  0xa1   :  { %v190_v22 = vadd.f32 %v189_v16, %v160_v10 }
  0xa2   :  { %v279_v20 = vpop.f32.mrf.mxu3 }
  0xa3   :  { %v216_v55 = vadd.f32 %v215_v28, %v190_v22 }
  0xa5   :  { %v7203_v48 = vand.u32 4294901760, %v216_v55 }
  0xa7   :  { %v7206_v41 = vsub.f32 %v216_v55, %v7203_v48  ;;  %813 = vmatmul.f32.vlgmr.msrb.gmra.mxu1 %v7203_v48  ;;  %v219_v47 = vpop.f32.mrf.mxu1 }
  0xa8   :  { %1253 = vmatpush.msrb.mxu1 %v6950_v11  ;;  %v193_v46 = vpop.f32.mrf.mxu0  ;;  %v253_v6 = vpop.f32.mrf.mxu2 }
  0xa9   :  { %11199 = vst [vmem:[#allocation8_spill] sm:$0xff] %v7206_v41  ;;  %v194_v57 = vadd.f32 %v193_v46, %v166_v62  ;;  %871 = vmatmul.f32.vlgmr.msrb.gmra.mxu2 %v7206_v41  ;;  %v7215_v22 = vand.u32 4294901760, %v7206_v41  ;;  %v280_v62 = vadd.f32 %v279_v20, %v245_v59 }
  0xaa   :  { %1255 = vmatpush.msrb.mxu1 %v6959_v39  ;;  %1300 = vmatpush.msrb.mxu2 %v1090_v21  ;;  %v283_v9 = vpop.f32.mrf.mxu3 }
  0xab   :  { %11200 = vst [vmem:[#allocation9_spill] sm:$0xff] %v7215_v22  ;;  %v220_v38 = vadd.f32 %v219_v47, %v194_v57  ;;  %915 = vmatmul.f32.vlgmr.msrb.gmra.mxu3 %v7215_v22  ;;  %v702_v56 = vsub.f32 %v7206_v41, %v7215_v22 }
  0xac   :  { %1257 = vmatpush.msrb.mxu1 %v7012_v7  ;;  %1304 = vmatpush.msrb.mxu2 %v1096_v19 }
  0xad   :  { %v7226_v4 = vand.u32 4294901760, %v220_v38  ;;  %1371 = vmatpush.msrb.mxu3 %v6950_v11  ;;  %v7229_v10 = vand.u32 4294901760, %v702_v56  ;;  %v480_v56 = vld [vmem:[#allocation2 + $0x288] sm:$0xff] }
  0xae   :  { %1259 = vmatpush.msrb.mxu1 %v7059_v30  ;;  %1308 = vmatpush.msrb.mxu2 %v1102_v36 }
  0xaf   :  { %11201 = vst [vmem:[#allocation10_spill] sm:$0xff] %v7226_v4  ;;  %v7235_v21 = vsub.f32 %v220_v38, %v7226_v4  ;;  %1373 = vmatpush.msrb.mxu3 %v6959_v39  ;;  %704 = vmatmul.f32.vlgmr.msrb.gmra.mxu0 %v7229_v10  ;;  %v336_v11 = vpop.f32.mrf.mxu1 }
  0xb0   :  { %11202 = vst [vmem:[#allocation11_spill] sm:$0xff] %v7229_v10  ;;  %817 = vmatmul.f32.gmra.mxu1 %v7226_v4  ;;  %1195 = vmatpush.msrb.mxu0 %v6969_v8  ;;  %v307_v19 = vpop.f32.mrf.mxu0  ;;  %v366_v59 = vpop.f32.mrf.mxu2 }
  0xb1   :  { %1261 = vmatpush.msrb.mxu1 %v7068_v37  ;;  %1312 = vmatpush.msrb.mxu2 %v1108_v43  ;;  %v308_v20 = vadd.f32 %v307_v19, %v280_v62  ;;  %v7245_v36 = vand.u32 4294901760, %v7235_v21  ;;  %v284_v43 = vadd.f32 %v283_v9, %v253_v6  ;;  %v11209_v62 = vand.u32 4294901760, %v7150_v15 }
  0xb2   :  { %1375 = vmatpush.msrb.mxu3 %v7012_v7  ;;  %876 = vmatmul.f32.gmra.mxu2 %v7235_v21  ;;  %v392_v39 = vpop.f32.mrf.mxu3 }
  0xb3   :  { %1198 = vmatpush.msrb.mxu0 %v6978_v3  ;;  %1263 = vmatpush.msrb.mxu1 %v7080_v44  ;;  %v337_v8 = vadd.f32 %v336_v11, %v308_v20  ;;  %v710_v14 = vsub.f32 %v7235_v21, %v7245_v36  ;;  %v520_v3 = vld [vmem:[#allocation2 + $0x3c8] sm:$0xff] }
  0xb4   :  { %1316 = vmatpush.msrb.mxu2 %v1114_v49  ;;  %1377 = vmatpush.msrb.mxu3 %v7059_v30  ;;  %v7272_v54 = vand.u32 4294901760, %v520_v3  ;;  %v472_v20 = vld [vmem:[#allocation2 + $0x248] sm:$0xff] }
  0xb5   :  { %921 = vmatmul.f32.gmra.mxu3 %v7245_v36  ;;  %1201 = vmatpush.msrb.mxu0 %v7062_v31  ;;  %v367_v7 = vadd.f32 %v366_v59, %v337_v8  ;;  %v7258_v16 = vand.u32 4294901760, %v710_v14  ;;  %v7346_v59 = vand.u32 4294901760, %v480_v56  ;;  %v7362_v14 = vand.u32 4294901760, %v472_v20 }
  0xb6   :  { %1265 = vmatpush.msrb.mxu1 %v7090_v50  ;;  %1320 = vmatpush.msrb.mxu2 %v1120_v5 }
  0xb7   :  { %1379 = vmatpush.msrb.mxu3 %v7068_v37  ;;  %1204 = vmatpush.msrb.mxu0 %v7071_v40  ;;  %v393_v49 = vadd.f32 %v392_v39, %v367_v7  ;;  %v342_v31 = vpop.f32.mrf.mxu1  ;;  %v512_v37 = vld [vmem:[#allocation2 + $0x388] sm:$0xff] }
  0xb8   :  { %1267 = vmatpush.msrb.mxu1 %v7099_v58  ;;  %1324 = vmatpush.msrb.mxu2 %v1126_v13  ;;  %v312_v30 = vpop.f32.mrf.mxu0  ;;  %v370_v40 = vpop.f32.mrf.mxu2  ;;  %v504_v13 = vld [vmem:[#allocation2 + $0x348] sm:$0xff]  ;;  %v7284_v46 = vand.u32 4294901760, %v512_v37 }
  0xb9   :  { %1381 = vmatpush.msrb.mxu3 %v7080_v44  ;;  %v7269_v28 = vand.u32 4294901760, %v393_v49  ;;  %712 = vmatmul.f32.gmra.mxu0 %v7258_v16  ;;  %v313_v5 = vadd.f32 %v312_v30, %v284_v43  ;;  %v464_v43 = vld [vmem:[#allocation2 + $0x208] sm:$0xff]  ;;  %v7374_v30 = vsub.f32 %v480_v56, %v7346_v59 }
  0xba   :  { %1031 = vmatmul.f32.vlgmr.msra.gmra.mxu1 %v7203_v48  ;;  %1207 = vmatpush.msrb.mxu0 %v7083_v45  ;;  %v396_v42 = vpop.f32.mrf.mxu3 }
  0xbb   :  { %11203 = vst [vmem:[#allocation12_spill] sm:$0xff] %v7269_v28  ;;  %v7277_v55 = vsub.f32 %v393_v49, %v7269_v28  ;;  %1269 = vmatpush.msrb.mxu1 %v7107_v17  ;;  %1328 = vmatpush.msrb.mxu2 %v1132_v26  ;;  %v343_v44 = vadd.f32 %v342_v31, %v313_v5  ;;  %v456_v31 = vld [vmem:[#allocation2 + $0x1c8] sm:$0xff] }
  0xbc   :  { %1383 = vmatpush.msrb.mxu3 %v7090_v50  ;;  %1210 = vmatpush.msrb.mxu0 %v7093_v51  ;;  %v7293_v26 = vsub.f32 %v520_v3, %v7272_v54  ;;  %v7297_v50 = vand.u32 4294901760, %v504_v13  ;;  %v496_v51 = vld [vmem:[#allocation2 + $0x308] sm:$0xff]  ;;  %v11212_v3 = vand.u32 4294901760, %v7173_v53 }
  0xbd   :  { %11204 = vst [vmem:[#allocation13_spill] sm:$0xff] %v7277_v55  ;;  %v7287_v45 = vand.u32 4294901760, %v7277_v55  ;;  %1271 = vmatpush.msrb.mxu1 %v7120_v33  ;;  %1332 = vmatpush.msrb.mxu2 %v1138_v63  ;;  %v371_v47 = vadd.f32 %v370_v40, %v343_v44  ;;  %v7314_v38 = vand.u32 4294901760, %v496_v51  ;;  %v7387_v44 = vsub.f32 %v472_v20, %v7362_v14 }
  0xbe   :  { %1385 = vmatpush.msrb.mxu3 %v7099_v58  ;;  %1213 = vmatpush.msrb.mxu0 %v7102_v2  ;;  %v7307_v58 = vsub.f32 %v512_v37, %v7284_v46  ;;  %v488_v2 = vld [vmem:[#allocation2 + $0x2c8] sm:$0xff]  ;;  %v11023_v9 = vand.u32 4294901760, %v7293_v26  ;;  %v7381_v37 = vand.u32 4294901760, %v464_v43 }
  0xbf   :  { %11205 = vst [vmem:[#allocation14_spill] sm:$0xff] %v7287_v45  ;;  %1185 = vmatmul.f32.vlgmr.msra.gmra.mxu3 %v7269_v28  ;;  %1273 = vmatpush.msrb.mxu1 %v7130_v0  ;;  %v397_v57 = vadd.f32 %v396_v42, %v371_v47  ;;  %v1074_v63 = vsub.f32 %v7277_v55, %v7287_v45  ;;  %v7393_v42 = vand.u32 4294901760, %v456_v31 }
  0xc0   :  { %1336 = vmatpush.msrb.mxu2 %v1144_v61  ;;  %1387 = vmatpush.msrb.mxu3 %v7107_v17  ;;  %v7320_v17 = vsub.f32 %v504_v13, %v7297_v50  ;;  %v1463_v19 = vsub.f32 %v7293_v26, %v11023_v9  ;;  %v7341_v11 = vsub.f32 %v496_v51, %v7314_v38  ;;  %v448_v13 = vld [vmem:[#allocation2 + $0x188] sm:$0xff] }
  0xc1   :  { %1216 = vmatpush.msrb.mxu0 %v7110_v18  ;;  %1275 = vmatpush.msrb.mxu1 %v7139_v23  ;;  %v7311_v6 = vand.u32 4294901760, %v397_v57  ;;  %v7327_v18 = vand.u32 4294901760, %v488_v2  ;;  %v440_v51 = vld [vmem:[#allocation2 + $0x148] sm:$0xff]  ;;  %v7407_v56 = vsub.f32 %v464_v43, %v7381_v37 }
  0xc2   :  { %1340 = vmatpush.msrb.mxu2 %v1150_v12  ;;  %1389 = vmatpush.msrb.mxu3 %v7120_v33  ;;  %v7331_v12 = vand.u32 4294901760, %v1074_v63  ;;  %v11022_v33 = vand.u32 4294901760, %v7307_v58  ;;  %v1464_v7 = vand.u32 4294901760, %v1463_v19  ;;  %v7416_v19 = vsub.f32 %v456_v31, %v7393_v42 }
  0xc3   :  { %11206 = vst [vmem:[#allocation15_spill] sm:$0xff] %v7311_v6  ;;  %v7323_v61 = vsub.f32 %v397_v57, %v7311_v6  ;;  %990 = vmatmul.f32.vlgmr.msra.gmra.mxu0 %v7203_v48  ;;  %1035 = vmatmul.f32.gmra.mxu1 %v7226_v4  ;;  %v7355_v8 = vsub.f32 %v488_v2, %v7327_v18  ;;  %v11214_v57 = vand.u32 4294901760, %v7191_v60  ;;  %v7418_v20 = vand.u32 4294901760, %v440_v51 }
  0xc4   :  { %1219 = vmatpush.msrb.mxu0 %v7123_v34  ;;  %1277 = vmatpush.msrb.mxu1 %v7147_v27  ;;  %11208 = vst [vmem:[#allocation17_spill] sm:$0xff] %v7331_v12  ;;  %v11020_v34 = vand.u32 4294901760, %v7320_v17  ;;  %v11009_v31 = vand.u32 4294901760, %v7416_v19 }
  0xc5   :  { %11207 = vst [vmem:[#allocation16_spill] sm:$0xff] %v7323_v61  ;;  %1344 = vmatpush.msrb.mxu2 %v11209_v62  ;;  %1391 = vmatpush.msrb.mxu3 %v7130_v0  ;;  %v7349_v39 = vand.u32 4294901760, %v7323_v61  ;;  %v11211_v0 = vand.u32 4294901760, %v7163_v35  ;;  %v11015_v5 = vand.u32 4294901760, %v7355_v8  ;;  %v11011_v62 = vand.u32 4294901760, %v7387_v44 }
  0xc6   :  { %1222 = vmatpush.msrb.mxu0 %v7133_v1  ;;  %1279 = vmatpush.msrb.mxu1 %v7160_v29  ;;  %v1469_v1 = vsub.f32 %v7307_v58, %v11022_v33  ;;  %v1475_v49 = vsub.f32 %v7320_v17, %v11020_v34 }
  0xc7   :  { %11210 = vst [vmem:[#allocation18_spill] sm:$0xff] %v7349_v39  ;;  %1348 = vmatpush.msrb.mxu2 %v11211_v0  ;;  %1393 = vmatpush.msrb.mxu3 %v7139_v23  ;;  %v11017_v23 = vand.u32 4294901760, %v7341_v11  ;;  %v1487_v2 = vsub.f32 %v7355_v8, %v11015_v5  ;;  %v432_v0 = vld [vmem:[#allocation2 + $0x108] sm:$0xff] }
  0xc8   :  { %1076 = vmatmul.f32.vlgmr.msra.gmra.mxu2 %v7331_v12  ;;  %1189 = vmatmul.f32.gmra.mxu3 %v7311_v6  ;;  %v1470_v40 = vand.u32 4294901760, %v1469_v1  ;;  %v1476_v47 = vand.u32 4294901760, %v1475_v49  ;;  %v7435_v49 = vand.u32 4294901760, %v432_v0  ;;  %v648_v5 = vld [vmem:[#allocation2 + $0x7c8] sm:$0xff] }
  0xc9   :  { %1225 = vmatpush.msrb.mxu0 %v7142_v32  ;;  %1281 = vmatpush.msrb.mxu1 %v7170_v52  ;;  %v1082_v32 = vsub.f32 %v7323_v61, %v7349_v39 }
  0xca   :  { %1352 = vmatpush.msrb.mxu2 %v11212_v3  ;;  %1395 = vmatpush.msrb.mxu3 %v7147_v27  ;;  %v11213_v27 = vand.u32 4294901760, %v7183_v25  ;;  %v1499_v3 = vsub.f32 %v7387_v44, %v11011_v62 }
  0xcb   :  { %1228 = vmatpush.msrb.mxu0 %v7150_v15  ;;  %1283 = vmatpush.msrb.mxu1 %v7180_v24  ;;  %v1481_v15 = vsub.f32 %v7341_v11, %v11017_v23  ;;  %v7401_v63 = vand.u32 4294901760, %v1082_v32  ;;  %v7440_v32 = vsub.f32 %v440_v51, %v7418_v20  ;;  %v7517_v23 = vand.u32 4294901760, %v648_v5 }
  0xcc   :  { %1356 = vmatpush.msrb.mxu2 %v11213_v27  ;;  %1397 = vmatpush.msrb.mxu3 %v7160_v29  ;;  %v11014_v29 = vand.u32 4294901760, %v7374_v30  ;;  %v416_v27 = vld [vmem:[#allocation2 + $0x88] sm:$0xff]  ;;  %v1500_v51 = vand.u32 4294901760, %v1499_v3 }
  0xcd   :  { %1465 = vmatpush.msra.mxu1 %v1464_v7  ;;  %994 = vmatmul.f32.gmra.mxu0 %v7226_v4  ;;  %11215 = vst [vmem:[#allocation19_spill] sm:$0xff] %v7401_v63  ;;  %v424_v7 = vld [vmem:[#allocation2 + $0xc8] sm:$0xff] }
  0xce   :  { %1231 = vmatpush.msrb.mxu0 %v7163_v35  ;;  %1287 = vmatmul.f32.vlgmr.msrb.gmra.mxu1 %v7287_v45  ;;  %v7409_v35 = vand.u32 4294901760, %v448_v13  ;;  %v1493_v1 = vsub.f32 %v7374_v30, %v11014_v29 }
  0xcf   :  { %1360 = vmatpush.msrb.mxu2 %v11214_v57  ;;  %1399 = vmatpush.msrb.mxu3 %v7170_v52  ;;  %v1482_v52 = vand.u32 4294901760, %v1481_v15  ;;  %v7456_v57 = vand.u32 4294901760, %v416_v27 }
  0xd0   :  { %1471 = vmatpush.msra.mxu1 %v1470_v40  ;;  %1234 = vmatpush.msrb.mxu0 %v7173_v53  ;;  %v1488_v53 = vand.u32 4294901760, %v1487_v2  ;;  %v7428_v43 = vsub.f32 %v448_v13, %v7409_v35  ;;  %v7444_v40 = vand.u32 4294901760, %v424_v7  ;;  %v1511_v2 = vsub.f32 %v7416_v19, %v11009_v31 }
  0xd1   :  { %1567 = vmatpush.msra.mxu2 %v7293_v26  ;;  %1401 = vmatpush.msrb.mxu3 %v7180_v24  ;;  %v11010_v24 = vand.u32 4294901760, %v7407_v56 }
  0xd2   :  { %1477 = vmatpush.msra.mxu1 %v1476_v47  ;;  %1084 = vmatmul.f32.gmra.mxu2 %v7401_v63  ;;  %v11012_v15 = vand.u32 4294901760, %v7428_v43  ;;  %v408_v47 = vld [vmem:[#allocation2 + $0x48] sm:$0xff]  ;;  %v1512_v62 = vand.u32 4294901760, %v1511_v2 }
  0xd3   :  { %1570 = vmatpush.msra.mxu2 %v7307_v58  ;;  %1625 = vmatpush.msra.mxu3 %v7272_v54  ;;  %v1505_v13 = vsub.f32 %v7407_v56, %v11010_v24  ;;  %v568_v63 = vld [vmem:[#allocation2 + $0x548] sm:$0xff] }
  0xd4   :  { %1237 = vmatpush.msrb.mxu0 %v7183_v25  ;;  %1403 = vmatmul.f32.vlgmr.msrb.gmra.mxu3 %v7269_v28  ;;  %v1494_v25 = vand.u32 4294901760, %v1493_v1  ;;  %v400_v1 = vld [vmem:[#allocation2 + $0x8] sm:$0xff]  ;;  %v1517_v31 = vsub.f32 %v7428_v43, %v11012_v15 }
  0xd5   :  { %1483 = vmatpush.msra.mxu1 %v1482_v52  ;;  %1573 = vmatpush.msra.mxu2 %v7320_v17  ;;  %v11013_v52 = vand.u32 4294901760, %v7440_v32  ;;  %v1506_v3 = vand.u32 4294901760, %v1505_v13 }
  0xd6   :  { %1627 = vmatpush.msra.mxu3 %v7284_v46  ;;  %1240 = vmatpush.msrb.mxu0 %v7191_v60  ;;  %v7454_v60 = vsub.f32 %v432_v0, %v7435_v49  ;;  %v7468_v0 = vand.u32 4294901760, %v408_v47  ;;  %v1518_v15 = vand.u32 4294901760, %v1517_v31 }
  0xd7   :  { %1489 = vmatpush.msra.mxu1 %v1488_v53  ;;  %1576 = vmatpush.msra.mxu2 %v7341_v11  ;;  %v7466_v53 = vsub.f32 %v424_v7, %v7444_v40  ;;  %v7480_v7 = vand.u32 4294901760, %v400_v1  ;;  %v1523_v13 = vsub.f32 %v7440_v32, %v11013_v52 }
  0xd8   :  { %1412 = vmatpush.msra.mxu0 %v7272_v54  ;;  %1629 = vmatpush.msra.mxu3 %v7297_v50  ;;  %v11016_v24 = vand.u32 4294901760, %v7454_v60 }
  0xd9   :  { %1243 = vmatmul.f32.vlgmr.msrb.gmra.mxu0 %v7277_v55  ;;  %1293 = vmatmul.f32.gmra.mxu1 %v7349_v39  ;;  %v7501_v29 = vsub.f32 %v400_v1, %v7480_v7  ;;  %v640_v1 = vld [vmem:[#allocation2 + $0x788] sm:$0xff] }
  0xda   :  { %1414 = vmatpush.msra.mxu0 %v7284_v46  ;;  %1495 = vmatpush.msra.mxu1 %v1494_v25  ;;  %v7478_v25 = vsub.f32 %v416_v27, %v7456_v57  ;;  %v7491_v27 = vsub.f32 %v408_v47, %v7468_v0  ;;  %v1529_v2 = vsub.f32 %v7454_v60, %v11016_v24  ;;  %v1524_v47 = vand.u32 4294901760, %v1523_v13  ;;  %v592_v39 = vld [vmem:[#allocation2 + $0x608] sm:$0xff] }
  0xdb   :  { %1579 = vmatpush.msra.mxu2 %v7355_v8  ;;  %1631 = vmatpush.msra.mxu3 %v7314_v38  ;;  %11217 = vst [vmem:[#allocation21_spill] sm:$0xff] %v7501_v29  ;;  %v11024_v24 = vand.u32 4294901760, %v7501_v29 }
  0xdc   :  { %1416 = vmatpush.msra.mxu0 %v7297_v50  ;;  %1501 = vmatpush.msra.mxu1 %v1500_v51  ;;  %v11018_v51 = vand.u32 4294901760, %v7466_v53  ;;  %11216 = vst [vmem:[#allocation20_spill] sm:$0xff] %v7491_v27  ;;  %v11019_v52 = vand.u32 4294901760, %v7478_v25 }
  0xdd   :  { %1582 = vmatpush.msra.mxu2 %v7374_v30  ;;  %1633 = vmatpush.msra.mxu3 %v7327_v18  ;;  %v1553_v34 = vsub.f32 %v7501_v29, %v11024_v24 }
  0xde   :  { %1362 = vmatmul.f32.vlgmr.msrb.gmra.mxu2 %v7269_v28  ;;  %1407 = vmatmul.f32.gmra.mxu3 %v7311_v6  ;;  %v1535_v31 = vsub.f32 %v7466_v53, %v11018_v51  ;;  %v1541_v13 = vsub.f32 %v7478_v25, %v11019_v52  ;;  %v7525_v51 = vand.u32 4294901760, %v640_v1  ;;  %v632_v52 = vld [vmem:[#allocation2 + $0x748] sm:$0xff] }
  0xdf   :  { %1418 = vmatpush.msra.mxu0 %v7314_v38  ;;  %1507 = vmatpush.msra.mxu1 %v1506_v3  ;;  %v11021_v3 = vand.u32 4294901760, %v7491_v27  ;;  %v7539_v9 = vand.u32 4294901760, %v632_v52 }
  0xe0   :  { %1585 = vmatpush.msra.mxu2 %v7387_v44  ;;  %1635 = vmatpush.msra.mxu3 %v7346_v59 }
  0xe1   :  { %1420 = vmatpush.msra.mxu0 %v7327_v18  ;;  %1513 = vmatpush.msra.mxu1 %v1512_v62  ;;  %v1530_v62 = vand.u32 4294901760, %v1529_v2  ;;  %v1547_v2 = vsub.f32 %v7491_v27, %v11021_v3  ;;  %v624_v3 = vld [vmem:[#allocation2 + $0x708] sm:$0xff] }
  0xe2   :  { %1588 = vmatpush.msra.mxu2 %v7407_v56  ;;  %1637 = vmatpush.msra.mxu3 %v7362_v14 }
  0xe3   :  { %1248 = vmatmul.f32.gmra.mxu0 %v7323_v61  ;;  %1519 = vmatpush.msra.mxu1 %v1518_v15  ;;  %v1536_v15 = vand.u32 4294901760, %v1535_v31  ;;  %v7534_v31 = vsub.f32 %v648_v5, %v7517_v23  ;;  %v1548_v33 = vand.u32 4294901760, %v1547_v2  ;;  %v616_v5 = vld [vmem:[#allocation2 + $0x6c8] sm:$0xff]  ;;  %v7548_v61 = vand.u32 4294901760, %v624_v3 }
  0xe4   :  { %1422 = vmatpush.msra.mxu0 %v7346_v59  ;;  %1591 = vmatpush.msra.mxu2 %v7416_v19  ;;  %v7555_v2 = vsub.f32 %v632_v52, %v7539_v9  ;;  %v7557_v55 = vand.u32 4294901760, %v616_v5  ;;  %v600_v52 = vld [vmem:[#allocation2 + $0x648] sm:$0xff] }
  0xe5   :  { %1639 = vmatpush.msra.mxu3 %v7381_v37  ;;  %1525 = vmatpush.msra.mxu1 %v1524_v47  ;;  %v1542_v47 = vand.u32 4294901760, %v1541_v13  ;;  %v1554_v13 = vand.u32 4294901760, %v1553_v34  ;;  %v11029_v24 = vand.u32 4294901760, %v7534_v31  ;;  %v7583_v45 = vand.u32 4294901760, %v600_v52 }
  0xe6   :  { %1424 = vmatpush.msra.mxu0 %v7362_v14  ;;  %1594 = vmatpush.msra.mxu2 %v7428_v43  ;;  %11218 = vst [vmem:[#allocation22_spill] sm:$0xff] %v7555_v2 }
  0xe7   :  { %1641 = vmatpush.msra.mxu3 %v7393_v42  ;;  %1366 = vmatmul.f32.gmra.mxu2 %v7311_v6  ;;  %v1835_v34 = vsub.f32 %v7534_v31, %v11029_v24  ;;  %v584_v24 = vld [vmem:[#allocation2 + $0x5c8] sm:$0xff] }
  0xe8   :  { %1426 = vmatpush.msra.mxu0 %v7381_v37  ;;  %1531 = vmatpush.msra.mxu1 %v1530_v62  ;;  %v7542_v62 = vsub.f32 %v640_v1, %v7525_v51 }
  0xe9   :  { %1597 = vmatpush.msra.mxu2 %v7440_v32  ;;  %1643 = vmatpush.msra.mxu3 %v7409_v35  ;;  %v1836_v6 = vand.u32 4294901760, %v1835_v34 }
  0xea   :  { %1428 = vmatpush.msra.mxu0 %v7393_v42  ;;  %1537 = vmatpush.msra.mxu1 %v1536_v15  ;;  %v608_v15 = vld [vmem:[#allocation2 + $0x688] sm:$0xff]  ;;  %v11038_v1 = vand.u32 4294901760, %v7542_v62 }
  0xeb   :  { %1600 = vmatpush.msra.mxu2 %v7454_v60  ;;  %1645 = vmatpush.msra.mxu3 %v7418_v20 }
  0xec   :  { %1430 = vmatpush.msra.mxu0 %v7409_v35  ;;  %1543 = vmatpush.msra.mxu1 %v1542_v47  ;;  %v7568_v47 = vand.u32 4294901760, %v608_v15 }
  0xed   :  { %1603 = vmatpush.msra.mxu2 %v7466_v53  ;;  %1647 = vmatpush.msra.mxu3 %v7435_v49 }
  0xee   :  { %1432 = vmatpush.msra.mxu0 %v7418_v20  ;;  %1549 = vmatpush.msra.mxu1 %v1548_v33  ;;  %v7566_v33 = vsub.f32 %v624_v3, %v7548_v61  ;;  %v7579_v3 = vsub.f32 %v616_v5, %v7557_v55 }
  0xef   :  { %1606 = vmatpush.msra.mxu2 %v7478_v25  ;;  %1649 = vmatpush.msra.mxu3 %v7444_v40 }
  0xf0   :  { %1434 = vmatpush.msra.mxu0 %v7435_v49  ;;  %1555 = vmatpush.msra.mxu1 %v1554_v13  ;;  %11219 = vst [vmem:[#allocation23_spill] sm:$0xff] %v7566_v33  ;;  %v1841_v13 = vsub.f32 %v7542_v62, %v11038_v1  ;;  %v7589_v1 = vsub.f32 %v608_v15, %v7568_v47  ;;  %v576_v15 = vld [vmem:[#allocation2 + $0x588] sm:$0xff] }
  0xf1   :  { %1609 = vmatpush.msra.mxu2 %v7491_v27  ;;  %1651 = vmatpush.msra.mxu3 %v7456_v57  ;;  %11220 = vst [vmem:[#allocation24_spill] sm:$0xff] %v7579_v3 }
  0xf2   :  { %1557 = vmatmul.f32.vlgmr.msra.gmra.mxu1 %v7203_v48  ;;  %1436 = vmatpush.msra.mxu0 %v7444_v40  ;;  %v1842_v5 = vand.u32 4294901760, %v1841_v13  ;;  %v11222_v13 = vand.u32 4294901760, %v7566_v33 }
  0xf3   :  { %1743 = vmatpush.msrb.mxu1 %v7272_v54  ;;  %1612 = vmatpush.msra.mxu2 %v7501_v29  ;;  %v7593_v54 = vand.u32 4294901760, %v592_v39  ;;  %v7606_v29 = vand.u32 4294901760, %v584_v24 }
  0xf4   :  { %1653 = vmatpush.msra.mxu3 %v7468_v0  ;;  %1615 = vmatmul.f32.vlgmr.msra.gmra.mxu2 %v7206_v41  ;;  %v11221_v41 = vand.u32 4294901760, %v7555_v2  ;;  %v1853_v27 = vsub.f32 %v7566_v33, %v11222_v13  ;;  %v560_v33 = vld [vmem:[#allocation2 + $0x508] sm:$0xff] }
  0xf5   :  { %1745 = vmatpush.msrb.mxu1 %v7284_v46  ;;  %1784 = vmatpush.msrb.mxu2 %v7517_v23  ;;  %v7604_v46 = vsub.f32 %v600_v52, %v7583_v45  ;;  %v7618_v52 = vand.u32 4294901760, %v576_v15 }
  0xf6   :  { %1438 = vmatpush.msra.mxu0 %v7456_v57  ;;  %1655 = vmatpush.msra.mxu3 %v7480_v7  ;;  %v1847_v34 = vsub.f32 %v7555_v2, %v11221_v41  ;;  %v7630_v41 = vand.u32 4294901760, %v568_v63  ;;  %v11225_v2 = vand.u32 4294901760, %v7293_v26 }
  0xf7   :  { %1659 = vmatmul.f32.vlgmr.msra.gmra.mxu3 %v7215_v22  ;;  %1747 = vmatpush.msrb.mxu1 %v7297_v50  ;;  %v7616_v50 = vsub.f32 %v592_v39, %v7593_v54  ;;  %v11223_v22 = vand.u32 4294901760, %v7579_v3  ;;  %v7628_v39 = vsub.f32 %v584_v24, %v7606_v29  ;;  %v11227_v26 = vand.u32 4294901760, %v7604_v46  ;;  %v536_v24 = vld [vmem:[#allocation2 + $0x448] sm:$0xff] }
  0xf8   :  { %1786 = vmatpush.msrb.mxu2 %v7525_v51  ;;  %1837 = vmatpush.msrb.mxu3 %v1836_v6  ;;  %v1848_v6 = vand.u32 4294901760, %v1847_v34  ;;  %v11224_v34 = vand.u32 4294901760, %v7589_v1 }
  0xf9   :  { %1440 = vmatpush.msra.mxu0 %v7468_v0  ;;  %1749 = vmatpush.msrb.mxu1 %v7314_v38  ;;  %v1859_v13 = vsub.f32 %v7579_v3, %v11223_v22  ;;  %v552_v3 = vld [vmem:[#allocation2 + $0x4c8] sm:$0xff]  ;;  %v7642_v38 = vsub.f32 %v576_v15, %v7618_v52  ;;  %v7655_v15 = vsub.f32 %v568_v63, %v7630_v41 }
  0xfa   :  { %1788 = vmatpush.msrb.mxu2 %v7539_v9  ;;  %1843 = vmatpush.msrb.mxu3 %v1842_v5  ;;  %v1854_v5 = vand.u32 4294901760, %v1853_v27  ;;  %v1865_v22 = vsub.f32 %v7589_v1, %v11224_v34  ;;  %v544_v27 = vld [vmem:[#allocation2 + $0x488] sm:$0xff]  ;;  %v11226_v34 = vand.u32 4294901760, %v7307_v58  ;;  %v11228_v58 = vand.u32 4294901760, %v7320_v17 }
  0xfb   :  { %1442 = vmatpush.msra.mxu0 %v7480_v7  ;;  %1561 = vmatmul.f32.gmra.mxu1 %v7226_v4  ;;  %v7644_v4 = vand.u32 4294901760, %v560_v33  ;;  %v11230_v17 = vand.u32 4294901760, %v7341_v11 }
  0xfc   :  { %1448 = vmatmul.f32.vlgmr.msra.gmra.mxu0 %v7229_v10  ;;  %1751 = vmatpush.msrb.mxu1 %v7327_v18  ;;  %v1860_v18 = vand.u32 4294901760, %v1859_v13  ;;  %v7657_v10 = vand.u32 4294901760, %v552_v3 }
  0xfd   :  { %1672 = vmatpush.msrb.mxu0 %v11225_v2  ;;  %1790 = vmatpush.msrb.mxu2 %v7548_v61  ;;  %v1871_v2 = vsub.f32 %v7604_v46, %v11227_v26  ;;  %v7668_v63 = vsub.f32 %v560_v33, %v7644_v4  ;;  %v7670_v26 = vand.u32 4294901760, %v544_v27 }
  0xfe   :  { %1849 = vmatpush.msrb.mxu3 %v1848_v6  ;;  %1620 = vmatmul.f32.gmra.mxu2 %v7235_v21  ;;  %v1866_v6 = vand.u32 4294901760, %v1865_v22  ;;  %v11231_v22 = vand.u32 4294901760, %v7628_v39  ;;  %v7681_v33 = vsub.f32 %v552_v3, %v7657_v10 }
  0xff   :  { %1676 = vmatpush.msrb.mxu0 %v11226_v34  ;;  %1753 = vmatpush.msrb.mxu1 %v7346_v59  ;;  %v11229_v59 = vand.u32 4294901760, %v7616_v50  ;;  %v528_v34 = vld [vmem:[#allocation2 + $0x408] sm:$0xff]  ;;  %v7693_v3 = vsub.f32 %v544_v27, %v7670_v26  ;;  %v11234_v27 = vand.u32 4294901760, %v7374_v30 }
 0x100   :  { %1792 = vmatpush.msrb.mxu2 %v7557_v55  ;;  %1855 = vmatpush.msrb.mxu3 %v1854_v5  ;;  %v1872_v5 = vand.u32 4294901760, %v1871_v2 }
 0x101   :  { %1665 = vmatmul.f32.gmra.mxu3 %v7245_v36  ;;  %1680 = vmatpush.msrb.mxu0 %v11228_v58  ;;  %v1877_v13 = vsub.f32 %v7616_v50, %v11229_v59  ;;  %v1883_v58 = vsub.f32 %v7628_v39, %v11231_v22  ;;  %v1894_v59 = vand.u32 4294901760, %v7655_v15  ;;  %v11233_v22 = vand.u32 4294901760, %v7355_v8 }
 0x102   :  { %1755 = vmatpush.msrb.mxu1 %v7362_v14  ;;  %1794 = vmatpush.msrb.mxu2 %v7568_v47  ;;  %v7685_v14 = vand.u32 4294901760, %v536_v24 }
 0x103   :  { %1861 = vmatpush.msrb.mxu3 %v1860_v18  ;;  %1684 = vmatpush.msrb.mxu0 %v11230_v17  ;;  %v1878_v11 = vand.u32 4294901760, %v1877_v13  ;;  %v11232_v18 = vand.u32 4294901760, %v7642_v38  ;;  %v1900_v17 = vand.u32 4294901760, %v7668_v63  ;;  %v1895_v13 = vsub.f32 %v7655_v15, %v1894_v59 }
 0x104   :  { %1757 = vmatpush.msrb.mxu1 %v7381_v37  ;;  %1796 = vmatpush.msrb.mxu2 %v7583_v45  ;;  %v7698_v37 = vand.u32 4294901760, %v528_v34  ;;  %v7709_v8 = vsub.f32 %v536_v24, %v7685_v14 }
 0x105   :  { %1867 = vmatpush.msrb.mxu3 %v1866_v6  ;;  %1456 = vmatmul.f32.gmra.mxu0 %v7258_v16  ;;  %v1889_v2 = vsub.f32 %v7642_v38, %v11232_v18  ;;  %v1884_v6 = vand.u32 4294901760, %v1883_v58  ;;  %v1906_v18 = vand.u32 4294901760, %v7681_v33  ;;  %v1912_v58 = vand.u32 4294901760, %v7693_v3 }
 0x106   :  { %1688 = vmatpush.msrb.mxu0 %v11233_v22  ;;  %1759 = vmatpush.msrb.mxu1 %v7393_v42  ;;  %v11235_v22 = vand.u32 4294901760, %v7387_v44  ;;  %v7720_v30 = vsub.f32 %v528_v34, %v7698_v37  ;;  %v1918_v44 = vand.u32 4294901760, %v7709_v8 }
 0x107   :  { %1798 = vmatpush.msrb.mxu2 %v7593_v54  ;;  %1873 = vmatpush.msrb.mxu3 %v1872_v5  ;;  %v1890_v42 = vand.u32 4294901760, %v1889_v2  ;;  %v1901_v5 = vsub.f32 %v7668_v63, %v1900_v17  ;;  %v1907_v24 = vsub.f32 %v7681_v33, %v1906_v18  ;;  %v1913_v34 = vsub.f32 %v7693_v3, %v1912_v58 }
 0x108   :  { %1692 = vmatpush.msrb.mxu0 %v11234_v27  ;;  %1761 = vmatpush.msrb.mxu1 %v7409_v35  ;;  %v1896_v35 = vand.u32 4294901760, %v1895_v13  ;;  %v11237_v2 = vand.u32 4294901760, %v7416_v19  ;;  %v1919_v13 = vsub.f32 %v7709_v8, %v1918_v44 }
 0x109   :  { %1800 = vmatpush.msrb.mxu2 %v7606_v29  ;;  %1879 = vmatpush.msrb.mxu3 %v1878_v11  ;;  %v11236_v11 = vand.u32 4294901760, %v7407_v56  ;;  %v1924_v56 = vand.u32 4294901760, %v7720_v30  ;;  %v1914_v19 = vand.u32 4294901760, %v1913_v34  ;;  %v11254_v34 = vld [vmem:[#allocation19_spill] sm:$0xff] }
 0x10a   :  { %1696 = vmatpush.msrb.mxu0 %v11235_v22  ;;  %1763 = vmatpush.msrb.mxu1 %v7418_v20  ;;  %v1902_v20 = vand.u32 4294901760, %v1901_v5  ;;  %v1920_v27 = vand.u32 4294901760, %v1919_v13  ;;  %v11247_v22 = vld [vmem:[#allocation22_spill] sm:$0xff] }
 0x10b   :  { %1802 = vmatpush.msrb.mxu2 %v7618_v52  ;;  %1885 = vmatpush.msrb.mxu3 %v1884_v6  ;;  %v11238_v6 = vand.u32 4294901760, %v7428_v43  ;;  %v1925_v43 = vsub.f32 %v7720_v30, %v1924_v56  ;;  %v505_v13 = vld [vmem:[#allocation2 + $0x350] sm:$0xff] }
 0x10c   :  { %1700 = vmatpush.msrb.mxu0 %v11236_v11  ;;  %1765 = vmatpush.msrb.mxu1 %v7435_v49  ;;  %v1908_v49 = vand.u32 4294901760, %v1907_v24  ;;  %v11251_v11 = vld [vmem:[#allocation10_spill] sm:$0xff] }
 0x10d   :  { %1804 = vmatpush.msrb.mxu2 %v7630_v41  ;;  %1891 = vmatpush.msrb.mxu3 %v1890_v42  ;;  %v11245_v42 = vld [vmem:[#allocation20_spill] sm:$0xff] }
 0x10e   :  { %1704 = vmatpush.msrb.mxu0 %v11237_v2  ;;  %1767 = vmatpush.msrb.mxu1 %v7444_v40  ;;  %v11239_v40 = vand.u32 4294901760, %v7440_v32  ;;  %v11241_v32 = vand.u32 4294901760, %v7466_v53  ;;  %v11244_v53 = vand.u32 4294901760, %v7542_v62  ;;  %v11246_v5 = vand.u32 4294901760, %v11245_v42 }
 0x10f   :  { %1806 = vmatpush.msrb.mxu2 %v7644_v4  ;;  %1897 = vmatpush.msrb.mxu3 %v1896_v35  ;;  %v11248_v35 = vand.u32 4294901760, %v11247_v22 }
 0x110   :  { %1708 = vmatpush.msrb.mxu0 %v11238_v6  ;;  %1769 = vmatpush.msrb.mxu1 %v7456_v57  ;;  %v11240_v57 = vand.u32 4294901760, %v7454_v60  ;;  %v11242_v60 = vand.u32 4294901760, %v7534_v31  ;;  %v11257_v6 = vld [vmem:[#allocation15_spill] sm:$0xff] }
 0x111   :  { %1808 = vmatpush.msrb.mxu2 %v7657_v10  ;;  %1903 = vmatpush.msrb.mxu3 %v1902_v20 }
 0x112   :  { %1712 = vmatpush.msrb.mxu0 %v11239_v40  ;;  %1771 = vmatpush.msrb.mxu1 %v7468_v0  ;;  %v1926_v0 = vand.u32 4294901760, %v1925_v43  ;;  %v11260_v40 = vand.u32 4294901760, %v7616_v50 }
 0x113   :  { %1810 = vmatpush.msrb.mxu2 %v7670_v26  ;;  %1909 = vmatpush.msrb.mxu3 %v1908_v49  ;;  %v521_v49 = vld [vmem:[#allocation2 + $0x3d0] sm:$0xff] }
 0x114   :  { %1716 = vmatpush.msrb.mxu0 %v11240_v57  ;;  %1773 = vmatpush.msrb.mxu1 %v7480_v7  ;;  %v11243_v7 = vand.u32 4294901760, %v7478_v25  ;;  %v11249_v25 = vld [vmem:[#allocation21_spill] sm:$0xff]  ;;  %v7818_v57 = vand.u32 4294901760, %v505_v13 }
 0x115   :  { %1812 = vmatpush.msrb.mxu2 %v7685_v14  ;;  %1915 = vmatpush.msrb.mxu3 %v1914_v19  ;;  %v11250_v24 = vand.u32 4294901760, %v11249_v25 }
 0x116   :  { %1775 = vmatmul.f32.vlgmr.msrb.gmra.mxu1 %v7203_v48  ;;  %1720 = vmatpush.msrb.mxu0 %v11241_v32 }
 0x117   :  { %1997 = vmatpush.msra.mxu1 %v7517_v23  ;;  %1814 = vmatpush.msrb.mxu2 %v7698_v37 }
 0x118   :  { %1921 = vmatpush.msrb.mxu3 %v1920_v27  ;;  %1820 = vmatmul.f32.vlgmr.msrb.gmra.mxu2 %v7331_v12 }
 0x119   :  { %1999 = vmatpush.msra.mxu1 %v7525_v51  ;;  %2044 = vmatpush.msra.mxu2 %v11242_v60  ;;  %v7837_v60 = vsub.f32 %v505_v13, %v7818_v57 }
 0x11a   :  { %1724 = vmatpush.msrb.mxu0 %v11243_v7  ;;  %1927 = vmatpush.msrb.mxu3 %v1926_v0  ;;  %v11262_v0 = vand.u32 4294901760, %v7642_v38 }
 0x11b   :  { %1929 = vmatmul.f32.vlgmr.msrb.gmra.mxu3 %v7269_v28  ;;  %2001 = vmatpush.msra.mxu1 %v7539_v9 }
 0x11c   :  { %2048 = vmatpush.msra.mxu2 %v11244_v53  ;;  %2115 = vmatpush.msra.mxu3 %v7517_v23  ;;  %v11252_v23 = vld [vmem:[#allocation23_spill] sm:$0xff] }
 0x11d   :  { %1728 = vmatpush.msrb.mxu0 %v11246_v5  ;;  %2003 = vmatpush.msra.mxu1 %v7548_v61  ;;  %v11253_v20 = vand.u32 4294901760, %v11252_v23  ;;  %v465_v5 = vld [vmem:[#allocation2 + $0x210] sm:$0xff] }
 0x11e   :  { %2052 = vmatpush.msra.mxu2 %v11248_v35  ;;  %2117 = vmatpush.msra.mxu3 %v7525_v51  ;;  %v11255_v51 = vld [vmem:[#allocation24_spill] sm:$0xff]  ;;  %v457_v35 = vld [vmem:[#allocation2 + $0x1d0] sm:$0xff] }
 0x11f   :  { %1732 = vmatpush.msrb.mxu0 %v11250_v24  ;;  %1779 = vmatmul.f32.gmra.mxu1 %v11251_v11  ;;  %v11256_v2 = vand.u32 4294901760, %v11255_v51  ;;  %v7890_v24 = vand.u32 4294901760, %v465_v5 }
 0x120   :  { %1734 = vmatmul.f32.vlgmr.msrb.gmra.mxu0 %v7203_v48  ;;  %2005 = vmatpush.msra.mxu1 %v7557_v55 }
 0x121   :  { %1939 = vmatpush.msra.mxu0 %v7534_v31  ;;  %2056 = vmatpush.msra.mxu2 %v11253_v20  ;;  %v513_v31 = vld [vmem:[#allocation2 + $0x390] sm:$0xff]  ;;  %v7904_v20 = vand.u32 4294901760, %v457_v35 }
 0x122   :  { %2119 = vmatpush.msra.mxu3 %v7539_v9  ;;  %1828 = vmatmul.f32.gmra.mxu2 %v11254_v34  ;;  %v11258_v9 = vand.u32 4294901760, %v7589_v1  ;;  %v7808_v19 = vand.u32 4294901760, %v513_v31 }
 0x123   :  { %1942 = vmatpush.msra.mxu0 %v7542_v62  ;;  %2007 = vmatpush.msra.mxu1 %v7568_v47  ;;  %v7801_v62 = vand.u32 4294901760, %v521_v49 }
 0x124   :  { %2060 = vmatpush.msra.mxu2 %v11256_v2  ;;  %2121 = vmatpush.msra.mxu3 %v7548_v61  ;;  %v11259_v61 = vand.u32 4294901760, %v7604_v46  ;;  %v7826_v27 = vsub.f32 %v513_v31, %v7808_v19  ;;  %v7918_v31 = vsub.f32 %v465_v5, %v7890_v24 }
 0x125   :  { %1933 = vmatmul.f32.gmra.mxu3 %v11257_v6  ;;  %1945 = vmatpush.msra.mxu0 %v11247_v22  ;;  %v7816_v43 = vsub.f32 %v521_v49, %v7801_v62 }
 0x126   :  { %2009 = vmatpush.msra.mxu1 %v7583_v45  ;;  %2064 = vmatpush.msra.mxu2 %v11258_v9 }
 0x127   :  { %2123 = vmatpush.msra.mxu3 %v7557_v55  ;;  %1948 = vmatpush.msra.mxu0 %v11252_v23  ;;  %v497_v55 = vld [vmem:[#allocation2 + $0x310] sm:$0xff] }
 0x128   :  { %2011 = vmatpush.msra.mxu1 %v7593_v54  ;;  %2068 = vmatpush.msra.mxu2 %v11259_v61  ;;  %v7828_v32 = vand.u32 4294901760, %v497_v55  ;;  %v441_v61 = vld [vmem:[#allocation2 + $0x150] sm:$0xff] }
 0x129   :  { %2125 = vmatpush.msra.mxu3 %v7568_v47  ;;  %1738 = vmatmul.f32.gmra.mxu0 %v11251_v11  ;;  %v11261_v47 = vand.u32 4294901760, %v7628_v39 }
 0x12a   :  { %1951 = vmatpush.msra.mxu0 %v11255_v51  ;;  %2013 = vmatpush.msra.mxu1 %v7606_v29  ;;  %v7850_v53 = vsub.f32 %v497_v55, %v7828_v32  ;;  %v11263_v51 = vld [vmem:[#allocation14_spill] sm:$0xff] }
 0x12b   :  { %2072 = vmatpush.msra.mxu2 %v11260_v40  ;;  %2127 = vmatpush.msra.mxu3 %v7583_v45  ;;  %v489_v45 = vld [vmem:[#allocation2 + $0x2d0] sm:$0xff]  ;;  %v7930_v40 = vsub.f32 %v457_v35, %v7904_v20 }
 0x12c   :  { %1954 = vmatpush.msra.mxu0 %v7589_v1  ;;  %2015 = vmatpush.msra.mxu1 %v7618_v52  ;;  %v11063_v1 = vand.u32 4294901760, %v7816_v43  ;;  %v7843_v7 = vpop.f32.mrf.mxu0  ;;  %v7914_v49 = vpop.f32.mrf.mxu2 }
 0x12d   :  { %2076 = vmatpush.msra.mxu2 %v11261_v47  ;;  %2129 = vmatpush.msra.mxu3 %v7593_v54  ;;  %v7841_v54 = vand.u32 4294901760, %v489_v45  ;;  %v433_v47 = vld [vmem:[#allocation2 + $0x110] sm:$0xff]  ;;  %v11062_v35 = vand.u32 4294901760, %v7930_v40 }
 0x12e   :  { %1957 = vmatpush.msra.mxu0 %v7604_v46  ;;  %2017 = vmatpush.msra.mxu1 %v7630_v41  ;;  %v481_v46 = vld [vmem:[#allocation2 + $0x290] sm:$0xff]  ;;  %v7908_v2 = vpop.f32.mrf.mxu3  ;;  %v7950_v5 = vand.u32 4294901760, %v433_v47 }
 0x12f   :  { %2080 = vmatpush.msra.mxu2 %v11262_v0  ;;  %2131 = vmatpush.msra.mxu3 %v7606_v29  ;;  %v11061_v29 = vand.u32 4294901760, %v7826_v27  ;;  %v7861_v42 = vand.u32 4294901760, %v481_v46 }
 0x130   :  { %1960 = vmatpush.msra.mxu0 %v7616_v50  ;;  %2019 = vmatpush.msra.mxu1 %v7644_v4  ;;  %v473_v50 = vld [vmem:[#allocation2 + $0x250] sm:$0xff] }
 0x131   :  { %2084 = vmatpush.msra.mxu2 %v1894_v59  ;;  %2133 = vmatpush.msra.mxu3 %v7618_v52  ;;  %v2207_v59 = vsub.f32 %v7816_v43, %v11063_v1  ;;  %v11060_v52 = vand.u32 4294901760, %v7837_v60  ;;  %v7875_v22 = vand.u32 4294901760, %v473_v50  ;;  %v7888_v25 = vsub.f32 %v481_v46, %v7861_v42 }
 0x132   :  { %1963 = vmatpush.msra.mxu0 %v7628_v39  ;;  %2021 = vmatpush.msra.mxu1 %v7657_v10  ;;  %v7866_v39 = vsub.f32 %v489_v45, %v7841_v54  ;;  %v7936_v45 = vand.u32 4294901760, %v441_v61  ;;  %v11057_v46 = vand.u32 4294901760, %v7918_v31 }
 0x133   :  { %2088 = vmatpush.msra.mxu2 %v1900_v17  ;;  %2135 = vmatpush.msra.mxu3 %v7630_v41  ;;  %v2213_v41 = vsub.f32 %v7826_v27, %v11061_v29  ;;  %v11059_v17 = vand.u32 4294901760, %v7850_v53  ;;  %v7902_v23 = vsub.f32 %v473_v50, %v7875_v22  ;;  %v11056_v9 = vand.u32 4294901760, %v7888_v25  ;;  %v425_v50 = vld [vmem:[#allocation2 + $0xd0] sm:$0xff] }
 0x134   :  { %1966 = vmatpush.msra.mxu0 %v7642_v38  ;;  %2023 = vmatpush.msra.mxu1 %v7670_v26  ;;  %v7879_v38 = vpop.f32.mrf.mxu1 }
 0x135   :  { %2092 = vmatpush.msra.mxu2 %v1906_v18  ;;  %2137 = vmatpush.msra.mxu3 %v7644_v4  ;;  %v2208_v4 = vand.u32 4294901760, %v2207_v59  ;;  %v2219_v18 = vsub.f32 %v7837_v60, %v11060_v52  ;;  %v11055_v55 = vand.u32 4294901760, %v7902_v23  ;;  %v2237_v0 = vsub.f32 %v7888_v25, %v11056_v9 }
 0x136   :  { %1969 = vmatpush.msra.mxu0 %v7655_v15  ;;  %2025 = vmatpush.msra.mxu1 %v7685_v14  ;;  %v11058_v15 = vand.u32 4294901760, %v7866_v39 }
 0x137   :  { %2096 = vmatpush.msra.mxu2 %v1912_v58  ;;  %2139 = vmatpush.msra.mxu3 %v7657_v10  ;;  %v2214_v10 = vand.u32 4294901760, %v2213_v41  ;;  %v2225_v58 = vsub.f32 %v7850_v53, %v11059_v17  ;;  %v2243_v41 = vsub.f32 %v7902_v23, %v11055_v55 }
 0x138   :  { %1972 = vmatpush.msra.mxu0 %v7668_v63  ;;  %2027 = vmatpush.msra.mxu1 %v7698_v37  ;;  %v449_v63 = vld [vmem:[#allocation2 + $0x190] sm:$0xff]  ;;  %v7973_v55 = vpop.f32.mrf.mxu3 }
 0x139   :  { %2100 = vmatpush.msra.mxu2 %v1918_v44  ;;  %2141 = vmatpush.msra.mxu3 %v7670_v26  ;;  %v7910_v44 = vpop.f32.mrf.mxu0  ;;  %v2220_v26 = vand.u32 4294901760, %v2219_v18  ;;  %v7925_v13 = vand.u32 4294901760, %v449_v63 }
 0x13a   :  { %2031 = vmatmul.f32.vlgmr.msra.gmra.mxu1 %v11263_v51  ;;  %1975 = vmatpush.msra.mxu0 %v7681_v33  ;;  %v2231_v33 = vsub.f32 %v7866_v39, %v11058_v15  ;;  %v401_v15 = vld [vmem:[#allocation2 + $0x10] sm:$0xff] }
 0x13b   :  { %2209 = vmatpush.msrb.mxu1 %v2208_v4  ;;  %2104 = vmatpush.msra.mxu2 %v1924_v56  ;;  %v2226_v56 = vand.u32 4294901760, %v2225_v58  ;;  %v7948_v59 = vsub.f32 %v449_v63, %v7925_v13  ;;  %v417_v4 = vld [vmem:[#allocation2 + $0x90] sm:$0xff]  ;;  %v7964_v58 = vand.u32 4294901760, %v425_v50  ;;  %v2238_v63 = vand.u32 4294901760, %v2237_v0 }
 0x13c   :  { %2143 = vmatpush.msra.mxu3 %v7685_v14  ;;  %2106 = vmatmul.f32.vlgmr.msra.gmra.mxu2 %v7269_v28  ;;  %v7934_v14 = vpop.permute.xlu0 %659  ;;  %v2244_v0 = vand.u32 4294901760, %v2243_v41  ;;  %v8010_v1 = vand.u32 4294901760, %v401_v15 }
 0x13d   :  { %2215 = vmatpush.msrb.mxu1 %v2214_v10  ;;  %2311 = vmatpush.msrb.mxu2 %v7816_v43  ;;  %11264 = vst [vmem:[#allocation20_spill] sm:$0xff] %v7934_v14  ;;  %v706_v18 = vadd.f32 %v7843_v7, %v7934_v14  ;;  %v7962_v10 = vsub.f32 %v441_v61, %v7936_v45  ;;  %v11064_v7 = vand.u32 4294901760, %v7948_v59  ;;  %v641_v14 = vld [vmem:[#allocation2 + $0x790] sm:$0xff] }
 0x13e   :  { %1978 = vmatpush.msra.mxu0 %v7693_v3  ;;  %2145 = vmatpush.msra.mxu3 %v7698_v37  ;;  %v2232_v3 = vand.u32 4294901760, %v2231_v33  ;;  %v7945_v37 = vpop.f32.mrf.mxu1  ;;  %v409_v33 = vld [vmem:[#allocation2 + $0x50] sm:$0xff]  ;;  %v7976_v61 = vsub.f32 %v433_v47, %v7950_v5  ;;  %v7994_v52 = vsub.f32 %v425_v50, %v7964_v58 }
 0x13f   :  { %2147 = vmatmul.f32.vlgmr.msra.gmra.mxu3 %v7269_v28  ;;  %2221 = vmatpush.msrb.mxu1 %v2220_v26  ;;  %v2249_v26 = vsub.f32 %v7918_v31, %v11057_v46  ;;  %v7987_v46 = vpop.f32.mrf.mxu2  ;;  %v815_v47 = vadd.f32 %v7879_v38, %v706_v18  ;;  %v7996_v29 = vand.u32 4294901760, %v409_v33  ;;  %v2261_v38 = vsub.f32 %v7948_v59, %v11064_v7 }
 0x140   :  { %2314 = vmatpush.msrb.mxu2 %v7826_v27  ;;  %2369 = vmatpush.msrb.mxu3 %v7801_v62  ;;  %v11269_v7 = vand.u32 4294901760, %v7962_v10 }
 0x141   :  { %1981 = vmatpush.msra.mxu0 %v7709_v8  ;;  %2227 = vmatpush.msrb.mxu1 %v2226_v56  ;;  %v11265_v8 = vld [vmem:[#allocation18_spill] sm:$0xff]  ;;  %v11266_v56 = vld [vmem:[#allocation13_spill] sm:$0xff]  ;;  %v7978_v9 = vpop.f32.mrf.mxu0  ;;  %v2250_v41 = vand.u32 4294901760, %v2249_v26  ;;  %v873_v26 = vadd.f32 %v7914_v49, %v815_v47 }
 0x142   :  { %2317 = vmatpush.msrb.mxu2 %v7837_v60  ;;  %2371 = vmatpush.msrb.mxu3 %v7808_v19  ;;  %v2267_v18 = vsub.f32 %v7962_v10, %v11269_v7  ;;  %v1186_v47 = vpop.f32.mrf.mxu3 }
 0x143   :  { %1984 = vmatpush.msra.mxu0 %v7720_v30  ;;  %2037 = vmatmul.f32.gmra.mxu1 %v11265_v8  ;;  %v7980_v30 = vand.u32 4294901760, %v417_v4  ;;  %v11273_v8 = vld [vmem:[#allocation16_spill] sm:$0xff] }
 0x144   :  { %1987 = vmatmul.f32.vlgmr.msra.gmra.mxu0 %v11266_v56  ;;  %2233 = vmatpush.msrb.mxu1 %v2232_v3  ;;  %v2255_v3 = vsub.f32 %v7930_v40, %v11062_v35  ;;  %v8001_v35 = vpop.permute.xlu0 %664  ;;  %v8021_v56 = vsub.f32 %v409_v33, %v7996_v29  ;;  %v8033_v33 = vsub.f32 %v401_v15, %v8010_v1 }
 0x145   :  { %2156 = vmatpush.msrb.mxu0 %v7801_v62  ;;  %2320 = vmatpush.msrb.mxu2 %v7850_v53  ;;  %11267 = vst [vmem:[#allocation22_spill] sm:$0xff] %v8001_v35  ;;  %v8008_v50 = vsub.f32 %v417_v4, %v7980_v30  ;;  %v714_v49 = vadd.f32 %v7910_v44, %v8001_v35  ;;  %v649_v4 = vld [vmem:[#allocation2 + $0x7d0] sm:$0xff] }
 0x146   :  { %2373 = vmatpush.msrb.mxu3 %v7818_v57  ;;  %2110 = vmatmul.f32.gmra.mxu2 %v11257_v6  ;;  %v1032_v17 = vpop.f32.mrf.mxu1  ;;  %11270 = vst [vmem:[#allocation10_spill] sm:$0xff] %v8021_v56  ;;  %v917_v44 = vadd.f32 %v7908_v2, %v873_v26  ;;  %v8046_v2 = vand.u32 4294901760, %v649_v4  ;;  %v11070_v15 = vand.u32 4294901760, %v8033_v33 }
 0x147   :  { %2158 = vmatpush.msrb.mxu0 %v7808_v19  ;;  %2239 = vmatpush.msrb.mxu1 %v2238_v63  ;;  %11268 = vst [vmem:[#allocation21_spill] sm:$0xff] %v8008_v50  ;;  %v2256_v63 = vand.u32 4294901760, %v2255_v3  ;;  %v11271_v3 = vand.u32 4294901760, %v7976_v61  ;;  %v11275_v26 = vand.u32 4294901760, %v8008_v50 }
 0x148   :  { %2323 = vmatpush.msrb.mxu2 %v7866_v39  ;;  %2375 = vmatpush.msrb.mxu3 %v7828_v32  ;;  %11272 = vst [vmem:[#allocation23_spill] sm:$0xff] %v8033_v33 }
 0x149   :  { %2151 = vmatmul.f32.gmra.mxu3 %v11257_v6  ;;  %2160 = vmatpush.msrb.mxu0 %v7818_v57  ;;  %v2273_v7 = vsub.f32 %v7976_v61, %v11271_v3  ;;  %v8056_v6 = vand.u32 4294901760, %v641_v14 }
 0x14a   :  { %2245 = vmatpush.msrb.mxu1 %v2244_v0  ;;  %2326 = vmatpush.msrb.mxu2 %v7888_v25  ;;  %v2262_v0 = vand.u32 4294901760, %v2261_v38  ;;  %v11274_v38 = vand.u32 4294901760, %v7994_v52  ;;  %v995_v35 = vpop.f32.mrf.mxu0 }
 0x14b   :  { %2377 = vmatpush.msrb.mxu3 %v7841_v54  ;;  %2162 = vmatpush.msrb.mxu0 %v7828_v32  ;;  %v1077_v51 = vpop.f32.mrf.mxu2  ;;  %v1190_v28 = vpop.f32.mrf.mxu3 }
 0x14c   :  { %2251 = vmatpush.msrb.mxu1 %v2250_v41  ;;  %2329 = vmatpush.msrb.mxu2 %v7902_v23  ;;  %v2268_v41 = vand.u32 4294901760, %v2267_v18  ;;  %v2279_v3 = vsub.f32 %v7994_v52, %v11274_v38  ;;  %v2274_v18 = vand.u32 4294901760, %v2273_v7  ;;  %v2285_v38 = vsub.f32 %v8008_v50, %v11275_v26 }
 0x14d   :  { %2379 = vmatpush.msrb.mxu3 %v7861_v42  ;;  %1992 = vmatmul.f32.gmra.mxu0 %v11273_v8  ;;  %v819_v8 = vadd.f32 %v7945_v37, %v714_v49  ;;  %v11276_v49 = vand.u32 4294901760, %v8021_v56  ;;  %v8066_v7 = vsub.f32 %v649_v4, %v8046_v2 }
 0x14e   :  { %2164 = vmatpush.msrb.mxu0 %v7841_v54  ;;  %2257 = vmatpush.msrb.mxu1 %v2256_v63  ;;  %v992_v63 = vadd.f32 %v7978_v9, %v917_v44  ;;  %v2280_v37 = vand.u32 4294901760, %v2279_v3  ;;  %v633_v44 = vld [vmem:[#allocation2 + $0x750] sm:$0xff]  ;;  %v1036_v26 = vpop.f32.mrf.mxu1  ;;  %v2297_v3 = vsub.f32 %v8033_v33, %v11070_v15 }
 0x14f   :  { %2332 = vmatpush.msrb.mxu2 %v7918_v31  ;;  %2381 = vmatpush.msrb.mxu3 %v7875_v22  ;;  %v2291_v9 = vsub.f32 %v8021_v56, %v11276_v49  ;;  %11277 = vst [vmem:[#allocation24_spill] sm:$0xff] %v8066_v7  ;;  %v8078_v34 = vand.u32 4294901760, %v633_v44 }
 0x150   :  { %2166 = vmatpush.msrb.mxu0 %v7861_v42  ;;  %2263 = vmatpush.msrb.mxu1 %v2262_v0  ;;  %v878_v0 = vadd.f32 %v7987_v46, %v819_v8  ;;  %v1033_v49 = vadd.f32 %v1032_v17, %v992_v63  ;;  %v8075_v46 = vsub.f32 %v641_v14, %v8056_v6  ;;  %v625_v8 = vld [vmem:[#allocation2 + $0x710] sm:$0xff]  ;;  %v11074_v17 = vand.u32 4294901760, %v8066_v7 }
 0x151   :  { %2335 = vmatpush.msrb.mxu2 %v7930_v40  ;;  %2383 = vmatpush.msrb.mxu3 %v7890_v24  ;;  %v2292_v4 = vand.u32 4294901760, %v2291_v9  ;;  %v617_v63 = vld [vmem:[#allocation2 + $0x6d0] sm:$0xff]  ;;  %v2298_v14 = vand.u32 4294901760, %v2297_v3 }
 0x152   :  { %2168 = vmatpush.msrb.mxu0 %v7875_v22  ;;  %2269 = vmatpush.msrb.mxu1 %v2268_v41  ;;  %v2286_v41 = vand.u32 4294901760, %v2285_v38  ;;  %11278 = vst [vmem:[#allocation25_spill] sm:$0xff] %v8075_v46  ;;  %v923_v38 = vadd.f32 %v7973_v55, %v878_v0  ;;  %v609_v0 = vld [vmem:[#allocation2 + $0x690] sm:$0xff]  ;;  %v8094_v3 = vand.u32 4294901760, %v617_v63 }
 0x153   :  { %2338 = vmatpush.msrb.mxu2 %v7948_v59  ;;  %2385 = vmatpush.msrb.mxu3 %v7904_v20 }
 0x154   :  { %2170 = vmatpush.msrb.mxu0 %v7890_v24  ;;  %2275 = vmatpush.msrb.mxu1 %v2274_v18  ;;  %v1078_v18 = vadd.f32 %v1077_v51, %v1033_v49  ;;  %v996_v55 = vadd.f32 %v995_v35, %v923_v38  ;;  %v8092_v49 = vsub.f32 %v633_v44, %v8078_v34  ;;  %v601_v38 = vld [vmem:[#allocation2 + $0x650] sm:$0xff]  ;;  %v8105_v44 = vand.u32 4294901760, %v609_v0 }
 0x155   :  { %2341 = vmatpush.msrb.mxu2 %v7962_v10  ;;  %2387 = vmatpush.msrb.mxu3 %v7925_v13  ;;  %v1085_v15 = vpop.f32.mrf.mxu2  ;;  %v2579_v35 = vsub.f32 %v8066_v7, %v11074_v17  ;;  %v593_v17 = vld [vmem:[#allocation2 + $0x610] sm:$0xff] }
 0x156   :  { %2172 = vmatpush.msrb.mxu0 %v7904_v20  ;;  %2281 = vmatpush.msrb.mxu1 %v2280_v37  ;;  %v8085_v37 = vand.u32 4294901760, %v625_v8  ;;  %v1244_v51 = vpop.f32.mrf.mxu0  ;;  %11279 = vst [vmem:[#allocation26_spill] sm:$0xff] %v8092_v49 }
 0x157   :  { %2344 = vmatpush.msrb.mxu2 %v7976_v61  ;;  %2389 = vmatpush.msrb.mxu3 %v7936_v45 }
 0x158   :  { %2174 = vmatpush.msrb.mxu0 %v7925_v13  ;;  %2287 = vmatpush.msrb.mxu1 %v2286_v41  ;;  %v1187_v41 = vadd.f32 %v1186_v47, %v1078_v18  ;;  %v11280_v47 = vand.u32 4294901760, %v8075_v46 }
 0x159   :  { %2347 = vmatpush.msrb.mxu2 %v7994_v52  ;;  %2391 = vmatpush.msrb.mxu3 %v7950_v5 }
 0x15a   :  { %2176 = vmatpush.msrb.mxu0 %v7936_v45  ;;  %2293 = vmatpush.msrb.mxu1 %v2292_v4  ;;  %v1245_v9 = vadd.f32 %v1244_v51, %v1187_v41  ;;  %v8103_v4 = vsub.f32 %v625_v8, %v8085_v37  ;;  %v2585_v18 = vsub.f32 %v8075_v46, %v11280_v47  ;;  %v8118_v41 = vand.u32 4294901760, %v601_v38 }
 0x15b   :  { %2350 = vmatpush.msrb.mxu2 %v8008_v50  ;;  %2393 = vmatpush.msrb.mxu3 %v7964_v58  ;;  %v1037_v50 = vadd.f32 %v1036_v26, %v996_v55  ;;  %v8116_v51 = vsub.f32 %v617_v63, %v8094_v3  ;;  %v11281_v26 = vld [vmem:[#allocation8_spill] sm:$0xff]  ;;  %v8126_v46 = vsub.f32 %v609_v0, %v8105_v44  ;;  %v8128_v8 = vand.u32 4294901760, %v593_v17  ;;  %v585_v63 = vld [vmem:[#allocation2 + $0x5d0] sm:$0xff]  ;;  %v1404_v0 = vpop.f32.mrf.mxu3 }
 0x15c   :  { %2178 = vmatpush.msrb.mxu0 %v7950_v5  ;;  %2299 = vmatpush.msrb.mxu1 %v2298_v14  ;;  %v1288_v14 = vpop.f32.mrf.mxu1  ;;  %v8143_v12 = vand.u32 4294901760, %v585_v63 }
 0x15d   :  { %2353 = vmatpush.msrb.mxu2 %v8021_v56  ;;  %2395 = vmatpush.msrb.mxu3 %v7980_v30  ;;  %v2580_v56 = vand.u32 4294901760, %v2579_v35  ;;  %v1086_v47 = vadd.f32 %v1085_v15, %v1037_v50  ;;  %11282 = vst [vmem:[#allocation27_spill] sm:$0xff] %v8126_v46  ;;  %v1289_v7 = vadd.f32 %v1288_v14, %v1245_v9  ;;  %v11283_v50 = vand.u32 4294901760, %v8092_v49  ;;  %v577_v14 = vld [vmem:[#allocation2 + $0x590] sm:$0xff] }
 0x15e   :  { %2301 = vmatmul.f32.vlgmr.msrb.gmra.mxu1 %v7203_v48  ;;  %2180 = vmatpush.msrb.mxu0 %v7964_v58 }
 0x15f   :  { %2487 = vmatpush.msra.mxu1 %v7801_v62  ;;  %2356 = vmatpush.msrb.mxu2 %v8033_v33  ;;  %v2586_v62 = vand.u32 4294901760, %v2585_v18  ;;  %v2591_v15 = vsub.f32 %v8092_v49, %v11283_v50  ;;  %v11284_v33 = vld [vmem:[#allocation9_spill] sm:$0xff]  ;;  %v1191_v18 = vadd.f32 %v1190_v28, %v1086_v47  ;;  %v11285_v50 = vand.u32 4294901760, %v8103_v4 }
 0x160   :  { %2397 = vmatpush.msrb.mxu3 %v7996_v29  ;;  %2359 = vmatmul.f32.vlgmr.msrb.gmra.mxu2 %v11281_v26  ;;  %v8139_v26 = vsub.f32 %v601_v38, %v8118_v41  ;;  %v1249_v9 = vpop.f32.mrf.mxu0  ;;  %v11085_v38 = vand.u32 4294901760, %v8126_v46  ;;  %v8151_v49 = vsub.f32 %v593_v17, %v8128_v8  ;;  %v11286_v47 = vand.u32 4294901760, %v8116_v51 }
 0x161   :  { %2489 = vmatpush.msra.mxu1 %v7808_v19  ;;  %2528 = vmatpush.msra.mxu2 %v8046_v2  ;;  %v1363_v35 = vpop.f32.mrf.mxu2  ;;  %v2597_v55 = vsub.f32 %v8103_v4, %v11285_v50  ;;  %v1250_v28 = vadd.f32 %v1249_v9, %v1191_v18  ;;  %v11288_v17 = vand.u32 4294901760, %v7816_v43  ;;  %v11290_v43 = vand.u32 4294901760, %v7826_v27 }
 0x162   :  { %2182 = vmatpush.msrb.mxu0 %v7980_v30  ;;  %2399 = vmatpush.msrb.mxu3 %v8010_v1  ;;  %v1364_v19 = vadd.f32 %v1363_v35, %v1289_v7  ;;  %v569_v35 = vld [vmem:[#allocation2 + $0x550] sm:$0xff]  ;;  %v2603_v50 = vsub.f32 %v8116_v51, %v11286_v47  ;;  %v2609_v18 = vsub.f32 %v8126_v46, %v11085_v38  ;;  %v11289_v38 = vand.u32 4294901760, %v8139_v26 }
 0x163   :  { %2403 = vmatmul.f32.vlgmr.msrb.gmra.mxu3 %v11284_v33  ;;  %2491 = vmatpush.msra.mxu1 %v7818_v57  ;;  %v8155_v57 = vand.u32 4294901760, %v577_v14  ;;  %v8167_v9 = vand.u32 4294901760, %v569_v35  ;;  %v553_v47 = vld [vmem:[#allocation2 + $0x4d0] sm:$0xff]  ;;  %v1408_v27 = vpop.f32.mrf.mxu3 }
 0x164   :  { %2530 = vmatpush.msra.mxu2 %v8056_v6  ;;  %2581 = vmatpush.msra.mxu3 %v2580_v56  ;;  %v1405_v7 = vadd.f32 %v1404_v0, %v1364_v19  ;;  %v2592_v56 = vand.u32 4294901760, %v2591_v15  ;;  %v561_v0 = vld [vmem:[#allocation2 + $0x510] sm:$0xff]  ;;  %v11287_v19 = vld [vmem:[#allocation11_spill] sm:$0xff]  ;;  %v2598_v15 = vand.u32 4294901760, %v2597_v55  ;;  %v2604_v55 = vand.u32 4294901760, %v2603_v50 }
 0x165   :  { %2184 = vmatpush.msrb.mxu0 %v7996_v29  ;;  %2493 = vmatpush.msra.mxu1 %v7828_v32  ;;  %v8165_v32 = vsub.f32 %v585_v63, %v8143_v12  ;;  %v8179_v63 = vsub.f32 %v577_v14, %v8155_v57  ;;  %v545_v46 = vld [vmem:[#allocation2 + $0x490] sm:$0xff]  ;;  %v2610_v50 = vand.u32 4294901760, %v2609_v18  ;;  %v11293_v18 = vand.u32 4294901760, %v7850_v53 }
 0x166   :  { %2532 = vmatpush.msra.mxu2 %v8078_v34  ;;  %2587 = vmatpush.msra.mxu3 %v2586_v62  ;;  %6619 = vst [vmem:[#allocation5] sm:$0xff] %v1405_v7  ;;  %v1294_v62 = vpop.f32.mrf.mxu1  ;;  %v2615_v7 = vsub.f32 %v8139_v26, %v11289_v38  ;;  %v11291_v38 = vand.u32 4294901760, %v8151_v49 }
 0x167   :  { %2186 = vmatpush.msrb.mxu0 %v8010_v1  ;;  %2305 = vmatmul.f32.gmra.mxu1 %v11251_v11  ;;  %v2626_v14 = vand.u32 4294901760, %v8165_v32 }
 0x168   :  { %2192 = vmatmul.f32.vlgmr.msrb.gmra.mxu0 %v11287_v19  ;;  %2495 = vmatpush.msra.mxu1 %v7841_v54  ;;  %v8181_v19 = vand.u32 4294901760, %v561_v0  ;;  %v1295_v54 = vadd.f32 %v1294_v62, %v1250_v28  ;;  %v8194_v28 = vand.u32 4294901760, %v553_v47  ;;  %v2621_v62 = vsub.f32 %v8151_v49, %v11291_v38 }
 0x169   :  { %2416 = vmatpush.msra.mxu0 %v11288_v17  ;;  %2534 = vmatpush.msra.mxu2 %v8085_v37  ;;  %v8192_v17 = vsub.f32 %v569_v35, %v8167_v9  ;;  %v2632_v35 = vand.u32 4294901760, %v8179_v63  ;;  %v2616_v38 = vand.u32 4294901760, %v2615_v7 }
 0x16a   :  { %2593 = vmatpush.msra.mxu3 %v2592_v56  ;;  %2364 = vmatmul.f32.gmra.mxu2 %v7235_v21  ;;  %v1367_v33 = vpop.f32.mrf.mxu2  ;;  %v2622_v53 = vand.u32 4294901760, %v2621_v62 }
 0x16b   :  { %2420 = vmatpush.msra.mxu0 %v11290_v43  ;;  %2497 = vmatpush.msra.mxu1 %v7861_v42  ;;  %v1368_v56 = vadd.f32 %v1367_v33, %v1295_v54  ;;  %v11292_v42 = vand.u32 4294901760, %v7837_v60  ;;  %v8205_v43 = vsub.f32 %v561_v0, %v8181_v19  ;;  %v8207_v54 = vand.u32 4294901760, %v545_v46 }
 0x16c   :  { %2536 = vmatpush.msra.mxu2 %v8094_v3  ;;  %2599 = vmatpush.msra.mxu3 %v2598_v15  ;;  %v537_v15 = vld [vmem:[#allocation2 + $0x450] sm:$0xff]  ;;  %v2627_v60 = vsub.f32 %v8165_v32, %v2626_v14  ;;  %v2638_v0 = vand.u32 4294901760, %v8192_v17  ;;  %v2633_v7 = vsub.f32 %v8179_v63, %v2632_v35 }
 0x16d   :  { %2409 = vmatmul.f32.gmra.mxu3 %v7245_v36  ;;  %2424 = vmatpush.msra.mxu0 %v11292_v42  ;;  %v1409_v33 = vadd.f32 %v1408_v27, %v1368_v56  ;;  %v8218_v56 = vsub.f32 %v553_v47, %v8194_v28  ;;  %v529_v27 = vld [vmem:[#allocation2 + $0x410] sm:$0xff]  ;;  %v8230_v47 = vsub.f32 %v545_v46, %v8207_v54  ;;  %v11294_v42 = vand.u32 4294901760, %v7866_v39 }
 0x16e   :  { %2499 = vmatpush.msra.mxu1 %v7875_v22  ;;  %2538 = vmatpush.msra.mxu2 %v8105_v44  ;;  %v8222_v22 = vand.u32 4294901760, %v537_v15  ;;  %v2639_v62 = vsub.f32 %v8192_v17, %v2638_v0  ;;  %v11295_v46 = vand.u32 4294901760, %v7888_v25 }
 0x16f   :  { %2605 = vmatpush.msra.mxu3 %v2604_v55  ;;  %2428 = vmatpush.msra.mxu0 %v11293_v18  ;;  %6627 = vst [vmem:[#allocation5 + $0x40] sm:$0xff] %v1409_v33  ;;  %v2644_v55 = vand.u32 4294901760, %v8205_v43  ;;  %v2650_v33 = vand.u32 4294901760, %v8218_v56 }
 0x170   :  { %2501 = vmatpush.msra.mxu1 %v7890_v24  ;;  %2540 = vmatpush.msra.mxu2 %v8118_v41  ;;  %v8235_v24 = vand.u32 4294901760, %v529_v27  ;;  %v8246_v39 = vsub.f32 %v537_v15, %v8222_v22 }
 0x171   :  { %2611 = vmatpush.msra.mxu3 %v2610_v50  ;;  %2200 = vmatmul.f32.gmra.mxu0 %v7258_v16  ;;  %v2628_v50 = vand.u32 4294901760, %v2627_v60  ;;  %v2645_v18 = vsub.f32 %v8205_v43, %v2644_v55  ;;  %v11296_v60 = vand.u32 4294901760, %v7902_v23  ;;  %v2651_v15 = vsub.f32 %v8218_v56, %v2650_v33 }
 0x172   :  { %2432 = vmatpush.msra.mxu0 %v11294_v42  ;;  %2503 = vmatpush.msra.mxu1 %v7904_v20  ;;  %v2634_v20 = vand.u32 4294901760, %v2633_v7  ;;  %v8257_v25 = vsub.f32 %v529_v27, %v8235_v24  ;;  %v2662_v23 = vand.u32 4294901760, %v8246_v39  ;;  %v11298_v7 = vand.u32 4294901760, %v7930_v40 }
 0x173   :  { %2542 = vmatpush.msra.mxu2 %v8128_v8  ;;  %2617 = vmatpush.msra.mxu3 %v2616_v38  ;;  %v2656_v38 = vand.u32 4294901760, %v8230_v47  ;;  %v11299_v42 = vand.u32 4294901760, %v7948_v59 }
 0x174   :  { %2436 = vmatpush.msra.mxu0 %v11295_v46  ;;  %2505 = vmatpush.msra.mxu1 %v7925_v13  ;;  %v2640_v13 = vand.u32 4294901760, %v2639_v62  ;;  %v11303_v46 = vld [vmem:[#allocation17_spill] sm:$0xff] }
 0x175   :  { %2544 = vmatpush.msra.mxu2 %v8143_v12  ;;  %2623 = vmatpush.msra.mxu3 %v2622_v53  ;;  %v11297_v53 = vand.u32 4294901760, %v7918_v31  ;;  %v2657_v27 = vsub.f32 %v8230_v47, %v2656_v38  ;;  %v2668_v31 = vand.u32 4294901760, %v8257_v25 }
 0x176   :  { %2440 = vmatpush.msra.mxu0 %v11296_v60  ;;  %2507 = vmatpush.msra.mxu1 %v7936_v45  ;;  %v2646_v45 = vand.u32 4294901760, %v2645_v18  ;;  %v11308_v60 = vld [vmem:[#allocation12_spill] sm:$0xff] }
 0x177   :  { %2546 = vmatpush.msra.mxu2 %v8155_v57  ;;  %2629 = vmatpush.msra.mxu3 %v2628_v50  ;;  %v2663_v50 = vsub.f32 %v8246_v39, %v2662_v23  ;;  %v2658_v40 = vand.u32 4294901760, %v2657_v27  ;;  %v2669_v59 = vsub.f32 %v8257_v25, %v2668_v31 }
 0x178   :  { %2444 = vmatpush.msra.mxu0 %v11297_v53  ;;  %2509 = vmatpush.msra.mxu1 %v7950_v5  ;;  %v2652_v5 = vand.u32 4294901760, %v2651_v15  ;;  %v11311_v15 = vld [vmem:[#allocation10_spill] sm:$0xff] }
 0x179   :  { %2548 = vmatpush.msra.mxu2 %v8167_v9  ;;  %2635 = vmatpush.msra.mxu3 %v2634_v20  ;;  %v2664_v62 = vand.u32 4294901760, %v2663_v50  ;;  %v11306_v20 = vld [vmem:[#allocation21_spill] sm:$0xff]  ;;  %v11312_v53 = vand.u32 4294901760, %v11311_v15  ;;  %v522_v50 = vld [vmem:[#allocation2 + $0x3d8] sm:$0xff] }
 0x17a   :  { %2448 = vmatpush.msra.mxu0 %v11298_v7  ;;  %2511 = vmatpush.msra.mxu1 %v7964_v58  ;;  %v11300_v58 = vand.u32 4294901760, %v7962_v10  ;;  %v2670_v10 = vand.u32 4294901760, %v2669_v59  ;;  %v11307_v18 = vand.u32 4294901760, %v11306_v20  ;;  %v11315_v7 = vld [vmem:[#allocation23_spill] sm:$0xff] }
 0x17b   :  { %2550 = vmatpush.msra.mxu2 %v8181_v19  ;;  %2641 = vmatpush.msra.mxu3 %v2640_v13  ;;  %v514_v59 = vld [vmem:[#allocation2 + $0x398] sm:$0xff] }
 0x17c   :  { %2452 = vmatpush.msra.mxu0 %v11299_v42  ;;  %2513 = vmatpush.msra.mxu1 %v7980_v30  ;;  %v11301_v30 = vand.u32 4294901760, %v7976_v61  ;;  %v11318_v42 = vld [vmem:[#allocation19_spill] sm:$0xff] }
 0x17d   :  { %2552 = vmatpush.msra.mxu2 %v8194_v28  ;;  %2647 = vmatpush.msra.mxu3 %v2646_v45  ;;  %v11313_v45 = vld [vmem:[#allocation26_spill] sm:$0xff]  ;;  %v482_v20 = vld [vmem:[#allocation2 + $0x298] sm:$0xff] }
 0x17e   :  { %2456 = vmatpush.msra.mxu0 %v11300_v58  ;;  %2515 = vmatpush.msra.mxu1 %v7996_v29  ;;  %v11302_v29 = vand.u32 4294901760, %v7994_v52  ;;  %v11309_v52 = vld [vmem:[#allocation25_spill] sm:$0xff]  ;;  %v11314_v27 = vand.u32 4294901760, %v11313_v45  ;;  %v11321_v58 = vld [vmem:[#allocation27_spill] sm:$0xff] }
 0x17f   :  { %2554 = vmatpush.msra.mxu2 %v8207_v54  ;;  %2653 = vmatpush.msra.mxu3 %v2652_v5  ;;  %v11310_v13 = vand.u32 4294901760, %v11309_v52  ;;  %v11316_v5 = vand.u32 4294901760, %v11315_v7  ;;  %v458_v7 = vld [vmem:[#allocation2 + $0x1d8] sm:$0xff] }
 0x180   :  { %2460 = vmatpush.msra.mxu0 %v11301_v30  ;;  %2517 = vmatpush.msra.mxu1 %v8010_v1  ;;  %v11304_v1 = vld [vmem:[#allocation24_spill] sm:$0xff]  ;;  %v8338_v30 = vand.u32 4294901760, %v522_v50 }
 0x181   :  { %2556 = vmatpush.msra.mxu2 %v8222_v22  ;;  %2659 = vmatpush.msra.mxu3 %v2658_v40  ;;  %v11305_v61 = vand.u32 4294901760, %v11304_v1  ;;  %v11320_v40 = vld [vmem:[#allocation15_spill] sm:$0xff] }
 0x182   :  { %2519 = vmatmul.f32.vlgmr.msra.gmra.mxu1 %v7203_v48  ;;  %2464 = vmatpush.msra.mxu0 %v11302_v29  ;;  %v8345_v29 = vand.u32 4294901760, %v514_v59 }
 0x183   :  { %2741 = vmatpush.msrb.mxu1 %v8046_v2  ;;  %2558 = vmatpush.msra.mxu2 %v8235_v24 }
 0x184   :  { %2665 = vmatpush.msra.mxu3 %v2664_v62  ;;  %2564 = vmatmul.f32.vlgmr.msra.gmra.mxu2 %v11303_v46  ;;  %v506_v62 = vld [vmem:[#allocation2 + $0x358] sm:$0xff] }
 0x185   :  { %2743 = vmatpush.msrb.mxu1 %v8056_v6  ;;  %2788 = vmatpush.msrb.mxu2 %v11305_v61 }
 0x186   :  { %2468 = vmatpush.msra.mxu0 %v11307_v18  ;;  %2671 = vmatpush.msra.mxu3 %v2670_v10  ;;  %v8353_v10 = vsub.f32 %v522_v50, %v8338_v30  ;;  %v1558_v18 = vpop.f32.mrf.mxu1  ;;  %v11326_v50 = vld [vmem:[#allocation14_spill] sm:$0xff] }
 0x187   :  { %2673 = vmatmul.f32.vlgmr.msra.gmra.mxu3 %v11308_v60  ;;  %2745 = vmatpush.msrb.mxu1 %v8078_v34 }
 0x188   :  { %2792 = vmatpush.msrb.mxu2 %v11310_v13  ;;  %2859 = vmatpush.msrb.mxu3 %v8046_v2  ;;  %v11317_v2 = vand.u32 4294901760, %v8103_v4  ;;  %v11095_v61 = vand.u32 4294901760, %v8353_v10  ;;  %v8398_v13 = vpop.f32.mrf.mxu2 }
 0x189   :  { %2472 = vmatpush.msra.mxu0 %v11312_v53  ;;  %2747 = vmatpush.msrb.mxu1 %v8085_v37 }
 0x18a   :  { %2796 = vmatpush.msrb.mxu2 %v11314_v27  ;;  %2861 = vmatpush.msrb.mxu3 %v8056_v6  ;;  %v11319_v6 = vand.u32 4294901760, %v8116_v51 }
 0x18b   :  { %2476 = vmatpush.msra.mxu0 %v11316_v5  ;;  %2523 = vmatmul.f32.gmra.mxu1 %v11251_v11 }
 0x18c   :  { %2478 = vmatmul.f32.vlgmr.msra.gmra.mxu0 %v7203_v48  ;;  %2749 = vmatpush.msrb.mxu1 %v8094_v3 }
 0x18d   :  { %2683 = vmatpush.msrb.mxu0 %v11304_v1  ;;  %2800 = vmatpush.msrb.mxu2 %v11317_v2  ;;  %v8355_v1 = vand.u32 4294901760, %v506_v62 }
 0x18e   :  { %2863 = vmatpush.msrb.mxu3 %v8078_v34  ;;  %2572 = vmatmul.f32.gmra.mxu2 %v11318_v42  ;;  %v11322_v34 = vand.u32 4294901760, %v11321_v58 }
 0x18f   :  { %2686 = vmatpush.msrb.mxu0 %v11309_v52  ;;  %2751 = vmatpush.msrb.mxu1 %v8105_v44  ;;  %v8396_v52 = vand.u32 4294901760, %v482_v20 }
 0x190   :  { %2804 = vmatpush.msrb.mxu2 %v11319_v6  ;;  %2865 = vmatpush.msrb.mxu3 %v8085_v37  ;;  %v11323_v37 = vand.u32 4294901760, %v8139_v26 }
 0x191   :  { %2677 = vmatmul.f32.gmra.mxu3 %v11320_v40  ;;  %2689 = vmatpush.msrb.mxu0 %v11313_v45  ;;  %v8425_v45 = vsub.f32 %v482_v20, %v8396_v52 }
 0x192   :  { %2753 = vmatpush.msrb.mxu1 %v8118_v41  ;;  %2808 = vmatpush.msrb.mxu2 %v11322_v34 }
 0x193   :  { %2867 = vmatpush.msrb.mxu3 %v8094_v3  ;;  %2692 = vmatpush.msrb.mxu0 %v8103_v4  ;;  %v498_v3 = vld [vmem:[#allocation2 + $0x318] sm:$0xff]  ;;  %v11324_v4 = vand.u32 4294901760, %v8151_v49 }
 0x194   :  { %2755 = vmatpush.msrb.mxu1 %v8128_v8  ;;  %2812 = vmatpush.msrb.mxu2 %v11323_v37  ;;  %v442_v37 = vld [vmem:[#allocation2 + $0x158] sm:$0xff] }
 0x195   :  { %2869 = vmatpush.msrb.mxu3 %v8105_v44  ;;  %2482 = vmatmul.f32.gmra.mxu0 %v11251_v11  ;;  %v8363_v44 = vsub.f32 %v514_v59, %v8345_v29 }
 0x196   :  { %2695 = vmatpush.msrb.mxu0 %v8116_v51  ;;  %2757 = vmatpush.msrb.mxu1 %v8143_v12  ;;  %v8365_v51 = vand.u32 4294901760, %v498_v3 }
 0x197   :  { %2816 = vmatpush.msrb.mxu2 %v11324_v4  ;;  %2871 = vmatpush.msrb.mxu3 %v8118_v41  ;;  %v490_v41 = vld [vmem:[#allocation2 + $0x2d8] sm:$0xff] }
 0x198   :  { %2698 = vmatpush.msrb.mxu0 %v11321_v58  ;;  %2759 = vmatpush.msrb.mxu1 %v8155_v57  ;;  %v8444_v58 = vand.u32 4294901760, %v458_v7  ;;  %v434_v4 = vld [vmem:[#allocation2 + $0x118] sm:$0xff] }
 0x199   :  { %2820 = vmatpush.msrb.mxu2 %v2626_v14  ;;  %2873 = vmatpush.msrb.mxu3 %v8128_v8  ;;  %v8374_v14 = vsub.f32 %v506_v62, %v8355_v1  ;;  %v8378_v8 = vand.u32 4294901760, %v490_v41  ;;  %v1562_v62 = vpop.f32.mrf.mxu1 }
 0x19a   :  { %2701 = vmatpush.msrb.mxu0 %v8139_v26  ;;  %2761 = vmatpush.msrb.mxu1 %v8167_v9  ;;  %v1449_v26 = vpop.f32.mrf.mxu0 }
 0x19b   :  { %2824 = vmatpush.msrb.mxu2 %v2632_v35  ;;  %2875 = vmatpush.msrb.mxu3 %v8143_v12  ;;  %v11094_v12 = vand.u32 4294901760, %v8363_v44  ;;  %v8385_v35 = vsub.f32 %v498_v3, %v8365_v51 }
 0x19c   :  { %2704 = vmatpush.msrb.mxu0 %v8151_v49  ;;  %2763 = vmatpush.msrb.mxu1 %v8181_v19  ;;  %v474_v49 = vld [vmem:[#allocation2 + $0x258] sm:$0xff] }
 0x19d   :  { %2828 = vmatpush.msrb.mxu2 %v2638_v0  ;;  %2877 = vmatpush.msrb.mxu3 %v8155_v57  ;;  %v2951_v57 = vsub.f32 %v8353_v10, %v11095_v61  ;;  %v11093_v0 = vand.u32 4294901760, %v8374_v14  ;;  %v11091_v15 = vand.u32 4294901760, %v8385_v35  ;;  %v8412_v53 = vand.u32 4294901760, %v474_v49 }
 0x19e   :  { %2707 = vmatpush.msrb.mxu0 %v8165_v32  ;;  %2765 = vmatpush.msrb.mxu1 %v8194_v28  ;;  %v8403_v32 = vsub.f32 %v490_v41, %v8378_v8 }
 0x19f   :  { %2832 = vmatpush.msrb.mxu2 %v2644_v55  ;;  %2879 = vmatpush.msrb.mxu3 %v8167_v9  ;;  %v466_v55 = vld [vmem:[#allocation2 + $0x218] sm:$0xff]  ;;  %v2957_v9 = vsub.f32 %v8363_v44, %v11094_v12  ;;  %v2969_v2 = vsub.f32 %v8385_v35, %v11091_v15  ;;  %v8440_v6 = vsub.f32 %v474_v49, %v8412_v53  ;;  %v8468_v49 = vand.u32 4294901760, %v442_v37 }
 0x1a0   :  { %2710 = vmatpush.msrb.mxu0 %v8179_v63  ;;  %2767 = vmatpush.msrb.mxu1 %v8207_v54  ;;  %v8414_v63 = vpop.f32.mrf.mxu3  ;;  %v8427_v27 = vand.u32 4294901760, %v466_v55 }
 0x1a1   :  { %2836 = vmatpush.msrb.mxu2 %v2650_v33  ;;  %2881 = vmatpush.msrb.mxu3 %v8181_v19  ;;  %v2952_v19 = vand.u32 4294901760, %v2951_v57  ;;  %v2963_v33 = vsub.f32 %v8374_v14, %v11093_v0  ;;  %v2970_v41 = vand.u32 4294901760, %v2969_v2  ;;  %v11088_v20 = vand.u32 4294901760, %v8440_v6 }
 0x1a2   :  { %2713 = vmatpush.msrb.mxu0 %v8192_v17  ;;  %2769 = vmatpush.msrb.mxu1 %v8222_v22  ;;  %v11090_v17 = vand.u32 4294901760, %v8403_v32  ;;  %v1457_v34 = vpop.f32.mrf.mxu0  ;;  %v8450_v59 = vsub.f32 %v466_v55, %v8427_v27  ;;  %v8475_v55 = vand.u32 4294901760, %v434_v4  ;;  %v8493_v2 = vsub.f32 %v442_v37, %v8468_v49  ;;  %v1776_v37 = vpop.f32.mrf.mxu1 }
 0x1a3   :  { %2840 = vmatpush.msrb.mxu2 %v2656_v38  ;;  %2883 = vmatpush.msrb.mxu3 %v8194_v28  ;;  %v11325_v38 = vld [vmem:[#allocation20_spill] sm:$0xff]  ;;  %v2958_v28 = vand.u32 4294901760, %v2957_v9  ;;  %v426_v9 = vld [vmem:[#allocation2 + $0xd8] sm:$0xff] }
 0x1a4   :  { %2716 = vmatpush.msrb.mxu0 %v8205_v43  ;;  %2771 = vmatpush.msrb.mxu1 %v8235_v24  ;;  %v1450_v5 = vadd.f32 %v1449_v26, %v11325_v38  ;;  %v450_v43 = vld [vmem:[#allocation2 + $0x198] sm:$0xff]  ;;  %v8461_v26 = vpop.f32.mrf.mxu2  ;;  %v11092_v57 = vand.u32 4294901760, %v8450_v59 }
 0x1a5   :  { %2844 = vmatpush.msrb.mxu2 %v2662_v23  ;;  %2885 = vmatpush.msrb.mxu3 %v8207_v54  ;;  %v2964_v54 = vand.u32 4294901760, %v2963_v33  ;;  %v11089_v23 = vand.u32 4294901760, %v8425_v45  ;;  %v8457_v3 = vand.u32 4294901760, %v450_v43 }
 0x1a6   :  { %2775 = vmatmul.f32.vlgmr.msrb.gmra.mxu1 %v11326_v50  ;;  %2719 = vmatpush.msrb.mxu0 %v8218_v56  ;;  %v2975_v56 = vsub.f32 %v8403_v32, %v11090_v17  ;;  %v11329_v17 = vld [vmem:[#allocation13_spill] sm:$0xff]  ;;  %v626_v50 = vld [vmem:[#allocation2 + $0x718] sm:$0xff] }
 0x1a7   :  { %2953 = vmatpush.msra.mxu1 %v2952_v19  ;;  %2848 = vmatpush.msrb.mxu2 %v2668_v31  ;;  %v1559_v31 = vadd.f32 %v1558_v18, %v1450_v5  ;;  %v2981_v18 = vsub.f32 %v8425_v45, %v11089_v23  ;;  %v8482_v19 = vsub.f32 %v450_v43, %v8457_v3  ;;  %v418_v5 = vld [vmem:[#allocation2 + $0x98] sm:$0xff]  ;;  %v8495_v43 = vand.u32 4294901760, %v426_v9 }
 0x1a8   :  { %2887 = vmatpush.msrb.mxu3 %v8222_v22  ;;  %2850 = vmatmul.f32.vlgmr.msrb.gmra.mxu2 %v11308_v60  ;;  %v8466_v22 = vsub.f32 %v458_v7, %v8444_v58  ;;  %v2987_v7 = vsub.f32 %v8440_v6, %v11088_v20  ;;  %v8504_v20 = vsub.f32 %v434_v4, %v8475_v55  ;;  %v410_v23 = vld [vmem:[#allocation2 + $0x58] sm:$0xff]  ;;  %v8508_v15 = vand.u32 4294901760, %v418_v5 }
 0x1a9   :  { %2959 = vmatpush.msra.mxu1 %v2958_v28  ;;  %3055 = vmatpush.msra.mxu2 %v8353_v10  ;;  %v1617_v33 = vadd.f32 %v8398_v13, %v1559_v31  ;;  %v11327_v13 = vld [vmem:[#allocation22_spill] sm:$0xff]  ;;  %v2982_v31 = vand.u32 4294901760, %v2981_v18  ;;  %v8520_v12 = vsub.f32 %v426_v9, %v8495_v43  ;;  %v11330_v0 = vand.u32 4294901760, %v8482_v19 }
 0x1aa   :  { %2722 = vmatpush.msrb.mxu0 %v8230_v47  ;;  %2889 = vmatpush.msrb.mxu3 %v8235_v24  ;;  %v8477_v47 = vpop.f32.mrf.mxu3  ;;  %v2976_v24 = vand.u32 4294901760, %v2975_v56  ;;  %v11096_v28 = vand.u32 4294901760, %v8466_v22  ;;  %v1735_v56 = vpop.f32.mrf.mxu0  ;;  %v2988_v18 = vand.u32 4294901760, %v2987_v7  ;;  %v11097_v61 = vand.u32 4294901760, %v8504_v20 }
 0x1ab   :  { %2891 = vmatmul.f32.vlgmr.msrb.gmra.mxu3 %v11308_v60  ;;  %2965 = vmatpush.msra.mxu1 %v2964_v54  ;;  %v1458_v54 = vadd.f32 %v1457_v34, %v11327_v13  ;;  %v3005_v9 = vsub.f32 %v8482_v19, %v11330_v0  ;;  %v570_v60 = vld [vmem:[#allocation2 + $0x558] sm:$0xff] }
 0x1ac   :  { %3058 = vmatpush.msra.mxu2 %v8363_v44  ;;  %3113 = vmatpush.msra.mxu3 %v8338_v30  ;;  %v1821_v4 = vpop.f32.mrf.mxu2 }
 0x1ad   :  { %2725 = vmatpush.msrb.mxu0 %v8246_v39  ;;  %2971 = vmatpush.msra.mxu1 %v2970_v41  ;;  %v11328_v39 = vld [vmem:[#allocation18_spill] sm:$0xff]  ;;  %v2993_v41 = vsub.f32 %v8450_v59, %v11092_v57  ;;  %v402_v57 = vld [vmem:[#allocation2 + $0x18] sm:$0xff] }
 0x1ae   :  { %3061 = vmatpush.msra.mxu2 %v8374_v14  ;;  %3115 = vmatpush.msra.mxu3 %v8345_v29 }
 0x1af   :  { %2728 = vmatpush.msrb.mxu0 %v8257_v25  ;;  %2781 = vmatmul.f32.gmra.mxu1 %v11328_v39  ;;  %v1661_v25 = vadd.f32 %v8414_v63, %v1617_v33  ;;  %v8522_v63 = vand.u32 4294901760, %v410_v23  ;;  %v1563_v33 = vadd.f32 %v1562_v62, %v1458_v54  ;;  %v2994_v7 = vand.u32 4294901760, %v2993_v41  ;;  %v650_v41 = vld [vmem:[#allocation2 + $0x7d8] sm:$0xff]  ;;  %v1780_v39 = vpop.f32.mrf.mxu1 }
 0x1b0   :  { %2731 = vmatmul.f32.vlgmr.msrb.gmra.mxu0 %v11329_v17  ;;  %2977 = vmatpush.msra.mxu1 %v2976_v24  ;;  %v2999_v24 = vsub.f32 %v8466_v22, %v11096_v28  ;;  %v8532_v17 = vsub.f32 %v418_v5, %v8508_v15  ;;  %v8534_v62 = vand.u32 4294901760, %v402_v57 }
 0x1b1   :  { %2900 = vmatpush.msra.mxu0 %v8338_v30  ;;  %3064 = vmatpush.msra.mxu2 %v8385_v35  ;;  %v1736_v34 = vadd.f32 %v1735_v56, %v1661_v25  ;;  %v11331_v56 = vand.u32 4294901760, %v8493_v2  ;;  %v8544_v0 = vsub.f32 %v410_v23, %v8522_v63  ;;  %v1622_v5 = vadd.f32 %v8461_v26, %v1563_v33  ;;  %v11334_v26 = vld [vmem:[#allocation16_spill] sm:$0xff] }
 0x1b2   :  { %3117 = vmatpush.msra.mxu3 %v8355_v1  ;;  %2854 = vmatmul.f32.gmra.mxu2 %v11320_v40  ;;  %v1930_v28 = vpop.f32.mrf.mxu3  ;;  %v3000_v54 = vand.u32 4294901760, %v2999_v24  ;;  %v3017_v25 = vsub.f32 %v8504_v20, %v11097_v61  ;;  %v3006_v24 = vand.u32 4294901760, %v3005_v9  ;;  %v8555_v23 = vsub.f32 %v402_v57, %v8534_v62  ;;  %v1739_v33 = vpop.f32.mrf.mxu0 }
 0x1b3   :  { %2902 = vmatpush.msra.mxu0 %v8345_v29  ;;  %2983 = vmatpush.msra.mxu1 %v2982_v31  ;;  %v3011_v31 = vsub.f32 %v8493_v2, %v11331_v56  ;;  %11332 = vst [vmem:[#allocation17_spill] sm:$0xff] %v8544_v0  ;;  %v1667_v57 = vadd.f32 %v8477_v47, %v1622_v5  ;;  %v642_v56 = vld [vmem:[#allocation2 + $0x798] sm:$0xff]  ;;  %v8572_v9 = vand.u32 4294901760, %v650_v41 }
 0x1b4   :  { %3067 = vmatpush.msra.mxu2 %v8403_v32  ;;  %3119 = vmatpush.msra.mxu3 %v8365_v51  ;;  %11333 = vst [vmem:[#allocation24_spill] sm:$0xff] %v8555_v23  ;;  %v3018_v61 = vand.u32 4294901760, %v3017_v25  ;;  %v1829_v13 = vpop.f32.mrf.mxu2  ;;  %v11337_v25 = vand.u32 4294901760, %v8544_v0 }
 0x1b5   :  { %2895 = vmatmul.f32.gmra.mxu3 %v11320_v40  ;;  %2904 = vmatpush.msra.mxu0 %v8355_v1  ;;  %v1740_v47 = vadd.f32 %v1739_v33, %v1667_v57  ;;  %v634_v33 = vld [vmem:[#allocation2 + $0x758] sm:$0xff] }
 0x1b6   :  { %2989 = vmatpush.msra.mxu1 %v2988_v18  ;;  %3070 = vmatpush.msra.mxu2 %v8425_v45  ;;  %v1777_v18 = vadd.f32 %v1776_v37, %v1736_v34  ;;  %v3012_v37 = vand.u32 4294901760, %v3011_v31  ;;  %v11335_v34 = vand.u32 4294901760, %v8520_v12 }
 0x1b7   :  { %3121 = vmatpush.msra.mxu3 %v8378_v8  ;;  %2906 = vmatpush.msra.mxu0 %v8365_v51 }
 0x1b8   :  { %2995 = vmatpush.msra.mxu1 %v2994_v7  ;;  %3073 = vmatpush.msra.mxu2 %v8440_v6  ;;  %v3023_v7 = vsub.f32 %v8520_v12, %v11335_v34  ;;  %v11098_v34 = vand.u32 4294901760, %v8555_v23 }
 0x1b9   :  { %3123 = vmatpush.msra.mxu3 %v8396_v52  ;;  %2736 = vmatmul.f32.gmra.mxu0 %v11334_v26  ;;  %v1822_v26 = vadd.f32 %v1821_v4, %v1777_v18  ;;  %v3035_v18 = vsub.f32 %v8544_v0, %v11337_v25  ;;  %v1781_v25 = vadd.f32 %v1780_v39, %v1740_v47  ;;  %v618_v39 = vld [vmem:[#allocation2 + $0x6d8] sm:$0xff] }
 0x1ba   :  { %2908 = vmatpush.msra.mxu0 %v8378_v8  ;;  %3001 = vmatpush.msra.mxu1 %v3000_v54  ;;  %v11336_v54 = vand.u32 4294901760, %v8532_v17  ;;  %v1934_v5 = vpop.f32.mrf.mxu3  ;;  %v3024_v4 = vand.u32 4294901760, %v3023_v7  ;;  %v8589_v7 = vsub.f32 %v650_v41, %v8572_v9 }
 0x1bb   :  { %3076 = vmatpush.msra.mxu2 %v8450_v59  ;;  %3125 = vmatpush.msra.mxu3 %v8412_v53  ;;  %v1931_v57 = vadd.f32 %v1930_v28, %v1822_v26  ;;  %v3036_v28 = vand.u32 4294901760, %v3035_v18  ;;  %v8594_v26 = vand.u32 4294901760, %v634_v33  ;;  %v1830_v42 = vadd.f32 %v1829_v13, %v1781_v25 }
 0x1bc   :  { %2910 = vmatpush.msra.mxu0 %v8396_v52  ;;  %3007 = vmatpush.msra.mxu1 %v3006_v24  ;;  %v3029_v31 = vsub.f32 %v8532_v17, %v11336_v54  ;;  %v8580_v24 = vand.u32 4294901760, %v642_v56  ;;  %v11340_v13 = vand.u32 4294901760, %v8589_v7 }
 0x1bd   :  { %3079 = vmatpush.msra.mxu2 %v8466_v22  ;;  %3127 = vmatpush.msra.mxu3 %v8427_v27 }
 0x1be   :  { %2912 = vmatpush.msra.mxu0 %v8412_v53  ;;  %3013 = vmatpush.msra.mxu1 %v3012_v37  ;;  %v3030_v54 = vand.u32 4294901760, %v3029_v31  ;;  %v3041_v37 = vsub.f32 %v8555_v23, %v11098_v34  ;;  %v8597_v31 = vsub.f32 %v642_v56, %v8580_v24 }
 0x1bf   :  { %3082 = vmatpush.msra.mxu2 %v8482_v19  ;;  %3129 = vmatpush.msra.mxu3 %v8444_v58  ;;  %v2107_v40 = vpop.f32.mrf.mxu2 }
 0x1c0   :  { %2914 = vmatpush.msra.mxu0 %v8427_v27  ;;  %3019 = vmatpush.msra.mxu1 %v3018_v61  ;;  %v2032_v61 = vpop.f32.mrf.mxu1  ;;  %11338 = vst [vmem:[#allocation21_spill] sm:$0xff] %v8597_v31  ;;  %v3042_v41 = vand.u32 4294901760, %v3041_v37  ;;  %v11100_v56 = vand.u32 4294901760, %v8597_v31  ;;  %v8612_v37 = vand.u32 4294901760, %v618_v39 }
 0x1c1   :  { %3085 = vmatpush.msra.mxu2 %v8493_v2  ;;  %3131 = vmatpush.msra.mxu3 %v8457_v3  ;;  %v1988_v38 = vpop.f32.mrf.mxu0 }
 0x1c2   :  { %2916 = vmatpush.msra.mxu0 %v8444_v58  ;;  %3025 = vmatpush.msra.mxu1 %v3024_v4  ;;  %v1989_v34 = vadd.f32 %v1988_v38, %v1931_v57  ;;  %v8603_v4 = vand.u32 4294901760, %v626_v50  ;;  %v610_v38 = vld [vmem:[#allocation2 + $0x698] sm:$0xff]  ;;  %v8610_v57 = vsub.f32 %v634_v33, %v8594_v26  ;;  %v2148_v47 = vpop.f32.mrf.mxu3 }
 0x1c3   :  { %3088 = vmatpush.msra.mxu2 %v8504_v20  ;;  %3133 = vmatpush.msra.mxu3 %v8468_v49 }
 0x1c4   :  { %2918 = vmatpush.msra.mxu0 %v8457_v3  ;;  %3031 = vmatpush.msra.mxu1 %v3030_v54  ;;  %v2033_v18 = vadd.f32 %v2032_v61, %v1989_v34  ;;  %11339 = vst [vmem:[#allocation25_spill] sm:$0xff] %v8610_v57  ;;  %v3323_v34 = vsub.f32 %v8589_v7, %v11340_v13  ;;  %v11342_v13 = vld [vmem:[#allocation8_spill] sm:$0xff] }
 0x1c5   :  { %3091 = vmatpush.msra.mxu2 %v8520_v12  ;;  %3135 = vmatpush.msra.mxu3 %v8475_v55  ;;  %v8621_v25 = vsub.f32 %v626_v50, %v8603_v4  ;;  %v1935_v61 = vadd.f32 %v1934_v5, %v1830_v42  ;;  %v586_v50 = vld [vmem:[#allocation2 + $0x5d8] sm:$0xff] }
 0x1c6   :  { %2920 = vmatpush.msra.mxu0 %v8468_v49  ;;  %3037 = vmatpush.msra.mxu1 %v3036_v28  ;;  %v2108_v54 = vadd.f32 %v2107_v40, %v2033_v18  ;;  %v8623_v28 = vand.u32 4294901760, %v610_v38  ;;  %v602_v40 = vld [vmem:[#allocation2 + $0x658] sm:$0xff] }
 0x1c7   :  { %3094 = vmatpush.msra.mxu2 %v8532_v17  ;;  %3137 = vmatpush.msra.mxu3 %v8495_v43  ;;  %v594_v18 = vld [vmem:[#allocation2 + $0x618] sm:$0xff]  ;;  %v8638_v5 = vand.u32 4294901760, %v602_v40 }
 0x1c8   :  { %2922 = vmatpush.msra.mxu0 %v8475_v55  ;;  %3043 = vmatpush.msra.mxu1 %v3042_v41  ;;  %v2149_v33 = vadd.f32 %v2148_v47, %v2108_v54  ;;  %v3329_v41 = vsub.f32 %v8597_v31, %v11100_v56  ;;  %v8634_v47 = vsub.f32 %v618_v39, %v8612_v37  ;;  %v3324_v56 = vand.u32 4294901760, %v3323_v34  ;;  %v11344_v31 = vld [vmem:[#allocation9_spill] sm:$0xff] }
 0x1c9   :  { %3097 = vmatpush.msra.mxu2 %v8544_v0  ;;  %3139 = vmatpush.msra.mxu3 %v8508_v15  ;;  %v2038_v0 = vpop.f32.mrf.mxu1  ;;  %v8644_v39 = vsub.f32 %v610_v38, %v8623_v28  ;;  %v11343_v34 = vand.u32 4294901760, %v8610_v57  ;;  %v562_v38 = vld [vmem:[#allocation2 + $0x518] sm:$0xff] }
 0x1ca   :  { %3045 = vmatmul.f32.vlgmr.msra.gmra.mxu1 %v7203_v48  ;;  %2924 = vmatpush.msra.mxu0 %v8495_v43  ;;  %6620 = vst [vmem:[#allocation5 + $0x8] sm:$0xff] %v2149_v33  ;;  %v1993_v42 = vpop.f32.mrf.mxu0  ;;  %v2111_v33 = vpop.f32.mrf.mxu2 }
 0x1cb   :  { %11341 = vst [vmem:[#allocation10_spill] sm:$0xff] %v8634_v47  ;;  %3231 = vmatpush.msrb.mxu1 %v8338_v30  ;;  %3100 = vmatpush.msra.mxu2 %v8555_v23  ;;  %v1994_v54 = vadd.f32 %v1993_v42, %v1935_v61  ;;  %v8648_v30 = vand.u32 4294901760, %v594_v18  ;;  %v3330_v61 = vand.u32 4294901760, %v3329_v41  ;;  %v3335_v42 = vsub.f32 %v8610_v57, %v11343_v34 }
 0x1cc   :  { %3141 = vmatpush.msra.mxu3 %v8522_v63  ;;  %3103 = vmatmul.f32.vlgmr.msra.gmra.mxu2 %v11342_v13  ;;  %v578_v13 = vld [vmem:[#allocation2 + $0x598] sm:$0xff]  ;;  %v11345_v41 = vand.u32 4294901760, %v8621_v25  ;;  %v2152_v57 = vpop.f32.mrf.mxu3 }
 0x1cd   :  { %3233 = vmatpush.msrb.mxu1 %v8345_v29  ;;  %3272 = vmatpush.msrb.mxu2 %v8572_v9  ;;  %v2039_v23 = vadd.f32 %v2038_v0, %v1994_v54  ;;  %v8659_v29 = vsub.f32 %v602_v40, %v8638_v5  ;;  %v8661_v54 = vand.u32 4294901760, %v586_v50  ;;  %v8673_v40 = vand.u32 4294901760, %v578_v13 }
 0x1ce   :  { %2926 = vmatpush.msra.mxu0 %v8508_v15  ;;  %3143 = vmatpush.msra.mxu3 %v8534_v62  ;;  %v3341_v34 = vsub.f32 %v8621_v25, %v11345_v41 }
 0x1cf   :  { %3147 = vmatmul.f32.vlgmr.msra.gmra.mxu3 %v11344_v31  ;;  %3235 = vmatpush.msrb.mxu1 %v8355_v1  ;;  %v2112_v0 = vadd.f32 %v2111_v33, %v2039_v23  ;;  %v8671_v1 = vsub.f32 %v594_v18, %v8648_v30  ;;  %v11346_v33 = vand.u32 4294901760, %v8634_v47  ;;  %v8685_v18 = vand.u32 4294901760, %v570_v60  ;;  %v554_v31 = vld [vmem:[#allocation2 + $0x4d8] sm:$0xff] }
 0x1d0   :  { %3274 = vmatpush.msrb.mxu2 %v8580_v24  ;;  %3325 = vmatpush.msrb.mxu3 %v3324_v56  ;;  %v3336_v56 = vand.u32 4294901760, %v3335_v42  ;;  %v11348_v42 = vand.u32 4294901760, %v8644_v39 }
 0x1d1   :  { %2928 = vmatpush.msra.mxu0 %v8522_v63  ;;  %3237 = vmatpush.msrb.mxu1 %v8365_v51  ;;  %v2153_v23 = vadd.f32 %v2152_v57, %v2112_v0  ;;  %v3347_v41 = vsub.f32 %v8634_v47, %v11346_v33  ;;  %v8683_v57 = vsub.f32 %v586_v50, %v8661_v54  ;;  %v11347_v0 = vld [vmem:[#allocation11_spill] sm:$0xff]  ;;  %v11349_v47 = vand.u32 4294901760, %v8353_v10 }
 0x1d2   :  { %3276 = vmatpush.msrb.mxu2 %v8594_v26  ;;  %3331 = vmatpush.msrb.mxu3 %v3330_v61  ;;  %v3342_v61 = vand.u32 4294901760, %v3341_v34  ;;  %v3353_v33 = vsub.f32 %v8644_v39, %v11348_v42  ;;  %v8699_v51 = vand.u32 4294901760, %v562_v38  ;;  %v546_v34 = vld [vmem:[#allocation2 + $0x498] sm:$0xff]  ;;  %v11350_v42 = vand.u32 4294901760, %v8363_v44 }
 0x1d3   :  { %2930 = vmatpush.msra.mxu0 %v8534_v62  ;;  %3049 = vmatmul.f32.gmra.mxu1 %v11251_v11  ;;  %6628 = vst [vmem:[#allocation5 + $0x48] sm:$0xff] %v2153_v23  ;;  %v8697_v23 = vsub.f32 %v578_v13, %v8673_v40  ;;  %v11351_v10 = vand.u32 4294901760, %v8659_v29  ;;  %v8710_v13 = vsub.f32 %v570_v60, %v8685_v18  ;;  %v11352_v44 = vand.u32 4294901760, %v8374_v14  ;;  %v538_v50 = vld [vmem:[#allocation2 + $0x458] sm:$0xff] }
 0x1d4   :  { %2936 = vmatmul.f32.vlgmr.msra.gmra.mxu0 %v11347_v0  ;;  %3239 = vmatpush.msrb.mxu1 %v8378_v8  ;;  %v3348_v8 = vand.u32 4294901760, %v3347_v41  ;;  %v8712_v0 = vand.u32 4294901760, %v554_v31  ;;  %v8723_v60 = vsub.f32 %v562_v38, %v8699_v51  ;;  %v11354_v14 = vand.u32 4294901760, %v8385_v35 }
 0x1d5   :  { %3160 = vmatpush.msrb.mxu0 %v11349_v47  ;;  %3278 = vmatpush.msrb.mxu2 %v8603_v4  ;;  %v3359_v47 = vsub.f32 %v8659_v29, %v11351_v10  ;;  %v8725_v10 = vand.u32 4294901760, %v546_v34 }
 0x1d6   :  { %3337 = vmatpush.msrb.mxu3 %v3336_v56  ;;  %3108 = vmatmul.f32.gmra.mxu2 %v7235_v21  ;;  %v3354_v56 = vand.u32 4294901760, %v3353_v33  ;;  %v11355_v33 = vand.u32 4294901760, %v8683_v57  ;;  %v8736_v38 = vsub.f32 %v554_v31, %v8712_v0 }
 0x1d7   :  { %3164 = vmatpush.msrb.mxu0 %v11350_v42  ;;  %3241 = vmatpush.msrb.mxu1 %v8396_v52  ;;  %v11353_v52 = vand.u32 4294901760, %v8671_v1  ;;  %v530_v42 = vld [vmem:[#allocation2 + $0x418] sm:$0xff]  ;;  %v8748_v31 = vsub.f32 %v546_v34, %v8725_v10  ;;  %v11358_v34 = vand.u32 4294901760, %v8425_v45 }
 0x1d8   :  { %3280 = vmatpush.msrb.mxu2 %v8612_v37  ;;  %3343 = vmatpush.msrb.mxu3 %v3342_v61  ;;  %v3360_v61 = vand.u32 4294901760, %v3359_v47 }
 0x1d9   :  { %3153 = vmatmul.f32.gmra.mxu3 %v7245_v36  ;;  %3168 = vmatpush.msrb.mxu0 %v11352_v44  ;;  %v3365_v41 = vsub.f32 %v8671_v1, %v11353_v52  ;;  %v3371_v44 = vsub.f32 %v8683_v57, %v11355_v33  ;;  %v3382_v52 = vand.u32 4294901760, %v8710_v13  ;;  %v11357_v33 = vand.u32 4294901760, %v8403_v32 }
 0x1da   :  { %3243 = vmatpush.msrb.mxu1 %v8412_v53  ;;  %3282 = vmatpush.msrb.mxu2 %v8623_v28  ;;  %v8740_v53 = vand.u32 4294901760, %v538_v50 }
 0x1db   :  { %3349 = vmatpush.msrb.mxu3 %v3348_v8  ;;  %3172 = vmatpush.msrb.mxu0 %v11354_v14  ;;  %v3366_v35 = vand.u32 4294901760, %v3365_v41  ;;  %v11356_v8 = vand.u32 4294901760, %v8697_v23  ;;  %v3388_v14 = vand.u32 4294901760, %v8723_v60  ;;  %v3383_v41 = vsub.f32 %v8710_v13, %v3382_v52 }
 0x1dc   :  { %3245 = vmatpush.msrb.mxu1 %v8427_v27  ;;  %3284 = vmatpush.msrb.mxu2 %v8638_v5  ;;  %v8753_v27 = vand.u32 4294901760, %v530_v42  ;;  %v8764_v32 = vsub.f32 %v538_v50, %v8740_v53 }
 0x1dd   :  { %3355 = vmatpush.msrb.mxu3 %v3354_v56  ;;  %2944 = vmatmul.f32.gmra.mxu0 %v7258_v16  ;;  %v3377_v47 = vsub.f32 %v8697_v23, %v11356_v8  ;;  %v3372_v56 = vand.u32 4294901760, %v3371_v44  ;;  %v3394_v8 = vand.u32 4294901760, %v8736_v38  ;;  %v3400_v44 = vand.u32 4294901760, %v8748_v31 }
 0x1de   :  { %3176 = vmatpush.msrb.mxu0 %v11357_v33  ;;  %3247 = vmatpush.msrb.mxu1 %v8444_v58  ;;  %v11359_v33 = vand.u32 4294901760, %v8440_v6  ;;  %v8775_v45 = vsub.f32 %v530_v42, %v8753_v27  ;;  %v3406_v6 = vand.u32 4294901760, %v8764_v32 }
 0x1df   :  { %3286 = vmatpush.msrb.mxu2 %v8648_v30  ;;  %3361 = vmatpush.msrb.mxu3 %v3360_v61  ;;  %v3378_v58 = vand.u32 4294901760, %v3377_v47  ;;  %v3389_v61 = vsub.f32 %v8723_v60, %v3388_v14  ;;  %v3395_v50 = vsub.f32 %v8736_v38, %v3394_v8  ;;  %v3401_v42 = vsub.f32 %v8748_v31, %v3400_v44 }
 0x1e0   :  { %3180 = vmatpush.msrb.mxu0 %v11358_v34  ;;  %3249 = vmatpush.msrb.mxu1 %v8457_v3  ;;  %v3384_v3 = vand.u32 4294901760, %v3383_v41  ;;  %v11361_v47 = vand.u32 4294901760, %v8466_v22  ;;  %v3407_v41 = vsub.f32 %v8764_v32, %v3406_v6 }
 0x1e1   :  { %3288 = vmatpush.msrb.mxu2 %v8661_v54  ;;  %3367 = vmatpush.msrb.mxu3 %v3366_v35  ;;  %v11360_v35 = vand.u32 4294901760, %v8450_v59  ;;  %v3412_v59 = vand.u32 4294901760, %v8775_v45  ;;  %v3402_v22 = vand.u32 4294901760, %v3401_v42  ;;  %v11378_v42 = vld [vmem:[#allocation19_spill] sm:$0xff] }
 0x1e2   :  { %3184 = vmatpush.msrb.mxu0 %v11359_v33  ;;  %3251 = vmatpush.msrb.mxu1 %v8468_v49  ;;  %v3390_v49 = vand.u32 4294901760, %v3389_v61  ;;  %v3408_v34 = vand.u32 4294901760, %v3407_v41  ;;  %v11371_v33 = vld [vmem:[#allocation17_spill] sm:$0xff] }
 0x1e3   :  { %3290 = vmatpush.msrb.mxu2 %v8673_v40  ;;  %3373 = vmatpush.msrb.mxu3 %v3372_v56  ;;  %v11362_v56 = vand.u32 4294901760, %v8482_v19  ;;  %v3413_v19 = vsub.f32 %v8775_v45, %v3412_v59 }
 0x1e4   :  { %3188 = vmatpush.msrb.mxu0 %v11360_v35  ;;  %3253 = vmatpush.msrb.mxu1 %v8475_v55  ;;  %v3396_v55 = vand.u32 4294901760, %v3395_v50  ;;  %v11373_v50 = vld [vmem:[#allocation25_spill] sm:$0xff] }
 0x1e5   :  { %3292 = vmatpush.msrb.mxu2 %v8685_v18  ;;  %3379 = vmatpush.msrb.mxu3 %v3378_v58  ;;  %v11368_v58 = vld [vmem:[#allocation12_spill] sm:$0xff]  ;;  %v11374_v35 = vand.u32 4294901760, %v11373_v50 }
 0x1e6   :  { %3192 = vmatpush.msrb.mxu0 %v11361_v47  ;;  %3255 = vmatpush.msrb.mxu1 %v8495_v43  ;;  %v11363_v43 = vand.u32 4294901760, %v8493_v2  ;;  %v11365_v2 = vand.u32 4294901760, %v8520_v12  ;;  %v11369_v12 = vld [vmem:[#allocation21_spill] sm:$0xff] }
 0x1e7   :  { %3294 = vmatpush.msrb.mxu2 %v8699_v51  ;;  %3385 = vmatpush.msrb.mxu3 %v3384_v3  ;;  %v11370_v61 = vand.u32 4294901760, %v11369_v12  ;;  %v11372_v3 = vand.u32 4294901760, %v11371_v33 }
 0x1e8   :  { %3196 = vmatpush.msrb.mxu0 %v11362_v56  ;;  %3257 = vmatpush.msrb.mxu1 %v8508_v15  ;;  %v11364_v15 = vand.u32 4294901760, %v8504_v20  ;;  %v11366_v20 = vand.u32 4294901760, %v8589_v7  ;;  %v11381_v56 = vld [vmem:[#allocation15_spill] sm:$0xff] }
 0x1e9   :  { %3296 = vmatpush.msrb.mxu2 %v8712_v0  ;;  %3391 = vmatpush.msrb.mxu3 %v3390_v49 }
 0x1ea   :  { %3200 = vmatpush.msrb.mxu0 %v11363_v43  ;;  %3259 = vmatpush.msrb.mxu1 %v8522_v63  ;;  %v3414_v63 = vand.u32 4294901760, %v3413_v19 }
 0x1eb   :  { %3298 = vmatpush.msrb.mxu2 %v8725_v10  ;;  %3397 = vmatpush.msrb.mxu3 %v3396_v55  ;;  %v523_v55 = vld [vmem:[#allocation2 + $0x3e0] sm:$0xff] }
 0x1ec   :  { %3204 = vmatpush.msrb.mxu0 %v11364_v15  ;;  %3261 = vmatpush.msrb.mxu1 %v8534_v62  ;;  %v11367_v62 = vand.u32 4294901760, %v8532_v17  ;;  %v11375_v17 = vld [vmem:[#allocation24_spill] sm:$0xff]  ;;  %v8856_v41 = vand.u32 4294901760, %v523_v55 }
 0x1ed   :  { %3300 = vmatpush.msrb.mxu2 %v8740_v53  ;;  %3403 = vmatpush.msrb.mxu3 %v3402_v22  ;;  %v11376_v49 = vand.u32 4294901760, %v11375_v17  ;;  %v507_v22 = vld [vmem:[#allocation2 + $0x360] sm:$0xff] }
 0x1ee   :  { %3263 = vmatmul.f32.vlgmr.msrb.gmra.mxu1 %v7203_v48  ;;  %3208 = vmatpush.msrb.mxu0 %v11365_v2  ;;  %v8871_v19 = vsub.f32 %v523_v55, %v8856_v41  ;;  %v8873_v15 = vand.u32 4294901760, %v507_v22 }
 0x1ef   :  { %3485 = vmatpush.msra.mxu1 %v8572_v9  ;;  %3302 = vmatpush.msrb.mxu2 %v8753_v27 }
 0x1f0   :  { %3409 = vmatpush.msrb.mxu3 %v3408_v34  ;;  %3308 = vmatmul.f32.vlgmr.msrb.gmra.mxu2 %v11303_v46 }
 0x1f1   :  { %3487 = vmatpush.msra.mxu1 %v8580_v24  ;;  %3532 = vmatpush.msra.mxu2 %v11366_v20  ;;  %v8892_v20 = vsub.f32 %v507_v22, %v8873_v15 }
 0x1f2   :  { %3212 = vmatpush.msrb.mxu0 %v11367_v62  ;;  %3415 = vmatpush.msrb.mxu3 %v3414_v63  ;;  %v11386_v63 = vand.u32 4294901760, %v8697_v23  ;;  %v483_v62 = vld [vmem:[#allocation2 + $0x2a0] sm:$0xff] }
 0x1f3   :  { %3417 = vmatmul.f32.vlgmr.msrb.gmra.mxu3 %v11368_v58  ;;  %3489 = vmatpush.msra.mxu1 %v8594_v26  ;;  %v8914_v33 = vand.u32 4294901760, %v483_v62 }
 0x1f4   :  { %3536 = vmatpush.msra.mxu2 %v11370_v61  ;;  %3603 = vmatpush.msra.mxu3 %v8572_v9  ;;  %v11377_v9 = vand.u32 4294901760, %v8621_v25  ;;  %v2302_v61 = vpop.f32.mrf.mxu1 }
 0x1f5   :  { %3216 = vmatpush.msrb.mxu0 %v11372_v3  ;;  %3491 = vmatpush.msra.mxu1 %v8603_v4  ;;  %v8916_v3 = vpop.f32.mrf.mxu2  ;;  %v8943_v17 = vsub.f32 %v483_v62, %v8914_v33 }
 0x1f6   :  { %3540 = vmatpush.msra.mxu2 %v11374_v35  ;;  %3605 = vmatpush.msra.mxu3 %v8580_v24  ;;  %v11379_v24 = vld [vmem:[#allocation10_spill] sm:$0xff] }
 0x1f7   :  { %3220 = vmatpush.msrb.mxu0 %v11376_v49  ;;  %3267 = vmatmul.f32.gmra.mxu1 %v11251_v11  ;;  %v11380_v47 = vand.u32 4294901760, %v11379_v24 }
 0x1f8   :  { %3222 = vmatmul.f32.vlgmr.msrb.gmra.mxu0 %v7203_v48  ;;  %3493 = vmatpush.msra.mxu1 %v8612_v37 }
 0x1f9   :  { %3427 = vmatpush.msra.mxu0 %v8589_v7  ;;  %3544 = vmatpush.msra.mxu2 %v11377_v9  ;;  %v11382_v7 = vand.u32 4294901760, %v8644_v39  ;;  %v459_v9 = vld [vmem:[#allocation2 + $0x1e0] sm:$0xff] }
 0x1fa   :  { %3607 = vmatpush.msra.mxu3 %v8594_v26  ;;  %3316 = vmatmul.f32.gmra.mxu2 %v11378_v42  ;;  %v515_v26 = vld [vmem:[#allocation2 + $0x3a0] sm:$0xff] }
 0x1fb   :  { %3430 = vmatpush.msra.mxu0 %v11369_v12  ;;  %3495 = vmatpush.msra.mxu1 %v8623_v28  ;;  %v8863_v43 = vand.u32 4294901760, %v515_v26 }
 0x1fc   :  { %3548 = vmatpush.msra.mxu2 %v11380_v47  ;;  %3609 = vmatpush.msra.mxu3 %v8603_v4  ;;  %v11383_v4 = vand.u32 4294901760, %v8659_v29 }
 0x1fd   :  { %3421 = vmatmul.f32.gmra.mxu3 %v11381_v56  ;;  %3433 = vmatpush.msra.mxu0 %v11373_v50  ;;  %v8881_v34 = vsub.f32 %v515_v26, %v8863_v43  ;;  %v8962_v26 = vand.u32 4294901760, %v459_v9 }
 0x1fe   :  { %3497 = vmatpush.msra.mxu1 %v8638_v5  ;;  %3552 = vmatpush.msra.mxu2 %v11382_v7  ;;  %v11388_v7 = vld [vmem:[#allocation14_spill] sm:$0xff] }
 0x1ff   :  { %3611 = vmatpush.msra.mxu3 %v8612_v37  ;;  %3436 = vmatpush.msra.mxu0 %v8621_v25  ;;  %v499_v37 = vld [vmem:[#allocation2 + $0x320] sm:$0xff]  ;;  %v11384_v25 = vand.u32 4294901760, %v8671_v1 }
 0x200   :  { %3499 = vmatpush.msra.mxu1 %v8648_v30  ;;  %3556 = vmatpush.msra.mxu2 %v11383_v4  ;;  %v8883_v2 = vand.u32 4294901760, %v499_v37 }
 0x201   :  { %3613 = vmatpush.msra.mxu3 %v8623_v28  ;;  %3226 = vmatmul.f32.gmra.mxu0 %v11251_v11  ;;  %v11385_v28 = vand.u32 4294901760, %v8683_v57 }
 0x202   :  { %3439 = vmatpush.msra.mxu0 %v11379_v24  ;;  %3501 = vmatpush.msra.mxu1 %v8661_v54  ;;  %v8903_v12 = vsub.f32 %v499_v37, %v8883_v2  ;;  %v443_v37 = vld [vmem:[#allocation2 + $0x160] sm:$0xff] }
 0x203   :  { %3560 = vmatpush.msra.mxu2 %v11384_v25  ;;  %3615 = vmatpush.msra.mxu3 %v8638_v5  ;;  %v491_v5 = vld [vmem:[#allocation2 + $0x2e0] sm:$0xff]  ;;  %v2306_v25 = vpop.f32.mrf.mxu1 }
 0x204   :  { %3442 = vmatpush.msra.mxu0 %v8644_v39  ;;  %3503 = vmatpush.msra.mxu1 %v8673_v40  ;;  %v11117_v39 = vand.u32 4294901760, %v8871_v19  ;;  %v11113_v50 = vand.u32 4294901760, %v8903_v12 }
 0x205   :  { %3564 = vmatpush.msra.mxu2 %v11385_v28  ;;  %3617 = vmatpush.msra.mxu3 %v8648_v30  ;;  %v8896_v30 = vand.u32 4294901760, %v491_v5 }
 0x206   :  { %3445 = vmatpush.msra.mxu0 %v8659_v29  ;;  %3505 = vmatpush.msra.mxu1 %v8685_v18  ;;  %v2193_v29 = vpop.f32.mrf.mxu0  ;;  %v3713_v47 = vsub.f32 %v8903_v12, %v11113_v50 }
 0x207   :  { %3568 = vmatpush.msra.mxu2 %v11386_v63  ;;  %3619 = vmatpush.msra.mxu3 %v8661_v54  ;;  %v11116_v54 = vand.u32 4294901760, %v8881_v34 }
 0x208   :  { %3448 = vmatpush.msra.mxu0 %v8671_v1  ;;  %3507 = vmatpush.msra.mxu1 %v8699_v51  ;;  %v475_v1 = vld [vmem:[#allocation2 + $0x260] sm:$0xff]  ;;  %v3714_v63 = vand.u32 4294901760, %v3713_v47 }
 0x209   :  { %3572 = vmatpush.msra.mxu2 %v3382_v52  ;;  %3621 = vmatpush.msra.mxu3 %v8673_v40  ;;  %v3695_v40 = vsub.f32 %v8871_v19, %v11117_v39  ;;  %v11115_v52 = vand.u32 4294901760, %v8892_v20  ;;  %v8930_v35 = vand.u32 4294901760, %v475_v1 }
 0x20a   :  { %3451 = vmatpush.msra.mxu0 %v8683_v57  ;;  %3509 = vmatpush.msra.mxu1 %v8712_v0  ;;  %v8921_v57 = vsub.f32 %v491_v5, %v8896_v30  ;;  %v435_v5 = vld [vmem:[#allocation2 + $0x120] sm:$0xff] }
 0x20b   :  { %3576 = vmatpush.msra.mxu2 %v3388_v14  ;;  %3623 = vmatpush.msra.mxu3 %v8685_v18  ;;  %v467_v14 = vld [vmem:[#allocation2 + $0x220] sm:$0xff]  ;;  %v3701_v18 = vsub.f32 %v8881_v34, %v11116_v54  ;;  %v8958_v55 = vsub.f32 %v475_v1, %v8930_v35  ;;  %v8986_v1 = vand.u32 4294901760, %v443_v37 }
 0x20c   :  { %3454 = vmatpush.msra.mxu0 %v8697_v23  ;;  %3511 = vmatpush.msra.mxu1 %v8725_v10  ;;  %v8932_v23 = vpop.f32.mrf.mxu3  ;;  %v8945_v49 = vand.u32 4294901760, %v467_v14 }
 0x20d   :  { %3580 = vmatpush.msra.mxu2 %v3394_v8  ;;  %3625 = vmatpush.msra.mxu3 %v8699_v51  ;;  %v3696_v51 = vand.u32 4294901760, %v3695_v40  ;;  %v3707_v8 = vsub.f32 %v8892_v20, %v11115_v52  ;;  %v11110_v62 = vand.u32 4294901760, %v8958_v55  ;;  %v9011_v47 = vsub.f32 %v443_v37, %v8986_v1  ;;  %v2520_v37 = vpop.f32.mrf.mxu1 }
 0x20e   :  { %3457 = vmatpush.msra.mxu0 %v8710_v13  ;;  %3513 = vmatpush.msra.mxu1 %v8740_v53  ;;  %v11112_v13 = vand.u32 4294901760, %v8921_v57  ;;  %v2201_v4 = vpop.f32.mrf.mxu0  ;;  %v8968_v22 = vsub.f32 %v467_v14, %v8945_v49  ;;  %v8993_v14 = vand.u32 4294901760, %v435_v5 }
 0x20f   :  { %3584 = vmatpush.msra.mxu2 %v3400_v44  ;;  %3627 = vmatpush.msra.mxu3 %v8712_v0  ;;  %v11387_v44 = vld [vmem:[#allocation20_spill] sm:$0xff]  ;;  %v3702_v0 = vand.u32 4294901760, %v3701_v18 }
 0x210   :  { %3460 = vmatpush.msra.mxu0 %v8723_v60  ;;  %3515 = vmatpush.msra.mxu1 %v8753_v27  ;;  %v2194_v24 = vadd.f32 %v2193_v29, %v11387_v44  ;;  %v451_v60 = vld [vmem:[#allocation2 + $0x1a0] sm:$0xff]  ;;  %v8979_v29 = vpop.f32.mrf.mxu2  ;;  %v11114_v40 = vand.u32 4294901760, %v8968_v22 }
 0x211   :  { %3588 = vmatpush.msra.mxu2 %v3406_v6  ;;  %3629 = vmatpush.msra.mxu3 %v8725_v10  ;;  %v3708_v10 = vand.u32 4294901760, %v3707_v8  ;;  %v11111_v6 = vand.u32 4294901760, %v8943_v17  ;;  %v8975_v28 = vand.u32 4294901760, %v451_v60  ;;  %v427_v18 = vld [vmem:[#allocation2 + $0xe0] sm:$0xff] }
 0x212   :  { %3519 = vmatmul.f32.vlgmr.msra.gmra.mxu1 %v11388_v7  ;;  %3463 = vmatpush.msra.mxu0 %v8736_v38  ;;  %v3719_v38 = vsub.f32 %v8921_v57, %v11112_v13  ;;  %v11391_v13 = vld [vmem:[#allocation13_spill] sm:$0xff]  ;;  %v627_v7 = vld [vmem:[#allocation2 + $0x720] sm:$0xff] }
 0x213   :  { %3697 = vmatpush.msrb.mxu1 %v3696_v51  ;;  %3592 = vmatpush.msra.mxu2 %v3412_v59  ;;  %v2303_v59 = vadd.f32 %v2302_v61, %v2194_v24  ;;  %v3725_v61 = vsub.f32 %v8943_v17, %v11111_v6  ;;  %v9000_v51 = vsub.f32 %v451_v60, %v8975_v28  ;;  %v419_v24 = vld [vmem:[#allocation2 + $0xa0] sm:$0xff]  ;;  %v9013_v60 = vand.u32 4294901760, %v427_v18 }
 0x214   :  { %3631 = vmatpush.msra.mxu3 %v8740_v53  ;;  %3594 = vmatmul.f32.vlgmr.msra.gmra.mxu2 %v11368_v58  ;;  %v8984_v53 = vsub.f32 %v459_v9, %v8962_v26  ;;  %v3731_v9 = vsub.f32 %v8958_v55, %v11110_v62  ;;  %v9022_v62 = vsub.f32 %v435_v5, %v8993_v14  ;;  %v411_v6 = vld [vmem:[#allocation2 + $0x60] sm:$0xff]  ;;  %v9026_v50 = vand.u32 4294901760, %v419_v24 }
 0x215   :  { %3703 = vmatpush.msrb.mxu1 %v3702_v0  ;;  %3799 = vmatpush.msrb.mxu2 %v8871_v19  ;;  %v2361_v8 = vadd.f32 %v8916_v3, %v2303_v59  ;;  %v11389_v3 = vld [vmem:[#allocation22_spill] sm:$0xff]  ;;  %v3726_v59 = vand.u32 4294901760, %v3725_v61  ;;  %v9038_v54 = vsub.f32 %v427_v18, %v9013_v60  ;;  %v11392_v52 = vand.u32 4294901760, %v9000_v51 }
 0x216   :  { %3466 = vmatpush.msra.mxu0 %v8748_v31  ;;  %3633 = vmatpush.msra.mxu3 %v8753_v27  ;;  %v8995_v31 = vpop.f32.mrf.mxu3  ;;  %v3720_v27 = vand.u32 4294901760, %v3719_v38  ;;  %v11118_v0 = vand.u32 4294901760, %v8984_v53  ;;  %v2479_v38 = vpop.f32.mrf.mxu0  ;;  %v3732_v61 = vand.u32 4294901760, %v3731_v9  ;;  %v11119_v39 = vand.u32 4294901760, %v9022_v62 }
 0x217   :  { %3635 = vmatmul.f32.vlgmr.msra.gmra.mxu3 %v11368_v58  ;;  %3709 = vmatpush.msrb.mxu1 %v3708_v10  ;;  %v2202_v10 = vadd.f32 %v2201_v4, %v11389_v3  ;;  %v3749_v18 = vsub.f32 %v9000_v51, %v11392_v52  ;;  %v571_v58 = vld [vmem:[#allocation2 + $0x560] sm:$0xff] }
 0x218   :  { %3802 = vmatpush.msrb.mxu2 %v8881_v34  ;;  %3857 = vmatpush.msrb.mxu3 %v8856_v41  ;;  %v2565_v5 = vpop.f32.mrf.mxu2 }
 0x219   :  { %3469 = vmatpush.msra.mxu0 %v8764_v32  ;;  %3715 = vmatpush.msrb.mxu1 %v3714_v63  ;;  %v11390_v32 = vld [vmem:[#allocation18_spill] sm:$0xff]  ;;  %v3737_v63 = vsub.f32 %v8968_v22, %v11114_v40  ;;  %v403_v40 = vld [vmem:[#allocation2 + $0x20] sm:$0xff] }
 0x21a   :  { %3805 = vmatpush.msrb.mxu2 %v8892_v20  ;;  %3859 = vmatpush.msrb.mxu3 %v8863_v43 }
 0x21b   :  { %3472 = vmatpush.msra.mxu0 %v8775_v45  ;;  %3525 = vmatmul.f32.gmra.mxu1 %v11390_v32  ;;  %v2405_v45 = vadd.f32 %v8932_v23, %v2361_v8  ;;  %v9040_v23 = vand.u32 4294901760, %v411_v6  ;;  %v2307_v8 = vadd.f32 %v2306_v25, %v2202_v10  ;;  %v3738_v9 = vand.u32 4294901760, %v3737_v63  ;;  %v651_v63 = vld [vmem:[#allocation2 + $0x7e0] sm:$0xff]  ;;  %v2524_v32 = vpop.f32.mrf.mxu1 }
 0x21c   :  { %3475 = vmatmul.f32.vlgmr.msra.gmra.mxu0 %v11391_v13  ;;  %3721 = vmatpush.msrb.mxu1 %v3720_v27  ;;  %v3743_v27 = vsub.f32 %v8984_v53, %v11118_v0  ;;  %v9050_v13 = vsub.f32 %v419_v24, %v9026_v50  ;;  %v9052_v25 = vand.u32 4294901760, %v403_v40 }
 0x21d   :  { %3644 = vmatpush.msrb.mxu0 %v8856_v41  ;;  %3808 = vmatpush.msrb.mxu2 %v8903_v12  ;;  %v2480_v4 = vadd.f32 %v2479_v38, %v2405_v45  ;;  %v11393_v38 = vand.u32 4294901760, %v9011_v47  ;;  %v9062_v52 = vsub.f32 %v411_v6, %v9040_v23  ;;  %v2366_v24 = vadd.f32 %v8979_v29, %v2307_v8  ;;  %v11396_v29 = vld [vmem:[#allocation16_spill] sm:$0xff] }
 0x21e   :  { %3861 = vmatpush.msrb.mxu3 %v8873_v15  ;;  %3598 = vmatmul.f32.gmra.mxu2 %v11381_v56  ;;  %v2674_v0 = vpop.f32.mrf.mxu3  ;;  %v3744_v10 = vand.u32 4294901760, %v3743_v27  ;;  %v3761_v45 = vsub.f32 %v9022_v62, %v11119_v39  ;;  %v3750_v27 = vand.u32 4294901760, %v3749_v18  ;;  %v9073_v6 = vsub.f32 %v403_v40, %v9052_v25  ;;  %v2483_v8 = vpop.f32.mrf.mxu0 }
 0x21f   :  { %3646 = vmatpush.msrb.mxu0 %v8863_v43  ;;  %3727 = vmatpush.msrb.mxu1 %v3726_v59  ;;  %v3755_v59 = vsub.f32 %v9011_v47, %v11393_v38  ;;  %11394 = vst [vmem:[#allocation26_spill] sm:$0xff] %v9062_v52  ;;  %v2411_v40 = vadd.f32 %v8995_v31, %v2366_v24  ;;  %v643_v38 = vld [vmem:[#allocation2 + $0x7a0] sm:$0xff]  ;;  %v9090_v18 = vand.u32 4294901760, %v651_v63 }
 0x220   :  { %3811 = vmatpush.msrb.mxu2 %v8921_v57  ;;  %3863 = vmatpush.msrb.mxu3 %v8883_v2  ;;  %11395 = vst [vmem:[#allocation23_spill] sm:$0xff] %v9073_v6  ;;  %v3762_v39 = vand.u32 4294901760, %v3761_v45  ;;  %v2573_v3 = vpop.f32.mrf.mxu2  ;;  %v11399_v45 = vand.u32 4294901760, %v9062_v52 }
 0x221   :  { %3639 = vmatmul.f32.gmra.mxu3 %v11381_v56  ;;  %3648 = vmatpush.msrb.mxu0 %v8873_v15  ;;  %v2484_v31 = vadd.f32 %v2483_v8, %v2411_v40  ;;  %v635_v8 = vld [vmem:[#allocation2 + $0x760] sm:$0xff] }
 0x222   :  { %3733 = vmatpush.msrb.mxu1 %v3732_v61  ;;  %3814 = vmatpush.msrb.mxu2 %v8943_v17  ;;  %v2521_v61 = vadd.f32 %v2520_v37, %v2480_v4  ;;  %v3756_v37 = vand.u32 4294901760, %v3755_v59  ;;  %v11397_v4 = vand.u32 4294901760, %v9038_v54 }
 0x223   :  { %3865 = vmatpush.msrb.mxu3 %v8896_v30  ;;  %3650 = vmatpush.msrb.mxu0 %v8883_v2 }
 0x224   :  { %3739 = vmatpush.msrb.mxu1 %v3738_v9  ;;  %3817 = vmatpush.msrb.mxu2 %v8958_v55  ;;  %v3767_v9 = vsub.f32 %v9038_v54, %v11397_v4  ;;  %v11120_v4 = vand.u32 4294901760, %v9073_v6 }
 0x225   :  { %3867 = vmatpush.msrb.mxu3 %v8914_v33  ;;  %3480 = vmatmul.f32.gmra.mxu0 %v11396_v29  ;;  %v2566_v29 = vadd.f32 %v2565_v5, %v2521_v61  ;;  %v3779_v61 = vsub.f32 %v9062_v52, %v11399_v45  ;;  %v2525_v45 = vadd.f32 %v2524_v32, %v2484_v31  ;;  %v619_v32 = vld [vmem:[#allocation2 + $0x6e0] sm:$0xff] }
 0x226   :  { %3652 = vmatpush.msrb.mxu0 %v8896_v30  ;;  %3745 = vmatpush.msrb.mxu1 %v3744_v10  ;;  %v11398_v10 = vand.u32 4294901760, %v9050_v13  ;;  %v2678_v24 = vpop.f32.mrf.mxu3  ;;  %v3768_v5 = vand.u32 4294901760, %v3767_v9  ;;  %v9107_v9 = vsub.f32 %v651_v63, %v9090_v18 }
 0x227   :  { %3820 = vmatpush.msrb.mxu2 %v8968_v22  ;;  %3869 = vmatpush.msrb.mxu3 %v8930_v35  ;;  %v2675_v40 = vadd.f32 %v2674_v0, %v2566_v29  ;;  %v3780_v0 = vand.u32 4294901760, %v3779_v61  ;;  %v9112_v29 = vand.u32 4294901760, %v635_v8  ;;  %v2574_v42 = vadd.f32 %v2573_v3, %v2525_v45 }
 0x228   :  { %3654 = vmatpush.msrb.mxu0 %v8914_v33  ;;  %3751 = vmatpush.msrb.mxu1 %v3750_v27  ;;  %v3773_v59 = vsub.f32 %v9050_v13, %v11398_v10  ;;  %v9098_v27 = vand.u32 4294901760, %v643_v38  ;;  %v11402_v3 = vand.u32 4294901760, %v9107_v9 }
 0x229   :  { %3823 = vmatpush.msrb.mxu2 %v8984_v53  ;;  %3871 = vmatpush.msrb.mxu3 %v8945_v49 }
 0x22a   :  { %3656 = vmatpush.msrb.mxu0 %v8930_v35  ;;  %3757 = vmatpush.msrb.mxu1 %v3756_v37  ;;  %v3774_v10 = vand.u32 4294901760, %v3773_v59  ;;  %v3785_v37 = vsub.f32 %v9073_v6, %v11120_v4  ;;  %v9115_v59 = vsub.f32 %v643_v38, %v9098_v27 }
 0x22b   :  { %3826 = vmatpush.msrb.mxu2 %v9000_v51  ;;  %3873 = vmatpush.msrb.mxu3 %v8962_v26  ;;  %v2851_v56 = vpop.f32.mrf.mxu2 }
 0x22c   :  { %3658 = vmatpush.msrb.mxu0 %v8945_v49  ;;  %3763 = vmatpush.msrb.mxu1 %v3762_v39  ;;  %v2776_v39 = vpop.f32.mrf.mxu1  ;;  %11400 = vst [vmem:[#allocation27_spill] sm:$0xff] %v9115_v59  ;;  %v3786_v63 = vand.u32 4294901760, %v3785_v37  ;;  %v11122_v38 = vand.u32 4294901760, %v9115_v59  ;;  %v9130_v37 = vand.u32 4294901760, %v619_v32 }
 0x22d   :  { %3829 = vmatpush.msrb.mxu2 %v9011_v47  ;;  %3875 = vmatpush.msrb.mxu3 %v8975_v28  ;;  %v2732_v44 = vpop.f32.mrf.mxu0 }
 0x22e   :  { %3660 = vmatpush.msrb.mxu0 %v8962_v26  ;;  %3769 = vmatpush.msrb.mxu1 %v3768_v5  ;;  %v2733_v4 = vadd.f32 %v2732_v44, %v2675_v40  ;;  %v9121_v5 = vand.u32 4294901760, %v627_v7  ;;  %v611_v44 = vld [vmem:[#allocation2 + $0x6a0] sm:$0xff]  ;;  %v9128_v40 = vsub.f32 %v635_v8, %v9112_v29  ;;  %v2892_v31 = vpop.f32.mrf.mxu3 }
 0x22f   :  { %3832 = vmatpush.msrb.mxu2 %v9022_v62  ;;  %3877 = vmatpush.msrb.mxu3 %v8986_v1 }
 0x230   :  { %3662 = vmatpush.msrb.mxu0 %v8975_v28  ;;  %3775 = vmatpush.msrb.mxu1 %v3774_v10  ;;  %v2777_v61 = vadd.f32 %v2776_v39, %v2733_v4  ;;  %11401 = vst [vmem:[#allocation21_spill] sm:$0xff] %v9128_v40  ;;  %v4067_v4 = vsub.f32 %v9107_v9, %v11402_v3  ;;  %v11404_v3 = vld [vmem:[#allocation8_spill] sm:$0xff] }
 0x231   :  { %3835 = vmatpush.msrb.mxu2 %v9038_v54  ;;  %3879 = vmatpush.msrb.mxu3 %v8993_v14  ;;  %v9139_v45 = vsub.f32 %v627_v7, %v9121_v5  ;;  %v2679_v39 = vadd.f32 %v2678_v24, %v2574_v42  ;;  %v587_v7 = vld [vmem:[#allocation2 + $0x5e0] sm:$0xff] }
 0x232   :  { %3664 = vmatpush.msrb.mxu0 %v8986_v1  ;;  %3781 = vmatpush.msrb.mxu1 %v3780_v0  ;;  %v2852_v10 = vadd.f32 %v2851_v56, %v2777_v61  ;;  %v9141_v0 = vand.u32 4294901760, %v611_v44  ;;  %v603_v56 = vld [vmem:[#allocation2 + $0x660] sm:$0xff] }
 0x233   :  { %3838 = vmatpush.msrb.mxu2 %v9050_v13  ;;  %3881 = vmatpush.msrb.mxu3 %v9013_v60  ;;  %v595_v61 = vld [vmem:[#allocation2 + $0x620] sm:$0xff]  ;;  %v9156_v24 = vand.u32 4294901760, %v603_v56 }
 0x234   :  { %3666 = vmatpush.msrb.mxu0 %v8993_v14  ;;  %3787 = vmatpush.msrb.mxu1 %v3786_v63  ;;  %v2893_v8 = vadd.f32 %v2892_v31, %v2852_v10  ;;  %v4073_v63 = vsub.f32 %v9115_v59, %v11122_v38  ;;  %v9152_v31 = vsub.f32 %v619_v32, %v9130_v37  ;;  %v4068_v38 = vand.u32 4294901760, %v4067_v4  ;;  %v11406_v59 = vld [vmem:[#allocation9_spill] sm:$0xff] }
 0x235   :  { %3841 = vmatpush.msrb.mxu2 %v9062_v52  ;;  %3883 = vmatpush.msrb.mxu3 %v9026_v50  ;;  %v2782_v52 = vpop.f32.mrf.mxu1  ;;  %v9162_v32 = vsub.f32 %v611_v44, %v9141_v0  ;;  %v11405_v4 = vand.u32 4294901760, %v9128_v40  ;;  %v563_v44 = vld [vmem:[#allocation2 + $0x520] sm:$0xff] }
 0x236   :  { %3789 = vmatmul.f32.vlgmr.msrb.gmra.mxu1 %v7203_v48  ;;  %3668 = vmatpush.msrb.mxu0 %v9013_v60  ;;  %6621 = vst [vmem:[#allocation5 + $0x10] sm:$0xff] %v2893_v8  ;;  %v2737_v42 = vpop.f32.mrf.mxu0  ;;  %v2855_v8 = vpop.f32.mrf.mxu2 }
 0x237   :  { %11403 = vst [vmem:[#allocation17_spill] sm:$0xff] %v9152_v31  ;;  %3975 = vmatpush.msra.mxu1 %v8856_v41  ;;  %3844 = vmatpush.msrb.mxu2 %v9073_v6  ;;  %v2738_v10 = vadd.f32 %v2737_v42, %v2679_v39  ;;  %v9166_v41 = vand.u32 4294901760, %v595_v61  ;;  %v4074_v39 = vand.u32 4294901760, %v4073_v63  ;;  %v4079_v42 = vsub.f32 %v9128_v40, %v11405_v4 }
 0x238   :  { %3885 = vmatpush.msrb.mxu3 %v9040_v23  ;;  %3847 = vmatmul.f32.vlgmr.msrb.gmra.mxu2 %v11404_v3  ;;  %v579_v3 = vld [vmem:[#allocation2 + $0x5a0] sm:$0xff]  ;;  %v11407_v63 = vand.u32 4294901760, %v9139_v45  ;;  %v2896_v40 = vpop.f32.mrf.mxu3 }
 0x239   :  { %3977 = vmatpush.msra.mxu1 %v8863_v43  ;;  %4016 = vmatpush.msra.mxu2 %v9090_v18  ;;  %v2783_v6 = vadd.f32 %v2782_v52, %v2738_v10  ;;  %v9177_v43 = vsub.f32 %v603_v56, %v9156_v24  ;;  %v9179_v10 = vand.u32 4294901760, %v587_v7  ;;  %v9191_v56 = vand.u32 4294901760, %v579_v3 }
 0x23a   :  { %3670 = vmatpush.msrb.mxu0 %v9026_v50  ;;  %3887 = vmatpush.msrb.mxu3 %v9052_v25  ;;  %v4085_v4 = vsub.f32 %v9139_v45, %v11407_v63 }
 0x23b   :  { %3891 = vmatmul.f32.vlgmr.msrb.gmra.mxu3 %v11406_v59  ;;  %3979 = vmatpush.msra.mxu1 %v8873_v15  ;;  %v2856_v52 = vadd.f32 %v2855_v8, %v2783_v6  ;;  %v9189_v15 = vsub.f32 %v595_v61, %v9166_v41  ;;  %v11408_v8 = vand.u32 4294901760, %v9152_v31  ;;  %v9203_v61 = vand.u32 4294901760, %v571_v58  ;;  %v555_v59 = vld [vmem:[#allocation2 + $0x4e0] sm:$0xff] }
 0x23c   :  { %4018 = vmatpush.msra.mxu2 %v9098_v27  ;;  %4069 = vmatpush.msra.mxu3 %v4068_v38  ;;  %v4080_v38 = vand.u32 4294901760, %v4079_v42  ;;  %v11410_v42 = vand.u32 4294901760, %v9162_v32 }
 0x23d   :  { %3672 = vmatpush.msrb.mxu0 %v9040_v23  ;;  %3981 = vmatpush.msra.mxu1 %v8883_v2  ;;  %v2897_v6 = vadd.f32 %v2896_v40, %v2856_v52  ;;  %v4091_v63 = vsub.f32 %v9152_v31, %v11408_v8  ;;  %v9201_v40 = vsub.f32 %v587_v7, %v9179_v10  ;;  %v11409_v52 = vld [vmem:[#allocation11_spill] sm:$0xff]  ;;  %v11411_v31 = vand.u32 4294901760, %v8871_v19  ;;  %v539_v7 = vld [vmem:[#allocation2 + $0x460] sm:$0xff] }
 0x23e   :  { %4020 = vmatpush.msra.mxu2 %v9112_v29  ;;  %4075 = vmatpush.msra.mxu3 %v4074_v39  ;;  %v4086_v39 = vand.u32 4294901760, %v4085_v4  ;;  %v4097_v8 = vsub.f32 %v9162_v32, %v11410_v42  ;;  %v9217_v2 = vand.u32 4294901760, %v563_v44  ;;  %v547_v4 = vld [vmem:[#allocation2 + $0x4a0] sm:$0xff]  ;;  %v11412_v42 = vand.u32 4294901760, %v8881_v34 }
 0x23f   :  { %3674 = vmatpush.msrb.mxu0 %v9052_v25  ;;  %3793 = vmatmul.f32.gmra.mxu1 %v11251_v11  ;;  %6629 = vst [vmem:[#allocation5 + $0x50] sm:$0xff] %v2897_v6  ;;  %v9215_v6 = vsub.f32 %v579_v3, %v9191_v56  ;;  %v11413_v19 = vand.u32 4294901760, %v9177_v43  ;;  %v9228_v3 = vsub.f32 %v571_v58, %v9203_v61  ;;  %v11414_v34 = vand.u32 4294901760, %v8892_v20 }
 0x240   :  { %3680 = vmatmul.f32.vlgmr.msrb.gmra.mxu0 %v11409_v52  ;;  %3983 = vmatpush.msra.mxu1 %v8896_v30  ;;  %v4092_v30 = vand.u32 4294901760, %v4091_v63  ;;  %v9230_v52 = vand.u32 4294901760, %v555_v59  ;;  %v9241_v58 = vsub.f32 %v563_v44, %v9217_v2  ;;  %v11416_v20 = vand.u32 4294901760, %v8903_v12 }
 0x241   :  { %3904 = vmatpush.msra.mxu0 %v11411_v31  ;;  %4022 = vmatpush.msra.mxu2 %v9121_v5  ;;  %v4103_v31 = vsub.f32 %v9177_v43, %v11413_v19  ;;  %v9243_v19 = vand.u32 4294901760, %v547_v4 }
 0x242   :  { %4081 = vmatpush.msra.mxu3 %v4080_v38  ;;  %3852 = vmatmul.f32.gmra.mxu2 %v7235_v21  ;;  %v4098_v38 = vand.u32 4294901760, %v4097_v8  ;;  %v11417_v8 = vand.u32 4294901760, %v9201_v40  ;;  %v9254_v44 = vsub.f32 %v555_v59, %v9230_v52 }
 0x243   :  { %3908 = vmatpush.msra.mxu0 %v11412_v42  ;;  %3985 = vmatpush.msra.mxu1 %v8914_v33  ;;  %v11415_v33 = vand.u32 4294901760, %v9189_v15  ;;  %v531_v42 = vld [vmem:[#allocation2 + $0x420] sm:$0xff]  ;;  %v9266_v59 = vsub.f32 %v547_v4, %v9243_v19  ;;  %v11420_v4 = vand.u32 4294901760, %v8943_v17 }
 0x244   :  { %4024 = vmatpush.msra.mxu2 %v9130_v37  ;;  %4087 = vmatpush.msra.mxu3 %v4086_v39  ;;  %v4104_v39 = vand.u32 4294901760, %v4103_v31 }
 0x245   :  { %3897 = vmatmul.f32.gmra.mxu3 %v7245_v36  ;;  %3912 = vmatpush.msra.mxu0 %v11414_v34  ;;  %v4109_v63 = vsub.f32 %v9189_v15, %v11415_v33  ;;  %v4115_v34 = vsub.f32 %v9201_v40, %v11417_v8  ;;  %v4126_v33 = vand.u32 4294901760, %v9228_v3  ;;  %v11419_v8 = vand.u32 4294901760, %v8921_v57 }
 0x246   :  { %3987 = vmatpush.msra.mxu1 %v8930_v35  ;;  %4026 = vmatpush.msra.mxu2 %v9141_v0  ;;  %v9258_v35 = vand.u32 4294901760, %v539_v7 }
 0x247   :  { %4093 = vmatpush.msra.mxu3 %v4092_v30  ;;  %3916 = vmatpush.msra.mxu0 %v11416_v20  ;;  %v4110_v12 = vand.u32 4294901760, %v4109_v63  ;;  %v11418_v30 = vand.u32 4294901760, %v9215_v6  ;;  %v4132_v20 = vand.u32 4294901760, %v9241_v58  ;;  %v4127_v63 = vsub.f32 %v9228_v3, %v4126_v33 }
 0x248   :  { %3989 = vmatpush.msra.mxu1 %v8945_v49  ;;  %4028 = vmatpush.msra.mxu2 %v9156_v24  ;;  %v9271_v49 = vand.u32 4294901760, %v531_v42  ;;  %v9282_v57 = vsub.f32 %v539_v7, %v9258_v35 }
 0x249   :  { %4099 = vmatpush.msra.mxu3 %v4098_v38  ;;  %3688 = vmatmul.f32.gmra.mxu0 %v7258_v16  ;;  %v4121_v31 = vsub.f32 %v9215_v6, %v11418_v30  ;;  %v4116_v38 = vand.u32 4294901760, %v4115_v34  ;;  %v4138_v30 = vand.u32 4294901760, %v9254_v44  ;;  %v4144_v34 = vand.u32 4294901760, %v9266_v59 }
 0x24a   :  { %3920 = vmatpush.msra.mxu0 %v11419_v8  ;;  %3991 = vmatpush.msra.mxu1 %v8962_v26  ;;  %v11421_v8 = vand.u32 4294901760, %v8958_v55  ;;  %v9293_v17 = vsub.f32 %v531_v42, %v9271_v49  ;;  %v4150_v55 = vand.u32 4294901760, %v9282_v57 }
 0x24b   :  { %4030 = vmatpush.msra.mxu2 %v9166_v41  ;;  %4105 = vmatpush.msra.mxu3 %v4104_v39  ;;  %v4122_v26 = vand.u32 4294901760, %v4121_v31  ;;  %v4133_v39 = vsub.f32 %v9241_v58, %v4132_v20  ;;  %v4139_v7 = vsub.f32 %v9254_v44, %v4138_v30  ;;  %v4145_v42 = vsub.f32 %v9266_v59, %v4144_v34 }
 0x24c   :  { %3924 = vmatpush.msra.mxu0 %v11420_v4  ;;  %3993 = vmatpush.msra.mxu1 %v8975_v28  ;;  %v4128_v28 = vand.u32 4294901760, %v4127_v63  ;;  %v11423_v31 = vand.u32 4294901760, %v8984_v53  ;;  %v4151_v63 = vsub.f32 %v9282_v57, %v4150_v55 }
 0x24d   :  { %4032 = vmatpush.msra.mxu2 %v9179_v10  ;;  %4111 = vmatpush.msra.mxu3 %v4110_v12  ;;  %v11422_v12 = vand.u32 4294901760, %v8968_v22  ;;  %v4156_v22 = vand.u32 4294901760, %v9293_v17  ;;  %v4146_v53 = vand.u32 4294901760, %v4145_v42  ;;  %v11440_v42 = vld [vmem:[#allocation19_spill] sm:$0xff] }
 0x24e   :  { %3928 = vmatpush.msra.mxu0 %v11421_v8  ;;  %3995 = vmatpush.msra.mxu1 %v8986_v1  ;;  %v4134_v1 = vand.u32 4294901760, %v4133_v39  ;;  %v4152_v4 = vand.u32 4294901760, %v4151_v63  ;;  %v11433_v8 = vld [vmem:[#allocation26_spill] sm:$0xff] }
 0x24f   :  { %4034 = vmatpush.msra.mxu2 %v9191_v56  ;;  %4117 = vmatpush.msra.mxu3 %v4116_v38  ;;  %v11424_v38 = vand.u32 4294901760, %v9000_v51  ;;  %v4157_v51 = vsub.f32 %v9293_v17, %v4156_v22 }
 0x250   :  { %3932 = vmatpush.msra.mxu0 %v11422_v12  ;;  %3997 = vmatpush.msra.mxu1 %v8993_v14  ;;  %v4140_v14 = vand.u32 4294901760, %v4139_v7  ;;  %v11435_v7 = vld [vmem:[#allocation21_spill] sm:$0xff] }
 0x251   :  { %4036 = vmatpush.msra.mxu2 %v9203_v61  ;;  %4123 = vmatpush.msra.mxu3 %v4122_v26  ;;  %v11430_v26 = vld [vmem:[#allocation12_spill] sm:$0xff]  ;;  %v11436_v12 = vand.u32 4294901760, %v11435_v7 }
 0x252   :  { %3936 = vmatpush.msra.mxu0 %v11423_v31  ;;  %3999 = vmatpush.msra.mxu1 %v9013_v60  ;;  %v11425_v60 = vand.u32 4294901760, %v9011_v47  ;;  %v11427_v47 = vand.u32 4294901760, %v9038_v54  ;;  %v11431_v54 = vld [vmem:[#allocation27_spill] sm:$0xff] }
 0x253   :  { %4038 = vmatpush.msra.mxu2 %v9217_v2  ;;  %4129 = vmatpush.msra.mxu3 %v4128_v28  ;;  %v11432_v39 = vand.u32 4294901760, %v11431_v54  ;;  %v11434_v28 = vand.u32 4294901760, %v11433_v8 }
 0x254   :  { %3940 = vmatpush.msra.mxu0 %v11424_v38  ;;  %4001 = vmatpush.msra.mxu1 %v9026_v50  ;;  %v11426_v50 = vand.u32 4294901760, %v9022_v62  ;;  %v11428_v62 = vand.u32 4294901760, %v9107_v9  ;;  %v11443_v38 = vld [vmem:[#allocation15_spill] sm:$0xff] }
 0x255   :  { %4040 = vmatpush.msra.mxu2 %v9230_v52  ;;  %4135 = vmatpush.msra.mxu3 %v4134_v1 }
 0x256   :  { %3944 = vmatpush.msra.mxu0 %v11425_v60  ;;  %4003 = vmatpush.msra.mxu1 %v9040_v23  ;;  %v4158_v23 = vand.u32 4294901760, %v4157_v51 }
 0x257   :  { %4042 = vmatpush.msra.mxu2 %v9243_v19  ;;  %4141 = vmatpush.msra.mxu3 %v4140_v14  ;;  %v524_v14 = vld [vmem:[#allocation2 + $0x3e8] sm:$0xff] }
 0x258   :  { %3948 = vmatpush.msra.mxu0 %v11426_v50  ;;  %4005 = vmatpush.msra.mxu1 %v9052_v25  ;;  %v11429_v25 = vand.u32 4294901760, %v9050_v13  ;;  %v11437_v13 = vld [vmem:[#allocation23_spill] sm:$0xff]  ;;  %v9374_v63 = vand.u32 4294901760, %v524_v14 }
 0x259   :  { %4044 = vmatpush.msra.mxu2 %v9258_v35  ;;  %4147 = vmatpush.msra.mxu3 %v4146_v53  ;;  %v11438_v1 = vand.u32 4294901760, %v11437_v13  ;;  %v508_v53 = vld [vmem:[#allocation2 + $0x368] sm:$0xff] }
 0x25a   :  { %4007 = vmatmul.f32.vlgmr.msra.gmra.mxu1 %v7203_v48  ;;  %3952 = vmatpush.msra.mxu0 %v11427_v47  ;;  %v9389_v51 = vsub.f32 %v524_v14, %v9374_v63  ;;  %v9391_v50 = vand.u32 4294901760, %v508_v53 }
 0x25b   :  { %4229 = vmatpush.msrb.mxu1 %v9090_v18  ;;  %4046 = vmatpush.msra.mxu2 %v9271_v49 }
 0x25c   :  { %4153 = vmatpush.msra.mxu3 %v4152_v4  ;;  %4052 = vmatmul.f32.vlgmr.msra.gmra.mxu2 %v11303_v46 }
 0x25d   :  { %4231 = vmatpush.msrb.mxu1 %v9098_v27  ;;  %4276 = vmatpush.msrb.mxu2 %v11428_v62  ;;  %v9410_v62 = vsub.f32 %v508_v53, %v9391_v50 }
 0x25e   :  { %3956 = vmatpush.msra.mxu0 %v11429_v25  ;;  %4159 = vmatpush.msra.mxu3 %v4158_v23  ;;  %v11448_v23 = vand.u32 4294901760, %v9215_v6  ;;  %v484_v25 = vld [vmem:[#allocation2 + $0x2a8] sm:$0xff] }
 0x25f   :  { %4161 = vmatmul.f32.vlgmr.msra.gmra.mxu3 %v11430_v26  ;;  %4233 = vmatpush.msrb.mxu1 %v9112_v29  ;;  %v9432_v8 = vand.u32 4294901760, %v484_v25 }
 0x260   :  { %4280 = vmatpush.msrb.mxu2 %v11432_v39  ;;  %4347 = vmatpush.msrb.mxu3 %v9090_v18  ;;  %v11439_v18 = vand.u32 4294901760, %v9139_v45  ;;  %v3046_v39 = vpop.f32.mrf.mxu1 }
 0x261   :  { %3960 = vmatpush.msra.mxu0 %v11434_v28  ;;  %4235 = vmatpush.msrb.mxu1 %v9121_v5  ;;  %v9434_v28 = vpop.f32.mrf.mxu2  ;;  %v9461_v13 = vsub.f32 %v484_v25, %v9432_v8 }
 0x262   :  { %4284 = vmatpush.msrb.mxu2 %v11436_v12  ;;  %4349 = vmatpush.msrb.mxu3 %v9098_v27  ;;  %v11441_v27 = vld [vmem:[#allocation17_spill] sm:$0xff] }
 0x263   :  { %3964 = vmatpush.msra.mxu0 %v11438_v1  ;;  %4011 = vmatmul.f32.gmra.mxu1 %v11251_v11  ;;  %v11442_v31 = vand.u32 4294901760, %v11441_v27 }
 0x264   :  { %3966 = vmatmul.f32.vlgmr.msra.gmra.mxu0 %v7203_v48  ;;  %4237 = vmatpush.msrb.mxu1 %v9130_v37 }
 0x265   :  { %4171 = vmatpush.msrb.mxu0 %v9107_v9  ;;  %4288 = vmatpush.msrb.mxu2 %v11439_v18  ;;  %v11444_v9 = vand.u32 4294901760, %v9162_v32  ;;  %v460_v18 = vld [vmem:[#allocation2 + $0x1e8] sm:$0xff] }
 0x266   :  { %4351 = vmatpush.msrb.mxu3 %v9112_v29  ;;  %4060 = vmatmul.f32.gmra.mxu2 %v11440_v42  ;;  %v516_v29 = vld [vmem:[#allocation2 + $0x3a8] sm:$0xff] }
 0x267   :  { %4174 = vmatpush.msrb.mxu0 %v11431_v54  ;;  %4239 = vmatpush.msrb.mxu1 %v9141_v0  ;;  %v9381_v60 = vand.u32 4294901760, %v516_v29 }
 0x268   :  { %4292 = vmatpush.msrb.mxu2 %v11442_v31  ;;  %4353 = vmatpush.msrb.mxu3 %v9121_v5  ;;  %v11445_v5 = vand.u32 4294901760, %v9177_v43 }
 0x269   :  { %4165 = vmatmul.f32.gmra.mxu3 %v11443_v38  ;;  %4177 = vmatpush.msrb.mxu0 %v11435_v7  ;;  %v9399_v4 = vsub.f32 %v516_v29, %v9381_v60  ;;  %v9480_v29 = vand.u32 4294901760, %v460_v18 }
 0x26a   :  { %4241 = vmatpush.msrb.mxu1 %v9156_v24  ;;  %4296 = vmatpush.msrb.mxu2 %v11444_v9  ;;  %v11450_v9 = vld [vmem:[#allocation14_spill] sm:$0xff] }
 0x26b   :  { %4355 = vmatpush.msrb.mxu3 %v9130_v37  ;;  %4180 = vmatpush.msrb.mxu0 %v9139_v45  ;;  %v500_v37 = vld [vmem:[#allocation2 + $0x328] sm:$0xff]  ;;  %v11446_v45 = vand.u32 4294901760, %v9189_v15 }
 0x26c   :  { %4243 = vmatpush.msrb.mxu1 %v9166_v41  ;;  %4300 = vmatpush.msrb.mxu2 %v11445_v5  ;;  %v9401_v47 = vand.u32 4294901760, %v500_v37 }
 0x26d   :  { %4357 = vmatpush.msrb.mxu3 %v9141_v0  ;;  %3970 = vmatmul.f32.gmra.mxu0 %v11251_v11  ;;  %v11447_v0 = vand.u32 4294901760, %v9201_v40 }
 0x26e   :  { %4183 = vmatpush.msrb.mxu0 %v11441_v27  ;;  %4245 = vmatpush.msrb.mxu1 %v9179_v10  ;;  %v9421_v54 = vsub.f32 %v500_v37, %v9401_v47  ;;  %v444_v37 = vld [vmem:[#allocation2 + $0x168] sm:$0xff] }
 0x26f   :  { %4304 = vmatpush.msrb.mxu2 %v11446_v45  ;;  %4359 = vmatpush.msrb.mxu3 %v9156_v24  ;;  %v492_v24 = vld [vmem:[#allocation2 + $0x2e8] sm:$0xff]  ;;  %v3050_v45 = vpop.f32.mrf.mxu1 }
 0x270   :  { %4186 = vmatpush.msrb.mxu0 %v9162_v32  ;;  %4247 = vmatpush.msrb.mxu1 %v9191_v56  ;;  %v11139_v32 = vand.u32 4294901760, %v9389_v51  ;;  %v11135_v7 = vand.u32 4294901760, %v9421_v54 }
 0x271   :  { %4308 = vmatpush.msrb.mxu2 %v11447_v0  ;;  %4361 = vmatpush.msrb.mxu3 %v9166_v41  ;;  %v9414_v41 = vand.u32 4294901760, %v492_v24 }
 0x272   :  { %4189 = vmatpush.msrb.mxu0 %v9177_v43  ;;  %4249 = vmatpush.msrb.mxu1 %v9203_v61  ;;  %v2937_v43 = vpop.f32.mrf.mxu0  ;;  %v4457_v31 = vsub.f32 %v9421_v54, %v11135_v7 }
 0x273   :  { %4312 = vmatpush.msrb.mxu2 %v11448_v23  ;;  %4363 = vmatpush.msrb.mxu3 %v9179_v10  ;;  %v11138_v10 = vand.u32 4294901760, %v9399_v4 }
 0x274   :  { %4192 = vmatpush.msrb.mxu0 %v9189_v15  ;;  %4251 = vmatpush.msrb.mxu1 %v9217_v2  ;;  %v476_v15 = vld [vmem:[#allocation2 + $0x268] sm:$0xff]  ;;  %v4458_v23 = vand.u32 4294901760, %v4457_v31 }
 0x275   :  { %4316 = vmatpush.msrb.mxu2 %v4126_v33  ;;  %4365 = vmatpush.msrb.mxu3 %v9191_v56  ;;  %v4439_v56 = vsub.f32 %v9389_v51, %v11139_v32  ;;  %v11137_v33 = vand.u32 4294901760, %v9410_v62  ;;  %v9448_v12 = vand.u32 4294901760, %v476_v15 }
 0x276   :  { %4195 = vmatpush.msrb.mxu0 %v9201_v40  ;;  %4253 = vmatpush.msrb.mxu1 %v9230_v52  ;;  %v9439_v40 = vsub.f32 %v492_v24, %v9414_v41  ;;  %v436_v24 = vld [vmem:[#allocation2 + $0x128] sm:$0xff] }
 0x277   :  { %4320 = vmatpush.msrb.mxu2 %v4132_v20  ;;  %4367 = vmatpush.msrb.mxu3 %v9203_v61  ;;  %v468_v20 = vld [vmem:[#allocation2 + $0x228] sm:$0xff]  ;;  %v4445_v61 = vsub.f32 %v9399_v4, %v11138_v10  ;;  %v9476_v14 = vsub.f32 %v476_v15, %v9448_v12  ;;  %v9504_v15 = vand.u32 4294901760, %v444_v37 }
 0x278   :  { %4198 = vmatpush.msrb.mxu0 %v9215_v6  ;;  %4255 = vmatpush.msrb.mxu1 %v9243_v19  ;;  %v9450_v6 = vpop.f32.mrf.mxu3  ;;  %v9463_v1 = vand.u32 4294901760, %v468_v20 }
 0x279   :  { %4324 = vmatpush.msrb.mxu2 %v4138_v30  ;;  %4369 = vmatpush.msrb.mxu3 %v9217_v2  ;;  %v4440_v2 = vand.u32 4294901760, %v4439_v56  ;;  %v4451_v30 = vsub.f32 %v9410_v62, %v11137_v33  ;;  %v11132_v25 = vand.u32 4294901760, %v9476_v14  ;;  %v9529_v31 = vsub.f32 %v444_v37, %v9504_v15  ;;  %v3264_v37 = vpop.f32.mrf.mxu1 }
 0x27a   :  { %4201 = vmatpush.msrb.mxu0 %v9228_v3  ;;  %4257 = vmatpush.msrb.mxu1 %v9258_v35  ;;  %v11134_v3 = vand.u32 4294901760, %v9439_v40  ;;  %v2945_v5 = vpop.f32.mrf.mxu0  ;;  %v9486_v53 = vsub.f32 %v468_v20, %v9463_v1  ;;  %v9511_v20 = vand.u32 4294901760, %v436_v24 }
 0x27b   :  { %4328 = vmatpush.msrb.mxu2 %v4144_v34  ;;  %4371 = vmatpush.msrb.mxu3 %v9230_v52  ;;  %v11449_v34 = vld [vmem:[#allocation20_spill] sm:$0xff]  ;;  %v4446_v52 = vand.u32 4294901760, %v4445_v61  ;;  %v428_v61 = vld [vmem:[#allocation2 + $0xe8] sm:$0xff] }
 0x27c   :  { %4204 = vmatpush.msrb.mxu0 %v9241_v58  ;;  %4259 = vmatpush.msrb.mxu1 %v9271_v49  ;;  %v2938_v27 = vadd.f32 %v2937_v43, %v11449_v34  ;;  %v452_v58 = vld [vmem:[#allocation2 + $0x1a8] sm:$0xff]  ;;  %v9497_v43 = vpop.f32.mrf.mxu2  ;;  %v11136_v56 = vand.u32 4294901760, %v9486_v53 }
 0x27d   :  { %4332 = vmatpush.msrb.mxu2 %v4150_v55  ;;  %4373 = vmatpush.msrb.mxu3 %v9243_v19  ;;  %v4452_v19 = vand.u32 4294901760, %v4451_v30  ;;  %v11133_v55 = vand.u32 4294901760, %v9461_v13  ;;  %v9493_v0 = vand.u32 4294901760, %v452_v58 }
 0x27e   :  { %4263 = vmatmul.f32.vlgmr.msrb.gmra.mxu1 %v11450_v9  ;;  %4207 = vmatpush.msrb.mxu0 %v9254_v44  ;;  %v4463_v44 = vsub.f32 %v9439_v40, %v11134_v3  ;;  %v11453_v3 = vld [vmem:[#allocation13_spill] sm:$0xff] }
 0x27f   :  { %4441 = vmatpush.msra.mxu1 %v4440_v2  ;;  %4336 = vmatpush.msrb.mxu2 %v4156_v22  ;;  %v3047_v22 = vadd.f32 %v3046_v39, %v2938_v27  ;;  %v4469_v39 = vsub.f32 %v9461_v13, %v11133_v55  ;;  %v9518_v2 = vsub.f32 %v452_v58, %v9493_v0  ;;  %v420_v27 = vld [vmem:[#allocation2 + $0xa8] sm:$0xff]  ;;  %v9531_v58 = vand.u32 4294901760, %v428_v61 }
 0x280   :  { %4375 = vmatpush.msrb.mxu3 %v9258_v35  ;;  %4338 = vmatmul.f32.vlgmr.msrb.gmra.mxu2 %v11430_v26  ;;  %v9502_v35 = vsub.f32 %v460_v18, %v9480_v29  ;;  %v4475_v18 = vsub.f32 %v9476_v14, %v11132_v25  ;;  %v9540_v25 = vsub.f32 %v436_v24, %v9511_v20  ;;  %v412_v55 = vld [vmem:[#allocation2 + $0x68] sm:$0xff]  ;;  %v9544_v7 = vand.u32 4294901760, %v420_v27 }
 0x281   :  { %4447 = vmatpush.msra.mxu1 %v4446_v52  ;;  %4543 = vmatpush.msra.mxu2 %v9389_v51  ;;  %v3105_v30 = vadd.f32 %v9434_v28, %v3047_v22  ;;  %v11451_v28 = vld [vmem:[#allocation22_spill] sm:$0xff]  ;;  %v4470_v22 = vand.u32 4294901760, %v4469_v39  ;;  %v9556_v10 = vsub.f32 %v428_v61, %v9531_v58  ;;  %v11454_v33 = vand.u32 4294901760, %v9518_v2  ;;  %v628_v9 = vld [vmem:[#allocation2 + $0x728] sm:$0xff] }
 0x282   :  { %4210 = vmatpush.msrb.mxu0 %v9266_v59  ;;  %4377 = vmatpush.msrb.mxu3 %v9271_v49  ;;  %v9513_v59 = vpop.f32.mrf.mxu3  ;;  %v4464_v49 = vand.u32 4294901760, %v4463_v44  ;;  %v11140_v52 = vand.u32 4294901760, %v9502_v35  ;;  %v3223_v44 = vpop.f32.mrf.mxu0  ;;  %v4476_v39 = vand.u32 4294901760, %v4475_v18  ;;  %v11141_v32 = vand.u32 4294901760, %v9540_v25 }
 0x283   :  { %4379 = vmatmul.f32.vlgmr.msrb.gmra.mxu3 %v11430_v26  ;;  %4453 = vmatpush.msra.mxu1 %v4452_v19  ;;  %v2946_v19 = vadd.f32 %v2945_v5, %v11451_v28  ;;  %v4493_v61 = vsub.f32 %v9518_v2, %v11454_v33  ;;  %v572_v26 = vld [vmem:[#allocation2 + $0x568] sm:$0xff] }
 0x284   :  { %4546 = vmatpush.msra.mxu2 %v9399_v4  ;;  %4601 = vmatpush.msra.mxu3 %v9374_v63  ;;  %v3309_v24 = vpop.f32.mrf.mxu2 }
 0x285   :  { %4213 = vmatpush.msrb.mxu0 %v9282_v57  ;;  %4459 = vmatpush.msra.mxu1 %v4458_v23  ;;  %v11452_v57 = vld [vmem:[#allocation18_spill] sm:$0xff]  ;;  %v4481_v23 = vsub.f32 %v9486_v53, %v11136_v56  ;;  %v404_v56 = vld [vmem:[#allocation2 + $0x28] sm:$0xff] }
 0x286   :  { %4549 = vmatpush.msra.mxu2 %v9410_v62  ;;  %4603 = vmatpush.msra.mxu3 %v9381_v60 }
 0x287   :  { %4216 = vmatpush.msrb.mxu0 %v9293_v17  ;;  %4269 = vmatmul.f32.gmra.mxu1 %v11452_v57  ;;  %v3149_v17 = vadd.f32 %v9450_v6, %v3105_v30  ;;  %v9558_v6 = vand.u32 4294901760, %v412_v55  ;;  %v3051_v30 = vadd.f32 %v3050_v45, %v2946_v19  ;;  %v4482_v18 = vand.u32 4294901760, %v4481_v23  ;;  %v652_v23 = vld [vmem:[#allocation2 + $0x7e8] sm:$0xff]  ;;  %v3268_v57 = vpop.f32.mrf.mxu1 }
 0x288   :  { %4219 = vmatmul.f32.vlgmr.msrb.gmra.mxu0 %v11453_v3  ;;  %4465 = vmatpush.msra.mxu1 %v4464_v49  ;;  %v4487_v49 = vsub.f32 %v9502_v35, %v11140_v52  ;;  %v9568_v3 = vsub.f32 %v420_v27, %v9544_v7  ;;  %v9570_v45 = vand.u32 4294901760, %v404_v56 }
 0x289   :  { %4388 = vmatpush.msra.mxu0 %v9374_v63  ;;  %4552 = vmatpush.msra.mxu2 %v9421_v54  ;;  %v3224_v5 = vadd.f32 %v3223_v44, %v3149_v17  ;;  %v11455_v44 = vand.u32 4294901760, %v9529_v31  ;;  %v9580_v33 = vsub.f32 %v412_v55, %v9558_v6  ;;  %v3110_v27 = vadd.f32 %v9497_v43, %v3051_v30  ;;  %v11458_v43 = vld [vmem:[#allocation16_spill] sm:$0xff] }
 0x28a   :  { %4605 = vmatpush.msra.mxu3 %v9391_v50  ;;  %4342 = vmatmul.f32.gmra.mxu2 %v11443_v38  ;;  %v3418_v52 = vpop.f32.mrf.mxu3  ;;  %v4488_v19 = vand.u32 4294901760, %v4487_v49  ;;  %v4505_v17 = vsub.f32 %v9540_v25, %v11141_v32  ;;  %v4494_v49 = vand.u32 4294901760, %v4493_v61  ;;  %v9591_v55 = vsub.f32 %v404_v56, %v9570_v45  ;;  %v3227_v30 = vpop.f32.mrf.mxu0 }
 0x28b   :  { %4390 = vmatpush.msra.mxu0 %v9381_v60  ;;  %4471 = vmatpush.msra.mxu1 %v4470_v22  ;;  %v4499_v22 = vsub.f32 %v9529_v31, %v11455_v44  ;;  %11456 = vst [vmem:[#allocation25_spill] sm:$0xff] %v9580_v33  ;;  %v3155_v56 = vadd.f32 %v9513_v59, %v3110_v27  ;;  %v644_v44 = vld [vmem:[#allocation2 + $0x7a8] sm:$0xff]  ;;  %v9608_v61 = vand.u32 4294901760, %v652_v23 }
 0x28c   :  { %4555 = vmatpush.msra.mxu2 %v9439_v40  ;;  %4607 = vmatpush.msra.mxu3 %v9401_v47  ;;  %11457 = vst [vmem:[#allocation24_spill] sm:$0xff] %v9591_v55  ;;  %v4506_v32 = vand.u32 4294901760, %v4505_v17  ;;  %v3317_v28 = vpop.f32.mrf.mxu2  ;;  %v11461_v17 = vand.u32 4294901760, %v9580_v33 }
 0x28d   :  { %4383 = vmatmul.f32.gmra.mxu3 %v11443_v38  ;;  %4392 = vmatpush.msra.mxu0 %v9391_v50  ;;  %v3228_v59 = vadd.f32 %v3227_v30, %v3155_v56  ;;  %v636_v30 = vld [vmem:[#allocation2 + $0x768] sm:$0xff] }
 0x28e   :  { %4477 = vmatpush.msra.mxu1 %v4476_v39  ;;  %4558 = vmatpush.msra.mxu2 %v9461_v13  ;;  %v3265_v39 = vadd.f32 %v3264_v37, %v3224_v5  ;;  %v4500_v37 = vand.u32 4294901760, %v4499_v22  ;;  %v11459_v5 = vand.u32 4294901760, %v9556_v10 }
 0x28f   :  { %4609 = vmatpush.msra.mxu3 %v9414_v41  ;;  %4394 = vmatpush.msra.mxu0 %v9401_v47 }
 0x290   :  { %4483 = vmatpush.msra.mxu1 %v4482_v18  ;;  %4561 = vmatpush.msra.mxu2 %v9476_v14  ;;  %v4511_v18 = vsub.f32 %v9556_v10, %v11459_v5  ;;  %v11142_v5 = vand.u32 4294901760, %v9591_v55 }
 0x291   :  { %4611 = vmatpush.msra.mxu3 %v9432_v8  ;;  %4224 = vmatmul.f32.gmra.mxu0 %v11458_v43  ;;  %v3310_v43 = vadd.f32 %v3309_v24, %v3265_v39  ;;  %v4523_v39 = vsub.f32 %v9580_v33, %v11461_v17  ;;  %v3269_v17 = vadd.f32 %v3268_v57, %v3228_v59  ;;  %v620_v57 = vld [vmem:[#allocation2 + $0x6e8] sm:$0xff] }
 0x292   :  { %4396 = vmatpush.msra.mxu0 %v9414_v41  ;;  %4489 = vmatpush.msra.mxu1 %v4488_v19  ;;  %v11460_v19 = vand.u32 4294901760, %v9568_v3  ;;  %v3422_v27 = vpop.f32.mrf.mxu3  ;;  %v4512_v24 = vand.u32 4294901760, %v4511_v18  ;;  %v9625_v18 = vsub.f32 %v652_v23, %v9608_v61 }
 0x293   :  { %4564 = vmatpush.msra.mxu2 %v9486_v53  ;;  %4613 = vmatpush.msra.mxu3 %v9448_v12  ;;  %v3419_v56 = vadd.f32 %v3418_v52, %v3310_v43  ;;  %v4524_v52 = vand.u32 4294901760, %v4523_v39  ;;  %v9630_v43 = vand.u32 4294901760, %v636_v30  ;;  %v3318_v42 = vadd.f32 %v3317_v28, %v3269_v17 }
 0x294   :  { %4398 = vmatpush.msra.mxu0 %v9432_v8  ;;  %4495 = vmatpush.msra.mxu1 %v4494_v49  ;;  %v4517_v22 = vsub.f32 %v9568_v3, %v11460_v19  ;;  %v9616_v49 = vand.u32 4294901760, %v644_v44  ;;  %v11464_v28 = vand.u32 4294901760, %v9625_v18 }
 0x295   :  { %4567 = vmatpush.msra.mxu2 %v9502_v35  ;;  %4615 = vmatpush.msra.mxu3 %v9463_v1 }
 0x296   :  { %4400 = vmatpush.msra.mxu0 %v9448_v12  ;;  %4501 = vmatpush.msra.mxu1 %v4500_v37  ;;  %v4518_v19 = vand.u32 4294901760, %v4517_v22  ;;  %v4529_v37 = vsub.f32 %v9591_v55, %v11142_v5  ;;  %v9633_v22 = vsub.f32 %v644_v44, %v9616_v49 }
 0x297   :  { %4570 = vmatpush.msra.mxu2 %v9518_v2  ;;  %4617 = vmatpush.msra.mxu3 %v9480_v29  ;;  %v3595_v38 = vpop.f32.mrf.mxu2 }
 0x298   :  { %4402 = vmatpush.msra.mxu0 %v9463_v1  ;;  %4507 = vmatpush.msra.mxu1 %v4506_v32  ;;  %v3520_v32 = vpop.f32.mrf.mxu1  ;;  %11462 = vst [vmem:[#allocation10_spill] sm:$0xff] %v9633_v22  ;;  %v4530_v23 = vand.u32 4294901760, %v4529_v37  ;;  %v11144_v44 = vand.u32 4294901760, %v9633_v22  ;;  %v9648_v37 = vand.u32 4294901760, %v620_v57 }
 0x299   :  { %4573 = vmatpush.msra.mxu2 %v9529_v31  ;;  %4619 = vmatpush.msra.mxu3 %v9493_v0  ;;  %v3476_v34 = vpop.f32.mrf.mxu0 }
 0x29a   :  { %4404 = vmatpush.msra.mxu0 %v9480_v29  ;;  %4513 = vmatpush.msra.mxu1 %v4512_v24  ;;  %v3477_v5 = vadd.f32 %v3476_v34, %v3419_v56  ;;  %v9639_v24 = vand.u32 4294901760, %v628_v9  ;;  %v612_v34 = vld [vmem:[#allocation2 + $0x6a8] sm:$0xff]  ;;  %v9646_v56 = vsub.f32 %v636_v30, %v9630_v43  ;;  %v3636_v59 = vpop.f32.mrf.mxu3 }
 0x29b   :  { %4576 = vmatpush.msra.mxu2 %v9540_v25  ;;  %4621 = vmatpush.msra.mxu3 %v9504_v15 }
 0x29c   :  { %4406 = vmatpush.msra.mxu0 %v9493_v0  ;;  %4519 = vmatpush.msra.mxu1 %v4518_v19  ;;  %v3521_v39 = vadd.f32 %v3520_v32, %v3477_v5  ;;  %11463 = vst [vmem:[#allocation27_spill] sm:$0xff] %v9646_v56  ;;  %v4811_v5 = vsub.f32 %v9625_v18, %v11464_v28  ;;  %v11466_v28 = vld [vmem:[#allocation8_spill] sm:$0xff] }
 0x29d   :  { %4579 = vmatpush.msra.mxu2 %v9556_v10  ;;  %4623 = vmatpush.msra.mxu3 %v9511_v20  ;;  %v9657_v17 = vsub.f32 %v628_v9, %v9639_v24  ;;  %v3423_v32 = vadd.f32 %v3422_v27, %v3318_v42  ;;  %v588_v9 = vld [vmem:[#allocation2 + $0x5e8] sm:$0xff] }
 0x29e   :  { %4408 = vmatpush.msra.mxu0 %v9504_v15  ;;  %4525 = vmatpush.msra.mxu1 %v4524_v52  ;;  %v3596_v19 = vadd.f32 %v3595_v38, %v3521_v39  ;;  %v9659_v52 = vand.u32 4294901760, %v612_v34  ;;  %v604_v38 = vld [vmem:[#allocation2 + $0x668] sm:$0xff] }
 0x29f   :  { %4582 = vmatpush.msra.mxu2 %v9568_v3  ;;  %4625 = vmatpush.msra.mxu3 %v9531_v58  ;;  %v596_v39 = vld [vmem:[#allocation2 + $0x628] sm:$0xff]  ;;  %v9674_v27 = vand.u32 4294901760, %v604_v38 }
 0x2a0   :  { %4410 = vmatpush.msra.mxu0 %v9511_v20  ;;  %4531 = vmatpush.msra.mxu1 %v4530_v23  ;;  %v3637_v30 = vadd.f32 %v3636_v59, %v3596_v19  ;;  %v4817_v23 = vsub.f32 %v9633_v22, %v11144_v44  ;;  %v9670_v59 = vsub.f32 %v620_v57, %v9648_v37  ;;  %v4812_v44 = vand.u32 4294901760, %v4811_v5  ;;  %v11468_v22 = vld [vmem:[#allocation9_spill] sm:$0xff] }
 0x2a1   :  { %4585 = vmatpush.msra.mxu2 %v9580_v33  ;;  %4627 = vmatpush.msra.mxu3 %v9544_v7  ;;  %v3526_v33 = vpop.f32.mrf.mxu1  ;;  %v9680_v57 = vsub.f32 %v612_v34, %v9659_v52  ;;  %v11467_v5 = vand.u32 4294901760, %v9646_v56  ;;  %v564_v34 = vld [vmem:[#allocation2 + $0x528] sm:$0xff] }
 0x2a2   :  { %4533 = vmatmul.f32.vlgmr.msra.gmra.mxu1 %v7203_v48  ;;  %4412 = vmatpush.msra.mxu0 %v9531_v58  ;;  %6622 = vst [vmem:[#allocation5 + $0x18] sm:$0xff] %v3637_v30  ;;  %v3481_v42 = vpop.f32.mrf.mxu0  ;;  %v3599_v30 = vpop.f32.mrf.mxu2 }
 0x2a3   :  { %11465 = vst [vmem:[#allocation26_spill] sm:$0xff] %v9670_v59  ;;  %4719 = vmatpush.msrb.mxu1 %v9374_v63  ;;  %4588 = vmatpush.msra.mxu2 %v9591_v55  ;;  %v3482_v19 = vadd.f32 %v3481_v42, %v3423_v32  ;;  %v9684_v63 = vand.u32 4294901760, %v596_v39  ;;  %v4818_v32 = vand.u32 4294901760, %v4817_v23  ;;  %v4823_v42 = vsub.f32 %v9646_v56, %v11467_v5 }
 0x2a4   :  { %4629 = vmatpush.msra.mxu3 %v9558_v6  ;;  %4591 = vmatmul.f32.vlgmr.msra.gmra.mxu2 %v11466_v28  ;;  %v580_v28 = vld [vmem:[#allocation2 + $0x5a8] sm:$0xff]  ;;  %v11469_v23 = vand.u32 4294901760, %v9657_v17  ;;  %v3640_v56 = vpop.f32.mrf.mxu3 }
 0x2a5   :  { %4721 = vmatpush.msrb.mxu1 %v9381_v60  ;;  %4760 = vmatpush.msrb.mxu2 %v9608_v61  ;;  %v3527_v55 = vadd.f32 %v3526_v33, %v3482_v19  ;;  %v9695_v60 = vsub.f32 %v604_v38, %v9674_v27  ;;  %v9697_v19 = vand.u32 4294901760, %v588_v9  ;;  %v9709_v38 = vand.u32 4294901760, %v580_v28 }
 0x2a6   :  { %4414 = vmatpush.msra.mxu0 %v9544_v7  ;;  %4631 = vmatpush.msra.mxu3 %v9570_v45  ;;  %v4829_v5 = vsub.f32 %v9657_v17, %v11469_v23 }
 0x2a7   :  { %4635 = vmatmul.f32.vlgmr.msra.gmra.mxu3 %v11468_v22  ;;  %4723 = vmatpush.msrb.mxu1 %v9391_v50  ;;  %v3600_v33 = vadd.f32 %v3599_v30, %v3527_v55  ;;  %v9707_v50 = vsub.f32 %v596_v39, %v9684_v63  ;;  %v11470_v30 = vand.u32 4294901760, %v9670_v59  ;;  %v9721_v39 = vand.u32 4294901760, %v572_v26  ;;  %v556_v22 = vld [vmem:[#allocation2 + $0x4e8] sm:$0xff] }
 0x2a8   :  { %4762 = vmatpush.msrb.mxu2 %v9616_v49  ;;  %4813 = vmatpush.msrb.mxu3 %v4812_v44  ;;  %v4824_v44 = vand.u32 4294901760, %v4823_v42  ;;  %v11472_v42 = vand.u32 4294901760, %v9680_v57 }
 0x2a9   :  { %4416 = vmatpush.msra.mxu0 %v9558_v6  ;;  %4725 = vmatpush.msrb.mxu1 %v9401_v47  ;;  %v3641_v55 = vadd.f32 %v3640_v56, %v3600_v33  ;;  %v4835_v23 = vsub.f32 %v9670_v59, %v11470_v30  ;;  %v9719_v56 = vsub.f32 %v588_v9, %v9697_v19  ;;  %v11471_v33 = vld [vmem:[#allocation11_spill] sm:$0xff]  ;;  %v11473_v59 = vand.u32 4294901760, %v9389_v51  ;;  %v540_v9 = vld [vmem:[#allocation2 + $0x468] sm:$0xff] }
 0x2aa   :  { %4764 = vmatpush.msrb.mxu2 %v9630_v43  ;;  %4819 = vmatpush.msrb.mxu3 %v4818_v32  ;;  %v4830_v32 = vand.u32 4294901760, %v4829_v5  ;;  %v4841_v30 = vsub.f32 %v9680_v57, %v11472_v42  ;;  %v9735_v47 = vand.u32 4294901760, %v564_v34  ;;  %v548_v5 = vld [vmem:[#allocation2 + $0x4a8] sm:$0xff]  ;;  %v11474_v42 = vand.u32 4294901760, %v9399_v4 }
 0x2ab   :  { %4418 = vmatpush.msra.mxu0 %v9570_v45  ;;  %4537 = vmatmul.f32.gmra.mxu1 %v11251_v11  ;;  %6630 = vst [vmem:[#allocation5 + $0x58] sm:$0xff] %v3641_v55  ;;  %v9733_v55 = vsub.f32 %v580_v28, %v9709_v38  ;;  %v11475_v51 = vand.u32 4294901760, %v9695_v60  ;;  %v9746_v28 = vsub.f32 %v572_v26, %v9721_v39  ;;  %v11476_v4 = vand.u32 4294901760, %v9410_v62 }
 0x2ac   :  { %4424 = vmatmul.f32.vlgmr.msra.gmra.mxu0 %v11471_v33  ;;  %4727 = vmatpush.msrb.mxu1 %v9414_v41  ;;  %v4836_v41 = vand.u32 4294901760, %v4835_v23  ;;  %v9748_v33 = vand.u32 4294901760, %v556_v22  ;;  %v9759_v26 = vsub.f32 %v564_v34, %v9735_v47  ;;  %v11478_v62 = vand.u32 4294901760, %v9421_v54 }
 0x2ad   :  { %4648 = vmatpush.msrb.mxu0 %v11473_v59  ;;  %4766 = vmatpush.msrb.mxu2 %v9639_v24  ;;  %v4847_v59 = vsub.f32 %v9695_v60, %v11475_v51  ;;  %v9761_v51 = vand.u32 4294901760, %v548_v5 }
 0x2ae   :  { %4825 = vmatpush.msrb.mxu3 %v4824_v44  ;;  %4596 = vmatmul.f32.gmra.mxu2 %v7235_v21  ;;  %v4842_v44 = vand.u32 4294901760, %v4841_v30  ;;  %v11479_v30 = vand.u32 4294901760, %v9719_v56  ;;  %v9772_v34 = vsub.f32 %v556_v22, %v9748_v33 }
 0x2af   :  { %4652 = vmatpush.msrb.mxu0 %v11474_v42  ;;  %4729 = vmatpush.msrb.mxu1 %v9432_v8  ;;  %v11477_v8 = vand.u32 4294901760, %v9707_v50  ;;  %v532_v42 = vld [vmem:[#allocation2 + $0x428] sm:$0xff]  ;;  %v9784_v22 = vsub.f32 %v548_v5, %v9761_v51  ;;  %v11482_v5 = vand.u32 4294901760, %v9461_v13 }
 0x2b0   :  { %4768 = vmatpush.msrb.mxu2 %v9648_v37  ;;  %4831 = vmatpush.msrb.mxu3 %v4830_v32  ;;  %v4848_v32 = vand.u32 4294901760, %v4847_v59 }
 0x2b1   :  { %4641 = vmatmul.f32.gmra.mxu3 %v7245_v36  ;;  %4656 = vmatpush.msrb.mxu0 %v11476_v4  ;;  %v4853_v23 = vsub.f32 %v9707_v50, %v11477_v8  ;;  %v4859_v4 = vsub.f32 %v9719_v56, %v11479_v30  ;;  %v4870_v8 = vand.u32 4294901760, %v9746_v28  ;;  %v11481_v30 = vand.u32 4294901760, %v9439_v40 }
 0x2b2   :  { %4731 = vmatpush.msrb.mxu1 %v9448_v12  ;;  %4770 = vmatpush.msrb.mxu2 %v9659_v52  ;;  %v9776_v12 = vand.u32 4294901760, %v540_v9 }
 0x2b3   :  { %4837 = vmatpush.msrb.mxu3 %v4836_v41  ;;  %4660 = vmatpush.msrb.mxu0 %v11478_v62  ;;  %v4854_v54 = vand.u32 4294901760, %v4853_v23  ;;  %v11480_v41 = vand.u32 4294901760, %v9733_v55  ;;  %v4876_v62 = vand.u32 4294901760, %v9759_v26  ;;  %v4871_v23 = vsub.f32 %v9746_v28, %v4870_v8 }
 0x2b4   :  { %4733 = vmatpush.msrb.mxu1 %v9463_v1  ;;  %4772 = vmatpush.msrb.mxu2 %v9674_v27  ;;  %v9789_v1 = vand.u32 4294901760, %v532_v42  ;;  %v9800_v40 = vsub.f32 %v540_v9, %v9776_v12 }
 0x2b5   :  { %4843 = vmatpush.msrb.mxu3 %v4842_v44  ;;  %4432 = vmatmul.f32.gmra.mxu0 %v7258_v16  ;;  %v4865_v59 = vsub.f32 %v9733_v55, %v11480_v41  ;;  %v4860_v44 = vand.u32 4294901760, %v4859_v4  ;;  %v4882_v41 = vand.u32 4294901760, %v9772_v34  ;;  %v4888_v4 = vand.u32 4294901760, %v9784_v22 }
 0x2b6   :  { %4664 = vmatpush.msrb.mxu0 %v11481_v30  ;;  %4735 = vmatpush.msrb.mxu1 %v9480_v29  ;;  %v11483_v30 = vand.u32 4294901760, %v9476_v14  ;;  %v9811_v13 = vsub.f32 %v532_v42, %v9789_v1  ;;  %v4894_v14 = vand.u32 4294901760, %v9800_v40 }
 0x2b7   :  { %4774 = vmatpush.msrb.mxu2 %v9684_v63  ;;  %4849 = vmatpush.msrb.mxu3 %v4848_v32  ;;  %v4866_v29 = vand.u32 4294901760, %v4865_v59  ;;  %v4877_v32 = vsub.f32 %v9759_v26, %v4876_v62  ;;  %v4883_v9 = vsub.f32 %v9772_v34, %v4882_v41  ;;  %v4889_v42 = vsub.f32 %v9784_v22, %v4888_v4 }
 0x2b8   :  { %4668 = vmatpush.msrb.mxu0 %v11482_v5  ;;  %4737 = vmatpush.msrb.mxu1 %v9493_v0  ;;  %v4872_v0 = vand.u32 4294901760, %v4871_v23  ;;  %v11485_v59 = vand.u32 4294901760, %v9502_v35  ;;  %v4895_v23 = vsub.f32 %v9800_v40, %v4894_v14 }
 0x2b9   :  { %4776 = vmatpush.msrb.mxu2 %v9697_v19  ;;  %4855 = vmatpush.msrb.mxu3 %v4854_v54  ;;  %v11484_v54 = vand.u32 4294901760, %v9486_v53  ;;  %v4900_v53 = vand.u32 4294901760, %v9811_v13  ;;  %v4890_v35 = vand.u32 4294901760, %v4889_v42  ;;  %v11502_v42 = vld [vmem:[#allocation19_spill] sm:$0xff] }
 0x2ba   :  { %4672 = vmatpush.msrb.mxu0 %v11483_v30  ;;  %4739 = vmatpush.msrb.mxu1 %v9504_v15  ;;  %v4878_v15 = vand.u32 4294901760, %v4877_v32  ;;  %v4896_v5 = vand.u32 4294901760, %v4895_v23  ;;  %v11495_v30 = vld [vmem:[#allocation25_spill] sm:$0xff] }
 0x2bb   :  { %4778 = vmatpush.msrb.mxu2 %v9709_v38  ;;  %4861 = vmatpush.msrb.mxu3 %v4860_v44  ;;  %v11486_v44 = vand.u32 4294901760, %v9518_v2  ;;  %v4901_v2 = vsub.f32 %v9811_v13, %v4900_v53 }
 0x2bc   :  { %4676 = vmatpush.msrb.mxu0 %v11484_v54  ;;  %4741 = vmatpush.msrb.mxu1 %v9511_v20  ;;  %v4884_v20 = vand.u32 4294901760, %v4883_v9  ;;  %v11497_v9 = vld [vmem:[#allocation27_spill] sm:$0xff] }
 0x2bd   :  { %4780 = vmatpush.msrb.mxu2 %v9721_v39  ;;  %4867 = vmatpush.msrb.mxu3 %v4866_v29  ;;  %v11492_v29 = vld [vmem:[#allocation12_spill] sm:$0xff]  ;;  %v11498_v54 = vand.u32 4294901760, %v11497_v9 }
 0x2be   :  { %4680 = vmatpush.msrb.mxu0 %v11485_v59  ;;  %4743 = vmatpush.msrb.mxu1 %v9531_v58  ;;  %v11487_v58 = vand.u32 4294901760, %v9529_v31  ;;  %v11489_v31 = vand.u32 4294901760, %v9556_v10  ;;  %v11493_v10 = vld [vmem:[#allocation10_spill] sm:$0xff] }
 0x2bf   :  { %4782 = vmatpush.msrb.mxu2 %v9735_v47  ;;  %4873 = vmatpush.msrb.mxu3 %v4872_v0  ;;  %v11494_v32 = vand.u32 4294901760, %v11493_v10  ;;  %v11496_v0 = vand.u32 4294901760, %v11495_v30 }
 0x2c0   :  { %4684 = vmatpush.msrb.mxu0 %v11486_v44  ;;  %4745 = vmatpush.msrb.mxu1 %v9544_v7  ;;  %v11488_v7 = vand.u32 4294901760, %v9540_v25  ;;  %v11490_v25 = vand.u32 4294901760, %v9625_v18  ;;  %v11505_v44 = vld [vmem:[#allocation15_spill] sm:$0xff] }
 0x2c1   :  { %4784 = vmatpush.msrb.mxu2 %v9748_v33  ;;  %4879 = vmatpush.msrb.mxu3 %v4878_v15 }
 0x2c2   :  { %4688 = vmatpush.msrb.mxu0 %v11487_v58  ;;  %4747 = vmatpush.msrb.mxu1 %v9558_v6  ;;  %v4902_v6 = vand.u32 4294901760, %v4901_v2 }
 0x2c3   :  { %4786 = vmatpush.msrb.mxu2 %v9761_v51  ;;  %4885 = vmatpush.msrb.mxu3 %v4884_v20  ;;  %v525_v20 = vld [vmem:[#allocation2 + $0x3f0] sm:$0xff] }
 0x2c4   :  { %4692 = vmatpush.msrb.mxu0 %v11488_v7  ;;  %4749 = vmatpush.msrb.mxu1 %v9570_v45  ;;  %v11491_v45 = vand.u32 4294901760, %v9568_v3  ;;  %v11499_v3 = vld [vmem:[#allocation24_spill] sm:$0xff]  ;;  %v9892_v23 = vand.u32 4294901760, %v525_v20 }
 0x2c5   :  { %4788 = vmatpush.msrb.mxu2 %v9776_v12  ;;  %4891 = vmatpush.msrb.mxu3 %v4890_v35  ;;  %v11500_v15 = vand.u32 4294901760, %v11499_v3  ;;  %v509_v35 = vld [vmem:[#allocation2 + $0x370] sm:$0xff] }
 0x2c6   :  { %4751 = vmatmul.f32.vlgmr.msrb.gmra.mxu1 %v7203_v48  ;;  %4696 = vmatpush.msrb.mxu0 %v11489_v31  ;;  %v9907_v2 = vsub.f32 %v525_v20, %v9892_v23  ;;  %v9909_v7 = vand.u32 4294901760, %v509_v35 }
 0x2c7   :  { %4973 = vmatpush.msra.mxu1 %v9608_v61  ;;  %4790 = vmatpush.msrb.mxu2 %v9789_v1 }
 0x2c8   :  { %4897 = vmatpush.msrb.mxu3 %v4896_v5  ;;  %4796 = vmatmul.f32.vlgmr.msrb.gmra.mxu2 %v11303_v46 }
 0x2c9   :  { %4975 = vmatpush.msra.mxu1 %v9616_v49  ;;  %5020 = vmatpush.msra.mxu2 %v11490_v25  ;;  %v9928_v25 = vsub.f32 %v509_v35, %v9909_v7 }
 0x2ca   :  { %4700 = vmatpush.msrb.mxu0 %v11491_v45  ;;  %4903 = vmatpush.msrb.mxu3 %v4902_v6  ;;  %v11510_v6 = vand.u32 4294901760, %v9733_v55  ;;  %v485_v45 = vld [vmem:[#allocation2 + $0x2b0] sm:$0xff] }
 0x2cb   :  { %4905 = vmatmul.f32.vlgmr.msrb.gmra.mxu3 %v11492_v29  ;;  %4977 = vmatpush.msra.mxu1 %v9630_v43  ;;  %v9950_v30 = vand.u32 4294901760, %v485_v45 }
 0x2cc   :  { %5024 = vmatpush.msra.mxu2 %v11494_v32  ;;  %5091 = vmatpush.msra.mxu3 %v9608_v61  ;;  %v11501_v61 = vand.u32 4294901760, %v9657_v17  ;;  %v3790_v32 = vpop.f32.mrf.mxu1 }
 0x2cd   :  { %4704 = vmatpush.msrb.mxu0 %v11496_v0  ;;  %4979 = vmatpush.msra.mxu1 %v9639_v24  ;;  %v9952_v0 = vpop.f32.mrf.mxu2  ;;  %v9979_v3 = vsub.f32 %v485_v45, %v9950_v30 }
 0x2ce   :  { %5028 = vmatpush.msra.mxu2 %v11498_v54  ;;  %5093 = vmatpush.msra.mxu3 %v9616_v49  ;;  %v11503_v49 = vld [vmem:[#allocation26_spill] sm:$0xff] }
 0x2cf   :  { %4708 = vmatpush.msrb.mxu0 %v11500_v15  ;;  %4755 = vmatmul.f32.gmra.mxu1 %v11251_v11  ;;  %v11504_v59 = vand.u32 4294901760, %v11503_v49 }
 0x2d0   :  { %4710 = vmatmul.f32.vlgmr.msrb.gmra.mxu0 %v7203_v48  ;;  %4981 = vmatpush.msra.mxu1 %v9648_v37 }
 0x2d1   :  { %4915 = vmatpush.msra.mxu0 %v9625_v18  ;;  %5032 = vmatpush.msra.mxu2 %v11501_v61  ;;  %v11506_v18 = vand.u32 4294901760, %v9680_v57  ;;  %v461_v61 = vld [vmem:[#allocation2 + $0x1f0] sm:$0xff] }
 0x2d2   :  { %5095 = vmatpush.msra.mxu3 %v9630_v43  ;;  %4804 = vmatmul.f32.gmra.mxu2 %v11502_v42  ;;  %v517_v43 = vld [vmem:[#allocation2 + $0x3b0] sm:$0xff] }
 0x2d3   :  { %4918 = vmatpush.msra.mxu0 %v11493_v10  ;;  %4983 = vmatpush.msra.mxu1 %v9659_v52  ;;  %v9899_v58 = vand.u32 4294901760, %v517_v43 }
 0x2d4   :  { %5036 = vmatpush.msra.mxu2 %v11504_v59  ;;  %5097 = vmatpush.msra.mxu3 %v9639_v24  ;;  %v11507_v24 = vand.u32 4294901760, %v9695_v60 }
 0x2d5   :  { %4909 = vmatmul.f32.gmra.mxu3 %v11505_v44  ;;  %4921 = vmatpush.msra.mxu0 %v11497_v9  ;;  %v9917_v5 = vsub.f32 %v517_v43, %v9899_v58  ;;  %v9998_v43 = vand.u32 4294901760, %v461_v61 }
 0x2d6   :  { %4985 = vmatpush.msra.mxu1 %v9674_v27  ;;  %5040 = vmatpush.msra.mxu2 %v11506_v18  ;;  %v11512_v18 = vld [vmem:[#allocation14_spill] sm:$0xff] }
 0x2d7   :  { %5099 = vmatpush.msra.mxu3 %v9648_v37  ;;  %4924 = vmatpush.msra.mxu0 %v9657_v17  ;;  %v501_v37 = vld [vmem:[#allocation2 + $0x330] sm:$0xff]  ;;  %v11508_v17 = vand.u32 4294901760, %v9707_v50 }
 0x2d8   :  { %4987 = vmatpush.msra.mxu1 %v9684_v63  ;;  %5044 = vmatpush.msra.mxu2 %v11507_v24  ;;  %v9919_v31 = vand.u32 4294901760, %v501_v37 }
 0x2d9   :  { %5101 = vmatpush.msra.mxu3 %v9659_v52  ;;  %4714 = vmatmul.f32.gmra.mxu0 %v11251_v11  ;;  %v11509_v52 = vand.u32 4294901760, %v9719_v56 }
 0x2da   :  { %4927 = vmatpush.msra.mxu0 %v11503_v49  ;;  %4989 = vmatpush.msra.mxu1 %v9697_v19  ;;  %v9939_v10 = vsub.f32 %v501_v37, %v9919_v31  ;;  %v445_v37 = vld [vmem:[#allocation2 + $0x170] sm:$0xff] }
 0x2db   :  { %5048 = vmatpush.msra.mxu2 %v11508_v17  ;;  %5103 = vmatpush.msra.mxu3 %v9674_v27  ;;  %v493_v27 = vld [vmem:[#allocation2 + $0x2f0] sm:$0xff]  ;;  %v3794_v17 = vpop.f32.mrf.mxu1 }
 0x2dc   :  { %4930 = vmatpush.msra.mxu0 %v9680_v57  ;;  %4991 = vmatpush.msra.mxu1 %v9709_v38  ;;  %v11161_v57 = vand.u32 4294901760, %v9907_v2  ;;  %v11157_v9 = vand.u32 4294901760, %v9939_v10 }
 0x2dd   :  { %5052 = vmatpush.msra.mxu2 %v11509_v52  ;;  %5105 = vmatpush.msra.mxu3 %v9684_v63  ;;  %v9932_v63 = vand.u32 4294901760, %v493_v27 }
 0x2de   :  { %4933 = vmatpush.msra.mxu0 %v9695_v60  ;;  %4993 = vmatpush.msra.mxu1 %v9721_v39  ;;  %v3681_v60 = vpop.f32.mrf.mxu0  ;;  %v5201_v59 = vsub.f32 %v9939_v10, %v11157_v9 }
 0x2df   :  { %5056 = vmatpush.msra.mxu2 %v11510_v6  ;;  %5107 = vmatpush.msra.mxu3 %v9697_v19  ;;  %v11160_v19 = vand.u32 4294901760, %v9917_v5 }
 0x2e0   :  { %4936 = vmatpush.msra.mxu0 %v9707_v50  ;;  %4995 = vmatpush.msra.mxu1 %v9735_v47  ;;  %v477_v50 = vld [vmem:[#allocation2 + $0x270] sm:$0xff]  ;;  %v5202_v6 = vand.u32 4294901760, %v5201_v59 }
 0x2e1   :  { %5060 = vmatpush.msra.mxu2 %v4870_v8  ;;  %5109 = vmatpush.msra.mxu3 %v9709_v38  ;;  %v5183_v38 = vsub.f32 %v9907_v2, %v11161_v57  ;;  %v11159_v8 = vand.u32 4294901760, %v9928_v25  ;;  %v9966_v54 = vand.u32 4294901760, %v477_v50 }
 0x2e2   :  { %4939 = vmatpush.msra.mxu0 %v9719_v56  ;;  %4997 = vmatpush.msra.mxu1 %v9748_v33  ;;  %v9957_v56 = vsub.f32 %v493_v27, %v9932_v63  ;;  %v437_v27 = vld [vmem:[#allocation2 + $0x130] sm:$0xff] }
 0x2e3   :  { %5064 = vmatpush.msra.mxu2 %v4876_v62  ;;  %5111 = vmatpush.msra.mxu3 %v9721_v39  ;;  %v469_v62 = vld [vmem:[#allocation2 + $0x230] sm:$0xff]  ;;  %v5189_v39 = vsub.f32 %v9917_v5, %v11160_v19  ;;  %v9994_v20 = vsub.f32 %v477_v50, %v9966_v54  ;;  %v10022_v50 = vand.u32 4294901760, %v445_v37 }
 0x2e4   :  { %4942 = vmatpush.msra.mxu0 %v9733_v55  ;;  %4999 = vmatpush.msra.mxu1 %v9761_v51  ;;  %v9968_v55 = vpop.f32.mrf.mxu3  ;;  %v9981_v15 = vand.u32 4294901760, %v469_v62 }
 0x2e5   :  { %5068 = vmatpush.msra.mxu2 %v4882_v41  ;;  %5113 = vmatpush.msra.mxu3 %v9735_v47  ;;  %v5184_v47 = vand.u32 4294901760, %v5183_v38  ;;  %v5195_v41 = vsub.f32 %v9928_v25, %v11159_v8  ;;  %v11154_v45 = vand.u32 4294901760, %v9994_v20  ;;  %v10047_v59 = vsub.f32 %v445_v37, %v10022_v50  ;;  %v4008_v37 = vpop.f32.mrf.mxu1 }
 0x2e6   :  { %4945 = vmatpush.msra.mxu0 %v9746_v28  ;;  %5001 = vmatpush.msra.mxu1 %v9776_v12  ;;  %v11156_v28 = vand.u32 4294901760, %v9957_v56  ;;  %v3689_v24 = vpop.f32.mrf.mxu0  ;;  %v10004_v35 = vsub.f32 %v469_v62, %v9981_v15  ;;  %v10029_v62 = vand.u32 4294901760, %v437_v27 }
 0x2e7   :  { %5072 = vmatpush.msra.mxu2 %v4888_v4  ;;  %5115 = vmatpush.msra.mxu3 %v9748_v33  ;;  %v11511_v4 = vld [vmem:[#allocation20_spill] sm:$0xff]  ;;  %v5190_v33 = vand.u32 4294901760, %v5189_v39  ;;  %v429_v39 = vld [vmem:[#allocation2 + $0xf0] sm:$0xff] }
 0x2e8   :  { %4948 = vmatpush.msra.mxu0 %v9759_v26  ;;  %5003 = vmatpush.msra.mxu1 %v9789_v1  ;;  %v3682_v49 = vadd.f32 %v3681_v60, %v11511_v4  ;;  %v453_v26 = vld [vmem:[#allocation2 + $0x1b0] sm:$0xff]  ;;  %v10015_v60 = vpop.f32.mrf.mxu2  ;;  %v11158_v38 = vand.u32 4294901760, %v10004_v35 }
 0x2e9   :  { %5076 = vmatpush.msra.mxu2 %v4894_v14  ;;  %5117 = vmatpush.msra.mxu3 %v9761_v51  ;;  %v5196_v51 = vand.u32 4294901760, %v5195_v41  ;;  %v11155_v14 = vand.u32 4294901760, %v9979_v3  ;;  %v10011_v52 = vand.u32 4294901760, %v453_v26 }
 0x2ea   :  { %5007 = vmatmul.f32.vlgmr.msra.gmra.mxu1 %v11512_v18  ;;  %4951 = vmatpush.msra.mxu0 %v9772_v34  ;;  %v5207_v34 = vsub.f32 %v9957_v56, %v11156_v28  ;;  %v11515_v28 = vld [vmem:[#allocation13_spill] sm:$0xff]  ;;  %v629_v18 = vld [vmem:[#allocation2 + $0x730] sm:$0xff] }
 0x2eb   :  { %5185 = vmatpush.msrb.mxu1 %v5184_v47  ;;  %5080 = vmatpush.msra.mxu2 %v4900_v53  ;;  %v3791_v53 = vadd.f32 %v3790_v32, %v3682_v49  ;;  %v5213_v32 = vsub.f32 %v9979_v3, %v11155_v14  ;;  %v10036_v47 = vsub.f32 %v453_v26, %v10011_v52  ;;  %v421_v49 = vld [vmem:[#allocation2 + $0xb0] sm:$0xff]  ;;  %v10049_v26 = vand.u32 4294901760, %v429_v39 }
 0x2ec   :  { %5119 = vmatpush.msra.mxu3 %v9776_v12  ;;  %5082 = vmatmul.f32.vlgmr.msra.gmra.mxu2 %v11492_v29  ;;  %v10020_v12 = vsub.f32 %v461_v61, %v9998_v43  ;;  %v5219_v61 = vsub.f32 %v9994_v20, %v11154_v45  ;;  %v10058_v45 = vsub.f32 %v437_v27, %v10029_v62  ;;  %v413_v14 = vld [vmem:[#allocation2 + $0x70] sm:$0xff]  ;;  %v10062_v9 = vand.u32 4294901760, %v421_v49 }
 0x2ed   :  { %5191 = vmatpush.msrb.mxu1 %v5190_v33  ;;  %5287 = vmatpush.msrb.mxu2 %v9907_v2  ;;  %v3849_v41 = vadd.f32 %v9952_v0, %v3791_v53  ;;  %v11513_v0 = vld [vmem:[#allocation22_spill] sm:$0xff]  ;;  %v5214_v53 = vand.u32 4294901760, %v5213_v32  ;;  %v10074_v19 = vsub.f32 %v429_v39, %v10049_v26  ;;  %v11516_v8 = vand.u32 4294901760, %v10036_v47 }
 0x2ee   :  { %4954 = vmatpush.msra.mxu0 %v9784_v22  ;;  %5121 = vmatpush.msra.mxu3 %v9789_v1  ;;  %v10031_v22 = vpop.f32.mrf.mxu3  ;;  %v5208_v1 = vand.u32 4294901760, %v5207_v34  ;;  %v11162_v33 = vand.u32 4294901760, %v10020_v12  ;;  %v3967_v34 = vpop.f32.mrf.mxu0  ;;  %v5220_v32 = vand.u32 4294901760, %v5219_v61  ;;  %v11163_v57 = vand.u32 4294901760, %v10058_v45 }
 0x2ef   :  { %5123 = vmatmul.f32.vlgmr.msra.gmra.mxu3 %v11492_v29  ;;  %5197 = vmatpush.msrb.mxu1 %v5196_v51  ;;  %v3690_v51 = vadd.f32 %v3689_v24, %v11513_v0  ;;  %v5237_v39 = vsub.f32 %v10036_v47, %v11516_v8  ;;  %v573_v29 = vld [vmem:[#allocation2 + $0x570] sm:$0xff] }
 0x2f0   :  { %5290 = vmatpush.msrb.mxu2 %v9917_v5  ;;  %5345 = vmatpush.msrb.mxu3 %v9892_v23  ;;  %v4053_v27 = vpop.f32.mrf.mxu2 }
 0x2f1   :  { %4957 = vmatpush.msra.mxu0 %v9800_v40  ;;  %5203 = vmatpush.msrb.mxu1 %v5202_v6  ;;  %v11514_v40 = vld [vmem:[#allocation18_spill] sm:$0xff]  ;;  %v5225_v6 = vsub.f32 %v10004_v35, %v11158_v38 }
 0x2f2   :  { %5293 = vmatpush.msrb.mxu2 %v9928_v25  ;;  %5347 = vmatpush.msrb.mxu3 %v9899_v58  ;;  %v405_v38 = vld [vmem:[#allocation2 + $0x30] sm:$0xff] }
 0x2f3   :  { %4960 = vmatpush.msra.mxu0 %v9811_v13  ;;  %5013 = vmatmul.f32.gmra.mxu1 %v11514_v40  ;;  %v3893_v13 = vadd.f32 %v9968_v55, %v3849_v41  ;;  %v10076_v55 = vand.u32 4294901760, %v413_v14  ;;  %v3795_v41 = vadd.f32 %v3794_v17, %v3690_v51  ;;  %v5226_v61 = vand.u32 4294901760, %v5225_v6  ;;  %v653_v6 = vld [vmem:[#allocation2 + $0x7f0] sm:$0xff]  ;;  %v4012_v40 = vpop.f32.mrf.mxu1 }
 0x2f4   :  { %4963 = vmatmul.f32.vlgmr.msra.gmra.mxu0 %v11515_v28  ;;  %5209 = vmatpush.msrb.mxu1 %v5208_v1  ;;  %v5231_v1 = vsub.f32 %v10020_v12, %v11162_v33  ;;  %v10086_v28 = vsub.f32 %v421_v49, %v10062_v9  ;;  %v10088_v17 = vand.u32 4294901760, %v405_v38 }
 0x2f5   :  { %5132 = vmatpush.msrb.mxu0 %v9892_v23  ;;  %5296 = vmatpush.msrb.mxu2 %v9939_v10  ;;  %v3968_v24 = vadd.f32 %v3967_v34, %v3893_v13  ;;  %v11517_v34 = vand.u32 4294901760, %v10047_v59  ;;  %v10098_v8 = vsub.f32 %v413_v14, %v10076_v55  ;;  %v3854_v49 = vadd.f32 %v10015_v60, %v3795_v41  ;;  %v11520_v60 = vld [vmem:[#allocation16_spill] sm:$0xff] }
 0x2f6   :  { %5349 = vmatpush.msrb.mxu3 %v9909_v7  ;;  %5086 = vmatmul.f32.gmra.mxu2 %v11505_v44  ;;  %v4162_v33 = vpop.f32.mrf.mxu3  ;;  %v5232_v51 = vand.u32 4294901760, %v5231_v1  ;;  %v5249_v13 = vsub.f32 %v10058_v45, %v11163_v57  ;;  %v5238_v1 = vand.u32 4294901760, %v5237_v39  ;;  %v10109_v14 = vsub.f32 %v405_v38, %v10088_v17  ;;  %v3971_v41 = vpop.f32.mrf.mxu0 }
 0x2f7   :  { %5134 = vmatpush.msrb.mxu0 %v9899_v58  ;;  %5215 = vmatpush.msrb.mxu1 %v5214_v53  ;;  %v5243_v53 = vsub.f32 %v10047_v59, %v11517_v34  ;;  %11518 = vst [vmem:[#allocation21_spill] sm:$0xff] %v10098_v8  ;;  %v3899_v38 = vadd.f32 %v10031_v22, %v3854_v49  ;;  %v645_v34 = vld [vmem:[#allocation2 + $0x7b0] sm:$0xff]  ;;  %v10126_v39 = vand.u32 4294901760, %v653_v6 }
 0x2f8   :  { %5299 = vmatpush.msrb.mxu2 %v9957_v56  ;;  %5351 = vmatpush.msrb.mxu3 %v9919_v31  ;;  %11519 = vst [vmem:[#allocation23_spill] sm:$0xff] %v10109_v14  ;;  %v5250_v57 = vand.u32 4294901760, %v5249_v13  ;;  %v4061_v0 = vpop.f32.mrf.mxu2  ;;  %v11523_v13 = vand.u32 4294901760, %v10098_v8 }
 0x2f9   :  { %5127 = vmatmul.f32.gmra.mxu3 %v11505_v44  ;;  %5136 = vmatpush.msrb.mxu0 %v9909_v7  ;;  %v3972_v22 = vadd.f32 %v3971_v41, %v3899_v38  ;;  %v637_v41 = vld [vmem:[#allocation2 + $0x770] sm:$0xff] }
 0x2fa   :  { %5221 = vmatpush.msrb.mxu1 %v5220_v32  ;;  %5302 = vmatpush.msrb.mxu2 %v9979_v3  ;;  %v4009_v32 = vadd.f32 %v4008_v37, %v3968_v24  ;;  %v5244_v37 = vand.u32 4294901760, %v5243_v53  ;;  %v11521_v24 = vand.u32 4294901760, %v10074_v19 }
 0x2fb   :  { %5353 = vmatpush.msrb.mxu3 %v9932_v63  ;;  %5138 = vmatpush.msrb.mxu0 %v9919_v31 }
 0x2fc   :  { %5227 = vmatpush.msrb.mxu1 %v5226_v61  ;;  %5305 = vmatpush.msrb.mxu2 %v9994_v20  ;;  %v5255_v61 = vsub.f32 %v10074_v19, %v11521_v24  ;;  %v11164_v24 = vand.u32 4294901760, %v10109_v14 }
 0x2fd   :  { %5355 = vmatpush.msrb.mxu3 %v9950_v30  ;;  %4968 = vmatmul.f32.gmra.mxu0 %v11520_v60  ;;  %v4054_v60 = vadd.f32 %v4053_v27, %v4009_v32  ;;  %v5267_v32 = vsub.f32 %v10098_v8, %v11523_v13  ;;  %v4013_v13 = vadd.f32 %v4012_v40, %v3972_v22  ;;  %v621_v40 = vld [vmem:[#allocation2 + $0x6f0] sm:$0xff] }
 0x2fe   :  { %5140 = vmatpush.msrb.mxu0 %v9932_v63  ;;  %5233 = vmatpush.msrb.mxu1 %v5232_v51  ;;  %v11522_v51 = vand.u32 4294901760, %v10086_v28  ;;  %v4166_v49 = vpop.f32.mrf.mxu3  ;;  %v5256_v27 = vand.u32 4294901760, %v5255_v61  ;;  %v10143_v61 = vsub.f32 %v653_v6, %v10126_v39 }
 0x2ff   :  { %5308 = vmatpush.msrb.mxu2 %v10004_v35  ;;  %5357 = vmatpush.msrb.mxu3 %v9966_v54  ;;  %v4163_v38 = vadd.f32 %v4162_v33, %v4054_v60  ;;  %v5268_v33 = vand.u32 4294901760, %v5267_v32  ;;  %v10148_v60 = vand.u32 4294901760, %v637_v41  ;;  %v4062_v42 = vadd.f32 %v4061_v0, %v4013_v13 }
 0x300   :  { %5142 = vmatpush.msrb.mxu0 %v9950_v30  ;;  %5239 = vmatpush.msrb.mxu1 %v5238_v1  ;;  %v5261_v53 = vsub.f32 %v10086_v28, %v11522_v51  ;;  %v10134_v1 = vand.u32 4294901760, %v645_v34  ;;  %v11526_v0 = vand.u32 4294901760, %v10143_v61 }
 0x301   :  { %5311 = vmatpush.msrb.mxu2 %v10020_v12  ;;  %5359 = vmatpush.msrb.mxu3 %v9981_v15 }
 0x302   :  { %5144 = vmatpush.msrb.mxu0 %v9966_v54  ;;  %5245 = vmatpush.msrb.mxu1 %v5244_v37  ;;  %v5262_v51 = vand.u32 4294901760, %v5261_v53  ;;  %v5273_v37 = vsub.f32 %v10109_v14, %v11164_v24  ;;  %v10151_v53 = vsub.f32 %v645_v34, %v10134_v1 }
 0x303   :  { %5314 = vmatpush.msrb.mxu2 %v10036_v47  ;;  %5361 = vmatpush.msrb.mxu3 %v9998_v43  ;;  %v4339_v44 = vpop.f32.mrf.mxu2 }
 0x304   :  { %5146 = vmatpush.msrb.mxu0 %v9981_v15  ;;  %5251 = vmatpush.msrb.mxu1 %v5250_v57  ;;  %v4264_v57 = vpop.f32.mrf.mxu1  ;;  %11524 = vst [vmem:[#allocation17_spill] sm:$0xff] %v10151_v53  ;;  %v5274_v6 = vand.u32 4294901760, %v5273_v37  ;;  %v11166_v34 = vand.u32 4294901760, %v10151_v53  ;;  %v10166_v37 = vand.u32 4294901760, %v621_v40 }
 0x305   :  { %5317 = vmatpush.msrb.mxu2 %v10047_v59  ;;  %5363 = vmatpush.msrb.mxu3 %v10011_v52  ;;  %v4220_v4 = vpop.f32.mrf.mxu0 }
 0x306   :  { %5148 = vmatpush.msrb.mxu0 %v9998_v43  ;;  %5257 = vmatpush.msrb.mxu1 %v5256_v27  ;;  %v4221_v24 = vadd.f32 %v4220_v4, %v4163_v38  ;;  %v10157_v27 = vand.u32 4294901760, %v629_v18  ;;  %v613_v4 = vld [vmem:[#allocation2 + $0x6b0] sm:$0xff]  ;;  %v10164_v38 = vsub.f32 %v637_v41, %v10148_v60  ;;  %v4380_v22 = vpop.f32.mrf.mxu3 }
 0x307   :  { %5320 = vmatpush.msrb.mxu2 %v10058_v45  ;;  %5365 = vmatpush.msrb.mxu3 %v10022_v50 }
 0x308   :  { %5150 = vmatpush.msrb.mxu0 %v10011_v52  ;;  %5263 = vmatpush.msrb.mxu1 %v5262_v51  ;;  %v4265_v32 = vadd.f32 %v4264_v57, %v4221_v24  ;;  %11525 = vst [vmem:[#allocation10_spill] sm:$0xff] %v10164_v38  ;;  %v5555_v24 = vsub.f32 %v10143_v61, %v11526_v0  ;;  %v11528_v0 = vld [vmem:[#allocation8_spill] sm:$0xff] }
 0x309   :  { %5323 = vmatpush.msrb.mxu2 %v10074_v19  ;;  %5367 = vmatpush.msrb.mxu3 %v10029_v62  ;;  %v10175_v13 = vsub.f32 %v629_v18, %v10157_v27  ;;  %v4167_v57 = vadd.f32 %v4166_v49, %v4062_v42  ;;  %v589_v18 = vld [vmem:[#allocation2 + $0x5f0] sm:$0xff] }
 0x30a   :  { %5152 = vmatpush.msrb.mxu0 %v10022_v50  ;;  %5269 = vmatpush.msrb.mxu1 %v5268_v33  ;;  %v4340_v51 = vadd.f32 %v4339_v44, %v4265_v32  ;;  %v10177_v33 = vand.u32 4294901760, %v613_v4  ;;  %v605_v44 = vld [vmem:[#allocation2 + $0x670] sm:$0xff] }
 0x30b   :  { %5326 = vmatpush.msrb.mxu2 %v10086_v28  ;;  %5369 = vmatpush.msrb.mxu3 %v10049_v26  ;;  %v597_v32 = vld [vmem:[#allocation2 + $0x630] sm:$0xff]  ;;  %v10192_v49 = vand.u32 4294901760, %v605_v44 }
 0x30c   :  { %5154 = vmatpush.msrb.mxu0 %v10029_v62  ;;  %5275 = vmatpush.msrb.mxu1 %v5274_v6  ;;  %v4381_v41 = vadd.f32 %v4380_v22, %v4340_v51  ;;  %v5561_v6 = vsub.f32 %v10151_v53, %v11166_v34  ;;  %v10188_v22 = vsub.f32 %v621_v40, %v10166_v37  ;;  %v5556_v34 = vand.u32 4294901760, %v5555_v24  ;;  %v11530_v53 = vld [vmem:[#allocation9_spill] sm:$0xff] }
 0x30d   :  { %5329 = vmatpush.msrb.mxu2 %v10098_v8  ;;  %5371 = vmatpush.msrb.mxu3 %v10062_v9  ;;  %v4270_v8 = vpop.f32.mrf.mxu1  ;;  %v10198_v40 = vsub.f32 %v613_v4, %v10177_v33  ;;  %v11529_v24 = vand.u32 4294901760, %v10164_v38  ;;  %v565_v4 = vld [vmem:[#allocation2 + $0x530] sm:$0xff] }
 0x30e   :  { %5277 = vmatmul.f32.vlgmr.msrb.gmra.mxu1 %v7203_v48  ;;  %5156 = vmatpush.msrb.mxu0 %v10049_v26  ;;  %6623 = vst [vmem:[#allocation5 + $0x20] sm:$0xff] %v4381_v41  ;;  %v4225_v42 = vpop.f32.mrf.mxu0  ;;  %v4343_v41 = vpop.f32.mrf.mxu2 }
 0x30f   :  { %11527 = vst [vmem:[#allocation25_spill] sm:$0xff] %v10188_v22  ;;  %5463 = vmatpush.msra.mxu1 %v9892_v23  ;;  %5332 = vmatpush.msrb.mxu2 %v10109_v14  ;;  %v4226_v51 = vadd.f32 %v4225_v42, %v4167_v57  ;;  %v10202_v23 = vand.u32 4294901760, %v597_v32  ;;  %v5562_v57 = vand.u32 4294901760, %v5561_v6  ;;  %v5567_v42 = vsub.f32 %v10164_v38, %v11529_v24 }
 0x310   :  { %5373 = vmatpush.msrb.mxu3 %v10076_v55  ;;  %5335 = vmatmul.f32.vlgmr.msrb.gmra.mxu2 %v11528_v0  ;;  %v581_v0 = vld [vmem:[#allocation2 + $0x5b0] sm:$0xff]  ;;  %v11531_v6 = vand.u32 4294901760, %v10175_v13  ;;  %v4384_v38 = vpop.f32.mrf.mxu3 }
 0x311   :  { %5465 = vmatpush.msra.mxu1 %v9899_v58  ;;  %5504 = vmatpush.msra.mxu2 %v10126_v39  ;;  %v4271_v14 = vadd.f32 %v4270_v8, %v4226_v51  ;;  %v10213_v58 = vsub.f32 %v605_v44, %v10192_v49  ;;  %v10215_v51 = vand.u32 4294901760, %v589_v18  ;;  %v10227_v44 = vand.u32 4294901760, %v581_v0 }
 0x312   :  { %5158 = vmatpush.msrb.mxu0 %v10062_v9  ;;  %5375 = vmatpush.msrb.mxu3 %v10088_v17  ;;  %v5573_v24 = vsub.f32 %v10175_v13, %v11531_v6 }
 0x313   :  { %5379 = vmatmul.f32.vlgmr.msrb.gmra.mxu3 %v11530_v53  ;;  %5467 = vmatpush.msra.mxu1 %v9909_v7  ;;  %v4344_v8 = vadd.f32 %v4343_v41, %v4271_v14  ;;  %v10225_v7 = vsub.f32 %v597_v32, %v10202_v23  ;;  %v11532_v41 = vand.u32 4294901760, %v10188_v22  ;;  %v10239_v32 = vand.u32 4294901760, %v573_v29  ;;  %v557_v53 = vld [vmem:[#allocation2 + $0x4f0] sm:$0xff] }
 0x314   :  { %5506 = vmatpush.msra.mxu2 %v10134_v1  ;;  %5557 = vmatpush.msra.mxu3 %v5556_v34  ;;  %v5568_v34 = vand.u32 4294901760, %v5567_v42  ;;  %v11534_v42 = vand.u32 4294901760, %v10198_v40 }
 0x315   :  { %5160 = vmatpush.msrb.mxu0 %v10076_v55  ;;  %5469 = vmatpush.msra.mxu1 %v9919_v31  ;;  %v4385_v14 = vadd.f32 %v4384_v38, %v4344_v8  ;;  %v5579_v6 = vsub.f32 %v10188_v22, %v11532_v41  ;;  %v10237_v38 = vsub.f32 %v589_v18, %v10215_v51  ;;  %v11533_v8 = vld [vmem:[#allocation11_spill] sm:$0xff]  ;;  %v11535_v22 = vand.u32 4294901760, %v9907_v2  ;;  %v541_v18 = vld [vmem:[#allocation2 + $0x470] sm:$0xff] }
 0x316   :  { %5508 = vmatpush.msra.mxu2 %v10148_v60  ;;  %5563 = vmatpush.msra.mxu3 %v5562_v57  ;;  %v5574_v57 = vand.u32 4294901760, %v5573_v24  ;;  %v5585_v41 = vsub.f32 %v10198_v40, %v11534_v42  ;;  %v10253_v31 = vand.u32 4294901760, %v565_v4  ;;  %v549_v24 = vld [vmem:[#allocation2 + $0x4b0] sm:$0xff]  ;;  %v11536_v42 = vand.u32 4294901760, %v9917_v5 }
 0x317   :  { %5162 = vmatpush.msrb.mxu0 %v10088_v17  ;;  %5281 = vmatmul.f32.gmra.mxu1 %v11251_v11  ;;  %6631 = vst [vmem:[#allocation5 + $0x60] sm:$0xff] %v4385_v14  ;;  %v10251_v14 = vsub.f32 %v581_v0, %v10227_v44  ;;  %v11537_v2 = vand.u32 4294901760, %v10213_v58  ;;  %v10264_v0 = vsub.f32 %v573_v29, %v10239_v32  ;;  %v11538_v5 = vand.u32 4294901760, %v9928_v25 }
 0x318   :  { %5168 = vmatmul.f32.vlgmr.msrb.gmra.mxu0 %v11533_v8  ;;  %5471 = vmatpush.msra.mxu1 %v9932_v63  ;;  %v5580_v63 = vand.u32 4294901760, %v5579_v6  ;;  %v10266_v8 = vand.u32 4294901760, %v557_v53  ;;  %v10277_v29 = vsub.f32 %v565_v4, %v10253_v31  ;;  %v11540_v25 = vand.u32 4294901760, %v9939_v10 }
 0x319   :  { %5392 = vmatpush.msra.mxu0 %v11535_v22  ;;  %5510 = vmatpush.msra.mxu2 %v10157_v27  ;;  %v5591_v22 = vsub.f32 %v10213_v58, %v11537_v2  ;;  %v10279_v2 = vand.u32 4294901760, %v549_v24 }
 0x31a   :  { %5569 = vmatpush.msra.mxu3 %v5568_v34  ;;  %5340 = vmatmul.f32.gmra.mxu2 %v7235_v21  ;;  %v5586_v34 = vand.u32 4294901760, %v5585_v41  ;;  %v11541_v41 = vand.u32 4294901760, %v10237_v38  ;;  %v10290_v4 = vsub.f32 %v557_v53, %v10266_v8 }
 0x31b   :  { %5396 = vmatpush.msra.mxu0 %v11536_v42  ;;  %5473 = vmatpush.msra.mxu1 %v9950_v30  ;;  %v11539_v30 = vand.u32 4294901760, %v10225_v7  ;;  %v533_v42 = vld [vmem:[#allocation2 + $0x430] sm:$0xff]  ;;  %v10302_v53 = vsub.f32 %v549_v24, %v10279_v2  ;;  %v11544_v24 = vand.u32 4294901760, %v9979_v3 }
 0x31c   :  { %5512 = vmatpush.msra.mxu2 %v10166_v37  ;;  %5575 = vmatpush.msra.mxu3 %v5574_v57  ;;  %v5592_v57 = vand.u32 4294901760, %v5591_v22 }
 0x31d   :  { %5385 = vmatmul.f32.gmra.mxu3 %v7245_v36  ;;  %5400 = vmatpush.msra.mxu0 %v11538_v5  ;;  %v5597_v6 = vsub.f32 %v10225_v7, %v11539_v30  ;;  %v5603_v5 = vsub.f32 %v10237_v38, %v11541_v41  ;;  %v5614_v30 = vand.u32 4294901760, %v10264_v0  ;;  %v11543_v41 = vand.u32 4294901760, %v9957_v56 }
 0x31e   :  { %5475 = vmatpush.msra.mxu1 %v9966_v54  ;;  %5514 = vmatpush.msra.mxu2 %v10177_v33  ;;  %v10294_v54 = vand.u32 4294901760, %v541_v18 }
 0x31f   :  { %5581 = vmatpush.msra.mxu3 %v5580_v63  ;;  %5404 = vmatpush.msra.mxu0 %v11540_v25  ;;  %v5598_v10 = vand.u32 4294901760, %v5597_v6  ;;  %v11542_v63 = vand.u32 4294901760, %v10251_v14  ;;  %v5620_v25 = vand.u32 4294901760, %v10277_v29  ;;  %v5615_v6 = vsub.f32 %v10264_v0, %v5614_v30 }
 0x320   :  { %5477 = vmatpush.msra.mxu1 %v9981_v15  ;;  %5516 = vmatpush.msra.mxu2 %v10192_v49  ;;  %v10307_v15 = vand.u32 4294901760, %v533_v42  ;;  %v10318_v56 = vsub.f32 %v541_v18, %v10294_v54 }
 0x321   :  { %5587 = vmatpush.msra.mxu3 %v5586_v34  ;;  %5176 = vmatmul.f32.gmra.mxu0 %v7258_v16  ;;  %v5609_v22 = vsub.f32 %v10251_v14, %v11542_v63  ;;  %v5604_v34 = vand.u32 4294901760, %v5603_v5  ;;  %v5626_v63 = vand.u32 4294901760, %v10290_v4  ;;  %v5632_v5 = vand.u32 4294901760, %v10302_v53 }
 0x322   :  { %5408 = vmatpush.msra.mxu0 %v11543_v41  ;;  %5479 = vmatpush.msra.mxu1 %v9998_v43  ;;  %v11545_v41 = vand.u32 4294901760, %v9994_v20  ;;  %v10329_v3 = vsub.f32 %v533_v42, %v10307_v15  ;;  %v5638_v20 = vand.u32 4294901760, %v10318_v56 }
 0x323   :  { %5518 = vmatpush.msra.mxu2 %v10202_v23  ;;  %5593 = vmatpush.msra.mxu3 %v5592_v57  ;;  %v5610_v43 = vand.u32 4294901760, %v5609_v22  ;;  %v5621_v57 = vsub.f32 %v10277_v29, %v5620_v25  ;;  %v5627_v18 = vsub.f32 %v10290_v4, %v5626_v63  ;;  %v5633_v42 = vsub.f32 %v10302_v53, %v5632_v5 }
 0x324   :  { %5412 = vmatpush.msra.mxu0 %v11544_v24  ;;  %5481 = vmatpush.msra.mxu1 %v10011_v52  ;;  %v5616_v52 = vand.u32 4294901760, %v5615_v6  ;;  %v11547_v22 = vand.u32 4294901760, %v10020_v12  ;;  %v5639_v6 = vsub.f32 %v10318_v56, %v5638_v20 }
 0x325   :  { %5520 = vmatpush.msra.mxu2 %v10215_v51  ;;  %5599 = vmatpush.msra.mxu3 %v5598_v10  ;;  %v11546_v10 = vand.u32 4294901760, %v10004_v35  ;;  %v5644_v35 = vand.u32 4294901760, %v10329_v3  ;;  %v5634_v12 = vand.u32 4294901760, %v5633_v42  ;;  %v11564_v42 = vld [vmem:[#allocation19_spill] sm:$0xff] }
 0x326   :  { %5416 = vmatpush.msra.mxu0 %v11545_v41  ;;  %5483 = vmatpush.msra.mxu1 %v10022_v50  ;;  %v5622_v50 = vand.u32 4294901760, %v5621_v57  ;;  %v5640_v24 = vand.u32 4294901760, %v5639_v6  ;;  %v11557_v41 = vld [vmem:[#allocation21_spill] sm:$0xff] }
 0x327   :  { %5522 = vmatpush.msra.mxu2 %v10227_v44  ;;  %5605 = vmatpush.msra.mxu3 %v5604_v34  ;;  %v11548_v34 = vand.u32 4294901760, %v10036_v47  ;;  %v5645_v47 = vsub.f32 %v10329_v3, %v5644_v35 }
 0x328   :  { %5420 = vmatpush.msra.mxu0 %v11546_v10  ;;  %5485 = vmatpush.msra.mxu1 %v10029_v62  ;;  %v5628_v62 = vand.u32 4294901760, %v5627_v18  ;;  %v11559_v18 = vld [vmem:[#allocation10_spill] sm:$0xff] }
 0x329   :  { %5524 = vmatpush.msra.mxu2 %v10239_v32  ;;  %5611 = vmatpush.msra.mxu3 %v5610_v43  ;;  %v11554_v43 = vld [vmem:[#allocation12_spill] sm:$0xff]  ;;  %v11560_v10 = vand.u32 4294901760, %v11559_v18 }
 0x32a   :  { %5424 = vmatpush.msra.mxu0 %v11547_v22  ;;  %5487 = vmatpush.msra.mxu1 %v10049_v26  ;;  %v11549_v26 = vand.u32 4294901760, %v10047_v59  ;;  %v11551_v59 = vand.u32 4294901760, %v10074_v19  ;;  %v11555_v19 = vld [vmem:[#allocation17_spill] sm:$0xff] }
 0x32b   :  { %5526 = vmatpush.msra.mxu2 %v10253_v31  ;;  %5617 = vmatpush.msra.mxu3 %v5616_v52  ;;  %v11556_v57 = vand.u32 4294901760, %v11555_v19  ;;  %v11558_v52 = vand.u32 4294901760, %v11557_v41 }
 0x32c   :  { %5428 = vmatpush.msra.mxu0 %v11548_v34  ;;  %5489 = vmatpush.msra.mxu1 %v10062_v9  ;;  %v11550_v9 = vand.u32 4294901760, %v10058_v45  ;;  %v11552_v45 = vand.u32 4294901760, %v10143_v61  ;;  %v11567_v34 = vld [vmem:[#allocation15_spill] sm:$0xff] }
 0x32d   :  { %5528 = vmatpush.msra.mxu2 %v10266_v8  ;;  %5623 = vmatpush.msra.mxu3 %v5622_v50 }
 0x32e   :  { %5432 = vmatpush.msra.mxu0 %v11549_v26  ;;  %5491 = vmatpush.msra.mxu1 %v10076_v55  ;;  %v5646_v55 = vand.u32 4294901760, %v5645_v47 }
 0x32f   :  { %5530 = vmatpush.msra.mxu2 %v10279_v2  ;;  %5629 = vmatpush.msra.mxu3 %v5628_v62  ;;  %v526_v62 = vld [vmem:[#allocation2 + $0x3f8] sm:$0xff] }
 0x330   :  { %5436 = vmatpush.msra.mxu0 %v11550_v9  ;;  %5493 = vmatpush.msra.mxu1 %v10088_v17  ;;  %v11553_v17 = vand.u32 4294901760, %v10086_v28  ;;  %v11561_v28 = vld [vmem:[#allocation23_spill] sm:$0xff]  ;;  %v10410_v6 = vand.u32 4294901760, %v526_v62 }
 0x331   :  { %5532 = vmatpush.msra.mxu2 %v10294_v54  ;;  %5635 = vmatpush.msra.mxu3 %v5634_v12  ;;  %v11562_v50 = vand.u32 4294901760, %v11561_v28  ;;  %v510_v12 = vld [vmem:[#allocation2 + $0x378] sm:$0xff] }
 0x332   :  { %5495 = vmatmul.f32.vlgmr.msra.gmra.mxu1 %v7203_v48  ;;  %5440 = vmatpush.msra.mxu0 %v11551_v59  ;;  %v10425_v47 = vsub.f32 %v526_v62, %v10410_v6  ;;  %v10427_v9 = vand.u32 4294901760, %v510_v12 }
 0x333   :  { %5717 = vmatpush.msrb.mxu1 %v10126_v39  ;;  %5534 = vmatpush.msra.mxu2 %v10307_v15 }
 0x334   :  { %5641 = vmatpush.msra.mxu3 %v5640_v24  ;;  %5540 = vmatmul.f32.vlgmr.msra.gmra.mxu2 %v11303_v46 }
 0x335   :  { %5719 = vmatpush.msrb.mxu1 %v10134_v1  ;;  %5764 = vmatpush.msrb.mxu2 %v11552_v45  ;;  %v10446_v45 = vsub.f32 %v510_v12, %v10427_v9 }
 0x336   :  { %5444 = vmatpush.msra.mxu0 %v11553_v17  ;;  %5647 = vmatpush.msra.mxu3 %v5646_v55  ;;  %v11572_v55 = vand.u32 4294901760, %v10251_v14  ;;  %v486_v17 = vld [vmem:[#allocation2 + $0x2b8] sm:$0xff] }
 0x337   :  { %5649 = vmatmul.f32.vlgmr.msra.gmra.mxu3 %v11554_v43  ;;  %5721 = vmatpush.msrb.mxu1 %v10148_v60  ;;  %v10468_v41 = vand.u32 4294901760, %v486_v17 }
 0x338   :  { %5768 = vmatpush.msrb.mxu2 %v11556_v57  ;;  %5835 = vmatpush.msrb.mxu3 %v10126_v39  ;;  %v11563_v39 = vand.u32 4294901760, %v10175_v13  ;;  %v4534_v57 = vpop.f32.mrf.mxu1 }
 0x339   :  { %5448 = vmatpush.msra.mxu0 %v11558_v52  ;;  %5723 = vmatpush.msrb.mxu1 %v10157_v27  ;;  %v10470_v52 = vpop.f32.mrf.mxu2  ;;  %v10497_v28 = vsub.f32 %v486_v17, %v10468_v41 }
 0x33a   :  { %5772 = vmatpush.msrb.mxu2 %v11560_v10  ;;  %5837 = vmatpush.msrb.mxu3 %v10134_v1  ;;  %v11565_v1 = vld [vmem:[#allocation25_spill] sm:$0xff] }
 0x33b   :  { %5452 = vmatpush.msra.mxu0 %v11562_v50  ;;  %5499 = vmatmul.f32.gmra.mxu1 %v11251_v11  ;;  %v11566_v22 = vand.u32 4294901760, %v11565_v1 }
 0x33c   :  { %5454 = vmatmul.f32.vlgmr.msra.gmra.mxu0 %v7203_v48  ;;  %5725 = vmatpush.msrb.mxu1 %v10166_v37 }
 0x33d   :  { %5659 = vmatpush.msrb.mxu0 %v10143_v61  ;;  %5776 = vmatpush.msrb.mxu2 %v11563_v39  ;;  %v11568_v61 = vand.u32 4294901760, %v10198_v40  ;;  %v462_v39 = vld [vmem:[#allocation2 + $0x1f8] sm:$0xff] }
 0x33e   :  { %5839 = vmatpush.msrb.mxu3 %v10148_v60  ;;  %5548 = vmatmul.f32.gmra.mxu2 %v11564_v42  ;;  %v518_v60 = vld [vmem:[#allocation2 + $0x3b8] sm:$0xff] }
 0x33f   :  { %5662 = vmatpush.msrb.mxu0 %v11555_v19  ;;  %5727 = vmatpush.msrb.mxu1 %v10177_v33  ;;  %v10417_v26 = vand.u32 4294901760, %v518_v60 }
 0x340   :  { %5780 = vmatpush.msrb.mxu2 %v11566_v22  ;;  %5841 = vmatpush.msrb.mxu3 %v10157_v27  ;;  %v11569_v27 = vand.u32 4294901760, %v10213_v58 }
 0x341   :  { %5653 = vmatmul.f32.gmra.mxu3 %v11567_v34  ;;  %5665 = vmatpush.msrb.mxu0 %v11559_v18  ;;  %v10435_v24 = vsub.f32 %v518_v60, %v10417_v26  ;;  %v10516_v60 = vand.u32 4294901760, %v462_v39 }
 0x342   :  { %5729 = vmatpush.msrb.mxu1 %v10192_v49  ;;  %5784 = vmatpush.msrb.mxu2 %v11568_v61  ;;  %v11574_v61 = vld [vmem:[#allocation14_spill] sm:$0xff] }
 0x343   :  { %5843 = vmatpush.msrb.mxu3 %v10166_v37  ;;  %5668 = vmatpush.msrb.mxu0 %v10175_v13  ;;  %v502_v37 = vld [vmem:[#allocation2 + $0x338] sm:$0xff]  ;;  %v11570_v13 = vand.u32 4294901760, %v10225_v7 }
 0x344   :  { %5731 = vmatpush.msrb.mxu1 %v10202_v23  ;;  %5788 = vmatpush.msrb.mxu2 %v11569_v27  ;;  %v10437_v59 = vand.u32 4294901760, %v502_v37 }
 0x345   :  { %5845 = vmatpush.msrb.mxu3 %v10177_v33  ;;  %5458 = vmatmul.f32.gmra.mxu0 %v11251_v11  ;;  %v11571_v33 = vand.u32 4294901760, %v10237_v38 }
 0x346   :  { %5671 = vmatpush.msrb.mxu0 %v11565_v1  ;;  %5733 = vmatpush.msrb.mxu1 %v10215_v51  ;;  %v10457_v19 = vsub.f32 %v502_v37, %v10437_v59  ;;  %v446_v37 = vld [vmem:[#allocation2 + $0x178] sm:$0xff] }
 0x347   :  { %5792 = vmatpush.msrb.mxu2 %v11570_v13  ;;  %5847 = vmatpush.msrb.mxu3 %v10192_v49  ;;  %v494_v49 = vld [vmem:[#allocation2 + $0x2f8] sm:$0xff]  ;;  %v4538_v13 = vpop.f32.mrf.mxu1 }
 0x348   :  { %5674 = vmatpush.msrb.mxu0 %v10198_v40  ;;  %5735 = vmatpush.msrb.mxu1 %v10227_v44  ;;  %v11183_v40 = vand.u32 4294901760, %v10425_v47  ;;  %v11179_v18 = vand.u32 4294901760, %v10457_v19 }
 0x349   :  { %5796 = vmatpush.msrb.mxu2 %v11571_v33  ;;  %5849 = vmatpush.msrb.mxu3 %v10202_v23  ;;  %v10450_v23 = vand.u32 4294901760, %v494_v49 }
 0x34a   :  { %5677 = vmatpush.msrb.mxu0 %v10213_v58  ;;  %5737 = vmatpush.msrb.mxu1 %v10239_v32  ;;  %v4425_v58 = vpop.f32.mrf.mxu0  ;;  %v5945_v22 = vsub.f32 %v10457_v19, %v11179_v18 }
 0x34b   :  { %5800 = vmatpush.msrb.mxu2 %v11572_v55  ;;  %5851 = vmatpush.msrb.mxu3 %v10215_v51  ;;  %v11182_v51 = vand.u32 4294901760, %v10435_v24 }
 0x34c   :  { %5680 = vmatpush.msrb.mxu0 %v10225_v7  ;;  %5739 = vmatpush.msrb.mxu1 %v10253_v31  ;;  %v478_v7 = vld [vmem:[#allocation2 + $0x278] sm:$0xff]  ;;  %v5946_v55 = vand.u32 4294901760, %v5945_v22 }
 0x34d   :  { %5804 = vmatpush.msrb.mxu2 %v5614_v30  ;;  %5853 = vmatpush.msrb.mxu3 %v10227_v44  ;;  %v5927_v44 = vsub.f32 %v10425_v47, %v11183_v40  ;;  %v11181_v30 = vand.u32 4294901760, %v10446_v45  ;;  %v10484_v10 = vand.u32 4294901760, %v478_v7 }
 0x34e   :  { %5683 = vmatpush.msrb.mxu0 %v10237_v38  ;;  %5741 = vmatpush.msrb.mxu1 %v10266_v8  ;;  %v10475_v38 = vsub.f32 %v494_v49, %v10450_v23  ;;  %v438_v49 = vld [vmem:[#allocation2 + $0x138] sm:$0xff] }
 0x34f   :  { %5808 = vmatpush.msrb.mxu2 %v5620_v25  ;;  %5855 = vmatpush.msrb.mxu3 %v10239_v32  ;;  %v470_v25 = vld [vmem:[#allocation2 + $0x238] sm:$0xff]  ;;  %v5933_v32 = vsub.f32 %v10435_v24, %v11182_v51  ;;  %v10512_v62 = vsub.f32 %v478_v7, %v10484_v10  ;;  %v10540_v7 = vand.u32 4294901760, %v446_v37 }
 0x350   :  { %5686 = vmatpush.msrb.mxu0 %v10251_v14  ;;  %5743 = vmatpush.msrb.mxu1 %v10279_v2  ;;  %v10486_v14 = vpop.f32.mrf.mxu3  ;;  %v10499_v50 = vand.u32 4294901760, %v470_v25 }
 0x351   :  { %5812 = vmatpush.msrb.mxu2 %v5626_v63  ;;  %5857 = vmatpush.msrb.mxu3 %v10253_v31  ;;  %v5928_v31 = vand.u32 4294901760, %v5927_v44  ;;  %v5939_v63 = vsub.f32 %v10446_v45, %v11181_v30  ;;  %v11176_v17 = vand.u32 4294901760, %v10512_v62  ;;  %v10565_v22 = vsub.f32 %v446_v37, %v10540_v7  ;;  %v4752_v37 = vpop.f32.mrf.mxu1 }
 0x352   :  { %5689 = vmatpush.msrb.mxu0 %v10264_v0  ;;  %5745 = vmatpush.msrb.mxu1 %v10294_v54  ;;  %v11178_v0 = vand.u32 4294901760, %v10475_v38  ;;  %v4433_v27 = vpop.f32.mrf.mxu0  ;;  %v10522_v12 = vsub.f32 %v470_v25, %v10499_v50  ;;  %v10547_v25 = vand.u32 4294901760, %v438_v49 }
 0x353   :  { %5816 = vmatpush.msrb.mxu2 %v5632_v5  ;;  %5859 = vmatpush.msrb.mxu3 %v10266_v8  ;;  %v11573_v5 = vld [vmem:[#allocation20_spill] sm:$0xff]  ;;  %v5934_v8 = vand.u32 4294901760, %v5933_v32  ;;  %v430_v32 = vld [vmem:[#allocation2 + $0xf8] sm:$0xff] }
 0x354   :  { %5692 = vmatpush.msrb.mxu0 %v10277_v29  ;;  %5747 = vmatpush.msrb.mxu1 %v10307_v15  ;;  %v4426_v1 = vadd.f32 %v4425_v58, %v11573_v5  ;;  %v454_v29 = vld [vmem:[#allocation2 + $0x1b8] sm:$0xff]  ;;  %v10533_v58 = vpop.f32.mrf.mxu2  ;;  %v11180_v44 = vand.u32 4294901760, %v10522_v12 }
 0x355   :  { %5820 = vmatpush.msrb.mxu2 %v5638_v20  ;;  %5861 = vmatpush.msrb.mxu3 %v10279_v2  ;;  %v5940_v2 = vand.u32 4294901760, %v5939_v63  ;;  %v11177_v20 = vand.u32 4294901760, %v10497_v28  ;;  %v10529_v33 = vand.u32 4294901760, %v454_v29 }
 0x356   :  { %5751 = vmatmul.f32.vlgmr.msrb.gmra.mxu1 %v11574_v61  ;;  %5695 = vmatpush.msrb.mxu0 %v10290_v4  ;;  %v5951_v4 = vsub.f32 %v10475_v38, %v11178_v0  ;;  %v11577_v0 = vld [vmem:[#allocation13_spill] sm:$0xff]  ;;  %v630_v61 = vld [vmem:[#allocation2 + $0x738] sm:$0xff] }
 0x357   :  { %5929 = vmatpush.msra.mxu1 %v5928_v31  ;;  %5824 = vmatpush.msrb.mxu2 %v5644_v35  ;;  %v4535_v35 = vadd.f32 %v4534_v57, %v4426_v1  ;;  %v5957_v57 = vsub.f32 %v10497_v28, %v11177_v20  ;;  %v10554_v31 = vsub.f32 %v454_v29, %v10529_v33  ;;  %v422_v1 = vld [vmem:[#allocation2 + $0xb8] sm:$0xff]  ;;  %v10567_v29 = vand.u32 4294901760, %v430_v32 }
 0x358   :  { %5863 = vmatpush.msrb.mxu3 %v10294_v54  ;;  %5826 = vmatmul.f32.vlgmr.msrb.gmra.mxu2 %v11554_v43  ;;  %v10538_v54 = vsub.f32 %v462_v39, %v10516_v60  ;;  %v5963_v39 = vsub.f32 %v10512_v62, %v11176_v17  ;;  %v10576_v17 = vsub.f32 %v438_v49, %v10547_v25  ;;  %v414_v20 = vld [vmem:[#allocation2 + $0x78] sm:$0xff]  ;;  %v10580_v18 = vand.u32 4294901760, %v422_v1 }
 0x359   :  { %5935 = vmatpush.msra.mxu1 %v5934_v8  ;;  %6031 = vmatpush.msra.mxu2 %v10425_v47  ;;  %v4593_v63 = vadd.f32 %v10470_v52, %v4535_v35  ;;  %v11575_v52 = vld [vmem:[#allocation22_spill] sm:$0xff]  ;;  %v5958_v35 = vand.u32 4294901760, %v5957_v57  ;;  %v10592_v51 = vsub.f32 %v430_v32, %v10567_v29  ;;  %v11578_v30 = vand.u32 4294901760, %v10554_v31 }
 0x35a   :  { %5698 = vmatpush.msrb.mxu0 %v10302_v53  ;;  %5865 = vmatpush.msrb.mxu3 %v10307_v15  ;;  %v10549_v53 = vpop.f32.mrf.mxu3  ;;  %v5952_v15 = vand.u32 4294901760, %v5951_v4  ;;  %v11184_v8 = vand.u32 4294901760, %v10538_v54  ;;  %v4711_v4 = vpop.f32.mrf.mxu0  ;;  %v5964_v57 = vand.u32 4294901760, %v5963_v39  ;;  %v11185_v40 = vand.u32 4294901760, %v10576_v17 }
 0x35b   :  { %5867 = vmatmul.f32.vlgmr.msrb.gmra.mxu3 %v11554_v43  ;;  %5941 = vmatpush.msra.mxu1 %v5940_v2  ;;  %v4434_v2 = vadd.f32 %v4433_v27, %v11575_v52  ;;  %v5981_v32 = vsub.f32 %v10554_v31, %v11578_v30  ;;  %v10604_v52 = vsub.f32 %v422_v1, %v10580_v18  ;;  %v574_v43 = vld [vmem:[#allocation2 + $0x578] sm:$0xff] }
 0x35c   :  { %6034 = vmatpush.msra.mxu2 %v10435_v24  ;;  %6089 = vmatpush.msra.mxu3 %v10410_v6  ;;  %v4797_v49 = vpop.f32.mrf.mxu2 }
 0x35d   :  { %5701 = vmatpush.msrb.mxu0 %v10318_v56  ;;  %5947 = vmatpush.msra.mxu1 %v5946_v55  ;;  %v11576_v56 = vld [vmem:[#allocation18_spill] sm:$0xff]  ;;  %v5969_v55 = vsub.f32 %v10522_v12, %v11180_v44  ;;  %v406_v44 = vld [vmem:[#allocation2 + $0x38] sm:$0xff] }
 0x35e   :  { %6037 = vmatpush.msra.mxu2 %v10446_v45  ;;  %6091 = vmatpush.msra.mxu3 %v10417_v26 }
 0x35f   :  { %5704 = vmatpush.msrb.mxu0 %v10329_v3  ;;  %5757 = vmatmul.f32.gmra.mxu1 %v11576_v56  ;;  %v4637_v3 = vadd.f32 %v10486_v14, %v4593_v63  ;;  %v10594_v14 = vand.u32 4294901760, %v414_v20  ;;  %v4539_v63 = vadd.f32 %v4538_v13, %v4434_v2  ;;  %v5970_v39 = vand.u32 4294901760, %v5969_v55  ;;  %v654_v55 = vld [vmem:[#allocation2 + $0x7f8] sm:$0xff]  ;;  %v4756_v56 = vpop.f32.mrf.mxu1 }
 0x360   :  { %5707 = vmatmul.f32.vlgmr.msrb.gmra.mxu0 %v11577_v0  ;;  %5953 = vmatpush.msra.mxu1 %v5952_v15  ;;  %v5975_v15 = vsub.f32 %v10538_v54, %v11184_v8  ;;  %v10606_v13 = vand.u32 4294901760, %v406_v44 }
 0x361   :  { %5876 = vmatpush.msra.mxu0 %v10410_v6  ;;  %6040 = vmatpush.msra.mxu2 %v10457_v19  ;;  %v4712_v27 = vadd.f32 %v4711_v4, %v4637_v3  ;;  %v11579_v4 = vand.u32 4294901760, %v10565_v22  ;;  %v10616_v30 = vsub.f32 %v414_v20, %v10594_v14  ;;  %v4598_v1 = vadd.f32 %v10533_v58, %v4539_v63  ;;  %v11582_v58 = vld [vmem:[#allocation16_spill] sm:$0xff] }
 0x362   :  { %6093 = vmatpush.msra.mxu3 %v10427_v9  ;;  %5830 = vmatmul.f32.gmra.mxu2 %v11567_v34  ;;  %v4906_v8 = vpop.f32.mrf.mxu3  ;;  %v5976_v2 = vand.u32 4294901760, %v5975_v15  ;;  %v5993_v3 = vsub.f32 %v10576_v17, %v11185_v40  ;;  %v5982_v15 = vand.u32 4294901760, %v5981_v32  ;;  %v10627_v20 = vsub.f32 %v406_v44, %v10606_v13  ;;  %v4715_v63 = vpop.f32.mrf.mxu0 }
 0x363   :  { %5878 = vmatpush.msra.mxu0 %v10417_v26  ;;  %5959 = vmatpush.msra.mxu1 %v5958_v35  ;;  %v5987_v35 = vsub.f32 %v10565_v22, %v11579_v4  ;;  %11580 = vst [vmem:[#allocation27_spill] sm:$0xff] %v10616_v30  ;;  %v4643_v44 = vadd.f32 %v10549_v53, %v4598_v1  ;;  %v646_v4 = vld [vmem:[#allocation2 + $0x7b8] sm:$0xff]  ;;  %v10644_v32 = vand.u32 4294901760, %v654_v55 }
 0x364   :  { %6043 = vmatpush.msra.mxu2 %v10475_v38  ;;  %6095 = vmatpush.msra.mxu3 %v10437_v59  ;;  %11581 = vst [vmem:[#allocation24_spill] sm:$0xff] %v10627_v20  ;;  %v5994_v40 = vand.u32 4294901760, %v5993_v3  ;;  %v4805_v0 = vpop.f32.mrf.mxu2  ;;  %v11585_v3 = vand.u32 4294901760, %v10616_v30 }
 0x365   :  { %5871 = vmatmul.f32.gmra.mxu3 %v11567_v34  ;;  %5880 = vmatpush.msra.mxu0 %v10427_v9  ;;  %v4716_v53 = vadd.f32 %v4715_v63, %v4643_v44  ;;  %v638_v63 = vld [vmem:[#allocation2 + $0x778] sm:$0xff] }
 0x366   :  { %5965 = vmatpush.msra.mxu1 %v5964_v57  ;;  %6046 = vmatpush.msra.mxu2 %v10497_v28  ;;  %v4753_v57 = vadd.f32 %v4752_v37, %v4712_v27  ;;  %v5988_v37 = vand.u32 4294901760, %v5987_v35  ;;  %v11583_v27 = vand.u32 4294901760, %v10592_v51 }
 0x367   :  { %6097 = vmatpush.msra.mxu3 %v10450_v23  ;;  %5882 = vmatpush.msra.mxu0 %v10437_v59 }
 0x368   :  { %5971 = vmatpush.msra.mxu1 %v5970_v39  ;;  %6049 = vmatpush.msra.mxu2 %v10512_v62  ;;  %v5999_v39 = vsub.f32 %v10592_v51, %v11583_v27  ;;  %v11186_v27 = vand.u32 4294901760, %v10627_v20 }
 0x369   :  { %6099 = vmatpush.msra.mxu3 %v10468_v41  ;;  %5712 = vmatmul.f32.gmra.mxu0 %v11582_v58  ;;  %v4798_v58 = vadd.f32 %v4797_v49, %v4753_v57  ;;  %v6011_v57 = vsub.f32 %v10616_v30, %v11585_v3  ;;  %v4757_v3 = vadd.f32 %v4756_v56, %v4716_v53  ;;  %v622_v56 = vld [vmem:[#allocation2 + $0x6f8] sm:$0xff] }
 0x36a   :  { %5884 = vmatpush.msra.mxu0 %v10450_v23  ;;  %5977 = vmatpush.msra.mxu1 %v5976_v2  ;;  %v11584_v2 = vand.u32 4294901760, %v10604_v52  ;;  %v4910_v1 = vpop.f32.mrf.mxu3  ;;  %v6000_v49 = vand.u32 4294901760, %v5999_v39  ;;  %v10661_v39 = vsub.f32 %v654_v55, %v10644_v32 }
 0x36b   :  { %6052 = vmatpush.msra.mxu2 %v10522_v12  ;;  %6101 = vmatpush.msra.mxu3 %v10484_v10  ;;  %v4907_v44 = vadd.f32 %v4906_v8, %v4798_v58  ;;  %v6012_v8 = vand.u32 4294901760, %v6011_v57  ;;  %v10666_v58 = vand.u32 4294901760, %v638_v63  ;;  %v4806_v42 = vadd.f32 %v4805_v0, %v4757_v3 }
 0x36c   :  { %5886 = vmatpush.msra.mxu0 %v10468_v41  ;;  %5983 = vmatpush.msra.mxu1 %v5982_v15  ;;  %v6005_v35 = vsub.f32 %v10604_v52, %v11584_v2  ;;  %v10652_v15 = vand.u32 4294901760, %v646_v4  ;;  %v11588_v0 = vand.u32 4294901760, %v10661_v39 }
 0x36d   :  { %6055 = vmatpush.msra.mxu2 %v10538_v54  ;;  %6103 = vmatpush.msra.mxu3 %v10499_v50 }
 0x36e   :  { %5888 = vmatpush.msra.mxu0 %v10484_v10  ;;  %5989 = vmatpush.msra.mxu1 %v5988_v37  ;;  %v6006_v2 = vand.u32 4294901760, %v6005_v35  ;;  %v6017_v37 = vsub.f32 %v10627_v20, %v11186_v27  ;;  %v10669_v35 = vsub.f32 %v646_v4, %v10652_v15 }
 0x36f   :  { %6058 = vmatpush.msra.mxu2 %v10554_v31  ;;  %6105 = vmatpush.msra.mxu3 %v10516_v60  ;;  %v5083_v34 = vpop.f32.mrf.mxu2 }
 0x370   :  { %5890 = vmatpush.msra.mxu0 %v10499_v50  ;;  %5995 = vmatpush.msra.mxu1 %v5994_v40  ;;  %v5008_v40 = vpop.f32.mrf.mxu1  ;;  %11586 = vst [vmem:[#allocation26_spill] sm:$0xff] %v10669_v35  ;;  %v6018_v55 = vand.u32 4294901760, %v6017_v37  ;;  %v11188_v4 = vand.u32 4294901760, %v10669_v35  ;;  %v10684_v37 = vand.u32 4294901760, %v622_v56 }
 0x371   :  { %6061 = vmatpush.msra.mxu2 %v10565_v22  ;;  %6107 = vmatpush.msra.mxu3 %v10529_v33  ;;  %v4964_v5 = vpop.f32.mrf.mxu0 }
 0x372   :  { %5892 = vmatpush.msra.mxu0 %v10516_v60  ;;  %6001 = vmatpush.msra.mxu1 %v6000_v49  ;;  %v4965_v27 = vadd.f32 %v4964_v5, %v4907_v44  ;;  %v10675_v49 = vand.u32 4294901760, %v630_v61  ;;  %v614_v5 = vld [vmem:[#allocation2 + $0x6b8] sm:$0xff]  ;;  %v10682_v44 = vsub.f32 %v638_v63, %v10666_v58  ;;  %v5124_v53 = vpop.f32.mrf.mxu3 }
 0x373   :  { %6064 = vmatpush.msra.mxu2 %v10576_v17  ;;  %6109 = vmatpush.msra.mxu3 %v10540_v7 }
 0x374   :  { %5894 = vmatpush.msra.mxu0 %v10529_v33  ;;  %6007 = vmatpush.msra.mxu1 %v6006_v2  ;;  %v5009_v57 = vadd.f32 %v5008_v40, %v4965_v27  ;;  %11587 = vst [vmem:[#allocation17_spill] sm:$0xff] %v10682_v44  ;;  %v6299_v27 = vsub.f32 %v10661_v39, %v11588_v0  ;;  %v11590_v0 = vld [vmem:[#allocation8_spill] sm:$0xff] }
 0x375   :  { %6067 = vmatpush.msra.mxu2 %v10592_v51  ;;  %6111 = vmatpush.msra.mxu3 %v10547_v25  ;;  %v10693_v3 = vsub.f32 %v630_v61, %v10675_v49  ;;  %v4911_v40 = vadd.f32 %v4910_v1, %v4806_v42  ;;  %v590_v61 = vld [vmem:[#allocation2 + $0x5f8] sm:$0xff] }
 0x376   :  { %5896 = vmatpush.msra.mxu0 %v10540_v7  ;;  %6013 = vmatpush.msra.mxu1 %v6012_v8  ;;  %v5084_v2 = vadd.f32 %v5083_v34, %v5009_v57  ;;  %v10695_v8 = vand.u32 4294901760, %v614_v5  ;;  %v606_v34 = vld [vmem:[#allocation2 + $0x678] sm:$0xff] }
 0x377   :  { %6070 = vmatpush.msra.mxu2 %v10604_v52  ;;  %6113 = vmatpush.msra.mxu3 %v10567_v29  ;;  %v598_v57 = vld [vmem:[#allocation2 + $0x638] sm:$0xff]  ;;  %v10710_v1 = vand.u32 4294901760, %v606_v34 }
 0x378   :  { %5898 = vmatpush.msra.mxu0 %v10547_v25  ;;  %6019 = vmatpush.msra.mxu1 %v6018_v55  ;;  %v5125_v63 = vadd.f32 %v5124_v53, %v5084_v2  ;;  %v6305_v55 = vsub.f32 %v10669_v35, %v11188_v4  ;;  %v10706_v53 = vsub.f32 %v622_v56, %v10684_v37  ;;  %v6300_v4 = vand.u32 4294901760, %v6299_v27  ;;  %v11592_v35 = vld [vmem:[#allocation9_spill] sm:$0xff] }
 0x379   :  { %6073 = vmatpush.msra.mxu2 %v10616_v30  ;;  %6115 = vmatpush.msra.mxu3 %v10580_v18  ;;  %v5014_v30 = vpop.f32.mrf.mxu1  ;;  %v10716_v56 = vsub.f32 %v614_v5, %v10695_v8  ;;  %v11591_v27 = vand.u32 4294901760, %v10682_v44 }
 0x37a   :  { %6021 = vmatmul.f32.vlgmr.msra.gmra.mxu1 %v7203_v48  ;;  %5900 = vmatpush.msra.mxu0 %v10567_v29  ;;  %6624 = vst [vmem:[#allocation5 + $0x28] sm:$0xff] %v5125_v63  ;;  %v4969_v42 = vpop.f32.mrf.mxu0  ;;  %v582_v63 = vld [vmem:[#allocation2 + $0x5b8] sm:$0xff] }
 0x37b   :  { %11589 = vst [vmem:[#allocation21_spill] sm:$0xff] %v10706_v53  ;;  %6207 = vmatpush.msrb.mxu1 %v10410_v6  ;;  %6076 = vmatpush.msra.mxu2 %v10627_v20  ;;  %v4970_v2 = vadd.f32 %v4969_v42, %v4911_v40  ;;  %v10720_v6 = vand.u32 4294901760, %v598_v57  ;;  %v6306_v40 = vand.u32 4294901760, %v6305_v55  ;;  %v6311_v42 = vsub.f32 %v10682_v44, %v11591_v27 }
 0x37c   :  { %6117 = vmatpush.msra.mxu3 %v10594_v14  ;;  %6079 = vmatmul.f32.vlgmr.msra.gmra.mxu2 %v11590_v0  ;;  %v5087_v0 = vpop.f32.mrf.mxu2  ;;  %v11593_v55 = vand.u32 4294901760, %v10693_v3  ;;  %v11198_v5 = vand.u32 4294901760, %v10716_v56  ;;  %v5128_v44 = vpop.f32.mrf.mxu3 }
 0x37d   :  { %6209 = vmatpush.msrb.mxu1 %v10417_v26  ;;  %6248 = vmatpush.msrb.mxu2 %v10644_v32  ;;  %v5015_v20 = vadd.f32 %v5014_v30, %v4970_v2  ;;  %v10731_v26 = vsub.f32 %v606_v34, %v10710_v1  ;;  %v10733_v2 = vand.u32 4294901760, %v590_v61  ;;  %v11594_v34 = vand.u32 4294901760, %v10706_v53 }
 0x37e   :  { %5902 = vmatpush.msra.mxu0 %v10580_v18  ;;  %6119 = vmatpush.msra.mxu3 %v10606_v13  ;;  %v6317_v27 = vsub.f32 %v10693_v3, %v11593_v55  ;;  %v566_v55 = vld [vmem:[#allocation2 + $0x538] sm:$0xff] }
 0x37f   :  { %6123 = vmatmul.f32.vlgmr.msra.gmra.mxu3 %v11592_v35  ;;  %6211 = vmatpush.msrb.mxu1 %v10427_v9  ;;  %v5088_v30 = vadd.f32 %v5087_v0, %v5015_v20  ;;  %v10743_v9 = vsub.f32 %v598_v57, %v10720_v6  ;;  %v10745_v35 = vand.u32 4294901760, %v582_v63  ;;  %v6323_v0 = vsub.f32 %v10706_v53, %v11594_v34  ;;  %v558_v34 = vld [vmem:[#allocation2 + $0x4f8] sm:$0xff] }
 0x380   :  { %6250 = vmatpush.msrb.mxu2 %v10652_v15  ;;  %6301 = vmatpush.msrb.mxu3 %v6300_v4  ;;  %v6312_v4 = vand.u32 4294901760, %v6311_v42  ;;  %v10757_v57 = vand.u32 4294901760, %v574_v43  ;;  %v6329_v42 = vsub.f32 %v10716_v56, %v11198_v5  ;;  %v11596_v53 = vand.u32 4294901760, %v10425_v47 }
 0x381   :  { %5904 = vmatpush.msra.mxu0 %v10594_v14  ;;  %6213 = vmatpush.msrb.mxu1 %v10437_v59  ;;  %v5129_v20 = vadd.f32 %v5128_v44, %v5088_v30  ;;  %v10755_v44 = vsub.f32 %v590_v61, %v10733_v2  ;;  %v11595_v30 = vld [vmem:[#allocation11_spill] sm:$0xff]  ;;  %v10771_v59 = vand.u32 4294901760, %v566_v55  ;;  %v11598_v47 = vand.u32 4294901760, %v10731_v26 }
 0x382   :  { %6252 = vmatpush.msrb.mxu2 %v10666_v58  ;;  %6307 = vmatpush.msrb.mxu3 %v6306_v40  ;;  %v6318_v40 = vand.u32 4294901760, %v6317_v27  ;;  %v550_v27 = vld [vmem:[#allocation2 + $0x4b8] sm:$0xff]  ;;  %v10784_v61 = vand.u32 4294901760, %v558_v34 }
 0x383   :  { %5906 = vmatpush.msra.mxu0 %v10606_v13  ;;  %6025 = vmatmul.f32.gmra.mxu1 %v11251_v11  ;;  %6632 = vst [vmem:[#allocation5 + $0x68] sm:$0xff] %v5129_v20  ;;  %v10769_v20 = vsub.f32 %v582_v63, %v10745_v35  ;;  %v6346_v5 = vand.u32 4294901760, %v10755_v44  ;;  %v10782_v63 = vsub.f32 %v574_v43, %v10757_v57 }
 0x384   :  { %5912 = vmatmul.f32.vlgmr.msra.gmra.mxu0 %v11595_v30  ;;  %6215 = vmatpush.msrb.mxu1 %v10450_v23  ;;  %v6324_v23 = vand.u32 4294901760, %v6323_v0  ;;  %v11597_v30 = vand.u32 4294901760, %v10435_v24  ;;  %v11599_v24 = vand.u32 4294901760, %v10446_v45  ;;  %v10795_v43 = vsub.f32 %v566_v55, %v10771_v59 }
 0x385   :  { %6136 = vmatpush.msrb.mxu0 %v11596_v53  ;;  %6254 = vmatpush.msrb.mxu2 %v10675_v49  ;;  %v6335_v53 = vsub.f32 %v10731_v26, %v11598_v47  ;;  %v6352_v0 = vand.u32 4294901760, %v10769_v20  ;;  %v542_v47 = vld [vmem:[#allocation2 + $0x478] sm:$0xff]  ;;  %v10808_v55 = vsub.f32 %v558_v34, %v10784_v61 }
 0x386   :  { %6313 = vmatpush.msrb.mxu3 %v6312_v4  ;;  %6084 = vmatmul.f32.gmra.mxu2 %v7235_v21  ;;  %v6330_v21 = vand.u32 4294901760, %v6329_v42  ;;  %v6358_v42 = vand.u32 4294901760, %v10782_v63 }
 0x387   :  { %6140 = vmatpush.msrb.mxu0 %v11597_v30  ;;  %6217 = vmatpush.msrb.mxu1 %v10468_v41  ;;  %v11600_v41 = vand.u32 4294901760, %v10743_v9  ;;  %v10797_v30 = vand.u32 4294901760, %v550_v27  ;;  %v6336_v45 = vand.u32 4294901760, %v6335_v53  ;;  %v6364_v53 = vand.u32 4294901760, %v10795_v43 }
 0x388   :  { %6256 = vmatpush.msrb.mxu2 %v10684_v37  ;;  %6319 = vmatpush.msrb.mxu3 %v6318_v40  ;;  %v6347_v40 = vsub.f32 %v10755_v44, %v6346_v5 }
 0x389   :  { %6129 = vmatmul.f32.gmra.mxu3 %v7245_v36  ;;  %6144 = vmatpush.msrb.mxu0 %v11599_v24  ;;  %v6341_v4 = vsub.f32 %v10743_v9, %v11600_v41  ;;  %v11601_v36 = vand.u32 4294901760, %v10457_v19  ;;  %v534_v24 = vld [vmem:[#allocation2 + $0x438] sm:$0xff]  ;;  %v10820_v34 = vsub.f32 %v550_v27, %v10797_v30  ;;  %v11602_v41 = vand.u32 4294901760, %v10475_v38 }
 0x38a   :  { %6219 = vmatpush.msrb.mxu1 %v10484_v10  ;;  %6258 = vmatpush.msrb.mxu2 %v10695_v8  ;;  %v10812_v10 = vand.u32 4294901760, %v542_v47  ;;  %v11603_v27 = vand.u32 4294901760, %v10497_v28 }
 0x38b   :  { %6325 = vmatpush.msrb.mxu3 %v6324_v23  ;;  %6148 = vmatpush.msrb.mxu0 %v11601_v36  ;;  %v6342_v19 = vand.u32 4294901760, %v6341_v4  ;;  %v6353_v23 = vsub.f32 %v10769_v20, %v6352_v0  ;;  %v6370_v4 = vand.u32 4294901760, %v10808_v55  ;;  %v6365_v36 = vsub.f32 %v10795_v43, %v6364_v53 }
 0x38c   :  { %6221 = vmatpush.msrb.mxu1 %v10499_v50  ;;  %6260 = vmatpush.msrb.mxu2 %v10710_v1  ;;  %v10825_v50 = vand.u32 4294901760, %v534_v24  ;;  %v10836_v38 = vsub.f32 %v542_v47, %v10812_v10 }
 0x38d   :  { %6331 = vmatpush.msrb.mxu3 %v6330_v21  ;;  %5920 = vmatmul.f32.gmra.mxu0 %v7258_v16  ;;  %v6348_v16 = vand.u32 4294901760, %v6347_v40  ;;  %v6359_v21 = vsub.f32 %v10782_v63, %v6358_v42  ;;  %v11604_v40 = vand.u32 4294901760, %v10512_v62  ;;  %v6371_v47 = vsub.f32 %v10808_v55, %v6370_v4 }
 0x38e   :  { %6152 = vmatpush.msrb.mxu0 %v11602_v41  ;;  %6223 = vmatpush.msrb.mxu1 %v10516_v60  ;;  %v6354_v60 = vand.u32 4294901760, %v6353_v23  ;;  %v10847_v28 = vsub.f32 %v534_v24, %v10825_v50  ;;  %v6382_v62 = vand.u32 4294901760, %v10836_v38  ;;  %v11606_v23 = vand.u32 4294901760, %v10538_v54 }
 0x38f   :  { %6262 = vmatpush.msrb.mxu2 %v10720_v6  ;;  %6337 = vmatpush.msrb.mxu3 %v6336_v45  ;;  %v6376_v45 = vand.u32 4294901760, %v10820_v34  ;;  %v11607_v41 = vand.u32 4294901760, %v10554_v31 }
 0x390   :  { %6156 = vmatpush.msrb.mxu0 %v11603_v27  ;;  %6225 = vmatpush.msrb.mxu1 %v10529_v33  ;;  %v6360_v33 = vand.u32 4294901760, %v6359_v21  ;;  %v11613_v27 = vld [vmem:[#allocation12_spill] sm:$0xff] }
 0x391   :  { %6264 = vmatpush.msrb.mxu2 %v10733_v2  ;;  %6343 = vmatpush.msrb.mxu3 %v6342_v19  ;;  %v11605_v19 = vand.u32 4294901760, %v10522_v12  ;;  %v6377_v24 = vsub.f32 %v10820_v34, %v6376_v45  ;;  %v6388_v12 = vand.u32 4294901760, %v10847_v28 }
 0x392   :  { %6160 = vmatpush.msrb.mxu0 %v11604_v40  ;;  %6227 = vmatpush.msrb.mxu1 %v10540_v7  ;;  %v6366_v7 = vand.u32 4294901760, %v6365_v36  ;;  %v11616_v36 = vld [vmem:[#allocation27_spill] sm:$0xff]  ;;  %v11618_v40 = vld [vmem:[#allocation17_spill] sm:$0xff] }
 0x393   :  { %6266 = vmatpush.msrb.mxu2 %v10745_v35  ;;  %6349 = vmatpush.msrb.mxu3 %v6348_v16  ;;  %v6383_v16 = vsub.f32 %v10836_v38, %v6382_v62  ;;  %v6378_v54 = vand.u32 4294901760, %v6377_v24  ;;  %v6389_v31 = vsub.f32 %v10847_v28, %v6388_v12 }
 0x394   :  { %6164 = vmatpush.msrb.mxu0 %v11605_v19  ;;  %6229 = vmatpush.msrb.mxu1 %v10547_v25  ;;  %v6372_v25 = vand.u32 4294901760, %v6371_v47  ;;  %v11623_v19 = vld [vmem:[#allocation19_spill] sm:$0xff] }
 0x395   :  { %6268 = vmatpush.msrb.mxu2 %v10757_v57  ;;  %6355 = vmatpush.msrb.mxu3 %v6354_v60  ;;  %v6384_v21 = vand.u32 4294901760, %v6383_v16 }
 0x396   :  { %6168 = vmatpush.msrb.mxu0 %v11606_v23  ;;  %6231 = vmatpush.msrb.mxu1 %v10567_v29  ;;  %v11608_v29 = vand.u32 4294901760, %v10565_v22  ;;  %v11610_v22 = vand.u32 4294901760, %v10592_v51  ;;  %v11614_v51 = vld [vmem:[#allocation26_spill] sm:$0xff] }
 0x397   :  { %6270 = vmatpush.msrb.mxu2 %v10771_v59  ;;  %6361 = vmatpush.msrb.mxu3 %v6360_v33  ;;  %v11615_v60 = vand.u32 4294901760, %v11614_v51  ;;  %v11619_v33 = vand.u32 4294901760, %v11618_v40 }
 0x398   :  { %6172 = vmatpush.msrb.mxu0 %v11607_v41  ;;  %6233 = vmatpush.msrb.mxu1 %v10580_v18  ;;  %v11609_v18 = vand.u32 4294901760, %v10576_v17  ;;  %v11611_v17 = vand.u32 4294901760, %v10661_v39 }
 0x399   :  { %6272 = vmatpush.msrb.mxu2 %v10784_v61  ;;  %6367 = vmatpush.msrb.mxu3 %v6366_v7 }
 0x39a   :  { %6176 = vmatpush.msrb.mxu0 %v11608_v29  ;;  %6235 = vmatpush.msrb.mxu1 %v10594_v14  ;;  %v6390_v14 = vand.u32 4294901760, %v6389_v31 }
 0x39b   :  { %6274 = vmatpush.msrb.mxu2 %v10797_v30  ;;  %6373 = vmatpush.msrb.mxu3 %v6372_v25 }
 0x39c   :  { %6180 = vmatpush.msrb.mxu0 %v11609_v18  ;;  %6237 = vmatpush.msrb.mxu1 %v10606_v13  ;;  %v11612_v13 = vand.u32 4294901760, %v10604_v52  ;;  %v11620_v52 = vld [vmem:[#allocation24_spill] sm:$0xff] }
 0x39d   :  { %6276 = vmatpush.msrb.mxu2 %v10812_v10  ;;  %6379 = vmatpush.msrb.mxu3 %v6378_v54  ;;  %v11621_v47 = vand.u32 4294901760, %v11620_v52 }
 0x39e   :  { %6239 = vmatmul.f32.vlgmr.msrb.gmra.mxu1 %v7203_v48  ;;  %6184 = vmatpush.msrb.mxu0 %v11610_v22 }
 0x39f   :  { %6461 = vmatpush.msra.mxu1 %v10644_v32  ;;  %6278 = vmatpush.msrb.mxu2 %v10825_v50 }
 0x3a0   :  { %6385 = vmatpush.msrb.mxu3 %v6384_v21  ;;  %6284 = vmatmul.f32.vlgmr.msrb.gmra.mxu2 %v11303_v46  ;;  %v11617_v46 = vand.u32 4294901760, %v11616_v36 }
 0x3a1   :  { %6463 = vmatpush.msra.mxu1 %v10652_v15  ;;  %6508 = vmatpush.msra.mxu2 %v11611_v17 }
 0x3a2   :  { %6188 = vmatpush.msrb.mxu0 %v11612_v13  ;;  %6391 = vmatpush.msrb.mxu3 %v6390_v14 }
 0x3a3   :  { %6393 = vmatmul.f32.vlgmr.msrb.gmra.mxu3 %v11613_v27  ;;  %6465 = vmatpush.msra.mxu1 %v10666_v58 }
 0x3a4   :  { %6512 = vmatpush.msra.mxu2 %v11615_v60  ;;  %6579 = vmatpush.msra.mxu3 %v10644_v32  ;;  %v11622_v32 = vand.u32 4294901760, %v10693_v3 }
 0x3a5   :  { %6192 = vmatpush.msrb.mxu0 %v11617_v46  ;;  %6467 = vmatpush.msra.mxu1 %v10675_v49 }
 0x3a6   :  { %6516 = vmatpush.msra.mxu2 %v11619_v33  ;;  %6581 = vmatpush.msra.mxu3 %v10652_v15  ;;  %v11624_v15 = vld [vmem:[#allocation21_spill] sm:$0xff] }
 0x3a7   :  { %6196 = vmatpush.msrb.mxu0 %v11621_v47  ;;  %6243 = vmatmul.f32.gmra.mxu1 %v11251_v11  ;;  %v11625_v7 = vand.u32 4294901760, %v11624_v15 }
 0x3a8   :  { %6198 = vmatmul.f32.vlgmr.msrb.gmra.mxu0 %v7203_v48  ;;  %6469 = vmatpush.msra.mxu1 %v10684_v37  ;;  %v11626_v48 = vld [vmem:[#allocation15_spill] sm:$0xff] }
 0x3a9   :  { %6403 = vmatpush.msra.mxu0 %v10661_v39  ;;  %6520 = vmatpush.msra.mxu2 %v11622_v32  ;;  %v11627_v39 = vand.u32 4294901760, %v10716_v56 }
 0x3aa   :  { %6583 = vmatpush.msra.mxu3 %v10666_v58  ;;  %6292 = vmatmul.f32.gmra.mxu2 %v11623_v19  ;;  %v11628_v58 = vand.u32 4294901760, %v10731_v26 }
 0x3ab   :  { %6406 = vmatpush.msra.mxu0 %v11614_v51  ;;  %6471 = vmatpush.msra.mxu1 %v10695_v8 }
 0x3ac   :  { %6524 = vmatpush.msra.mxu2 %v11625_v7  ;;  %6585 = vmatpush.msra.mxu3 %v10675_v49  ;;  %v11629_v49 = vand.u32 4294901760, %v10743_v9 }
 0x3ad   :  { %6397 = vmatmul.f32.gmra.mxu3 %v11626_v48  ;;  %6409 = vmatpush.msra.mxu0 %v11618_v40 }
 0x3ae   :  { %6473 = vmatpush.msra.mxu1 %v10710_v1  ;;  %6528 = vmatpush.msra.mxu2 %v11627_v39 }
 0x3af   :  { %6587 = vmatpush.msra.mxu3 %v10684_v37  ;;  %6412 = vmatpush.msra.mxu0 %v10693_v3  ;;  %v5278_v37 = vpop.f32.mrf.mxu1  ;;  %v5336_v3 = vpop.f32.mrf.mxu2 }
 0x3b0   :  { %6475 = vmatpush.msra.mxu1 %v10720_v6  ;;  %6532 = vmatpush.msra.mxu2 %v11628_v58 }
 0x3b1   :  { %6589 = vmatpush.msra.mxu3 %v10695_v8  ;;  %6202 = vmatmul.f32.gmra.mxu0 %v11251_v11  ;;  %v5169_v11 = vpop.f32.mrf.mxu0  ;;  %v5380_v8 = vpop.f32.mrf.mxu3 }
 0x3b2   :  { %6415 = vmatpush.msra.mxu0 %v11624_v15  ;;  %6477 = vmatpush.msra.mxu1 %v10733_v2 }
 0x3b3   :  { %6536 = vmatpush.msra.mxu2 %v11629_v49  ;;  %6591 = vmatpush.msra.mxu3 %v10710_v1  ;;  %v11630_v1 = vld [vmem:[#allocation20_spill] sm:$0xff] }
 0x3b4   :  { %6418 = vmatpush.msra.mxu0 %v10716_v56  ;;  %6479 = vmatpush.msra.mxu1 %v10745_v35  ;;  %v5170_v56 = vadd.f32 %v5169_v11, %v11630_v1 }
 0x3b5   :  { %6540 = vmatpush.msra.mxu2 %v6346_v5  ;;  %6593 = vmatpush.msra.mxu3 %v10720_v6  ;;  %v11631_v6 = vld [vmem:[#allocation14_spill] sm:$0xff] }
 0x3b6   :  { %6421 = vmatpush.msra.mxu0 %v10731_v26  ;;  %6481 = vmatpush.msra.mxu1 %v10757_v57 }
 0x3b7   :  { %6544 = vmatpush.msra.mxu2 %v6352_v0  ;;  %6595 = vmatpush.msra.mxu3 %v10733_v2  ;;  %v5282_v26 = vpop.f32.mrf.mxu1  ;;  %v5279_v2 = vadd.f32 %v5278_v37, %v5170_v56 }
 0x3b8   :  { %6424 = vmatpush.msra.mxu0 %v10743_v9  ;;  %6483 = vmatpush.msra.mxu1 %v10771_v59  ;;  %v5341_v9 = vpop.f32.mrf.mxu2 }
 0x3b9   :  { %6548 = vmatpush.msra.mxu2 %v6358_v42  ;;  %6597 = vmatpush.msra.mxu3 %v10745_v35  ;;  %v5177_v5 = vpop.f32.mrf.mxu0  ;;  %v5386_v35 = vpop.f32.mrf.mxu3 }
 0x3ba   :  { %6427 = vmatpush.msra.mxu0 %v10755_v44  ;;  %6485 = vmatpush.msra.mxu1 %v10784_v61  ;;  %v5337_v44 = vadd.f32 %v5336_v3, %v5279_v2 }
 0x3bb   :  { %6552 = vmatpush.msra.mxu2 %v6364_v53  ;;  %6599 = vmatpush.msra.mxu3 %v10757_v57  ;;  %v11633_v57 = vld [vmem:[#allocation18_spill] sm:$0xff]  ;;  %v11635_v53 = vld [vmem:[#allocation16_spill] sm:$0xff] }
 0x3bc   :  { %6430 = vmatpush.msra.mxu0 %v10769_v20  ;;  %6487 = vmatpush.msra.mxu1 %v10797_v30 }
 0x3bd   :  { %6556 = vmatpush.msra.mxu2 %v6370_v4  ;;  %6601 = vmatpush.msra.mxu3 %v10771_v59  ;;  %v11632_v59 = vld [vmem:[#allocation13_spill] sm:$0xff] }
 0x3be   :  { %6433 = vmatpush.msra.mxu0 %v10782_v63  ;;  %6489 = vmatpush.msra.mxu1 %v10812_v10 }
 0x3bf   :  { %6560 = vmatpush.msra.mxu2 %v6376_v45  ;;  %6603 = vmatpush.msra.mxu3 %v10784_v61  ;;  %v11634_v61 = vld [vmem:[#allocation22_spill] sm:$0xff]  ;;  %v5496_v0 = vpop.f32.mrf.mxu1 }
 0x3c0   :  { %6436 = vmatpush.msra.mxu0 %v10795_v43  ;;  %6491 = vmatpush.msra.mxu1 %v10825_v50  ;;  %v5178_v20 = vadd.f32 %v5177_v5, %v11634_v61  ;;  %v5381_v43 = vadd.f32 %v5380_v8, %v5337_v44 }
 0x3c1   :  { %6564 = vmatpush.msra.mxu2 %v6382_v62  ;;  %6605 = vmatpush.msra.mxu3 %v10797_v30  ;;  %v5455_v63 = vpop.f32.mrf.mxu0  ;;  %v5541_v30 = vpop.f32.mrf.mxu2 }
 0x3c2   :  { %6495 = vmatmul.f32.vlgmr.msra.gmra.mxu1 %v11631_v6  ;;  %6439 = vmatpush.msra.mxu0 %v10808_v55  ;;  %v5283_v42 = vadd.f32 %v5282_v26, %v5178_v20  ;;  %v5456_v55 = vadd.f32 %v5455_v63, %v5381_v43 }
 0x3c3   :  { %6568 = vmatpush.msra.mxu2 %v6388_v12  ;;  %6607 = vmatpush.msra.mxu3 %v10812_v10  ;;  %v5650_v10 = vpop.f32.mrf.mxu3 }
 0x3c4   :  { %6570 = vmatmul.f32.vlgmr.msra.gmra.mxu2 %v11613_v27  ;;  %6442 = vmatpush.msra.mxu0 %v10820_v34  ;;  %v5342_v34 = vadd.f32 %v5341_v9, %v5283_v42 }
 0x3c5   :  { %6609 = vmatpush.msra.mxu3 %v10825_v50  ;;  %v5497_v50 = vadd.f32 %v5496_v0, %v5456_v55 }
 0x3c6   :  { %6611 = vmatmul.f32.vlgmr.msra.gmra.mxu3 %v11613_v27  ;;  %6445 = vmatpush.msra.mxu0 %v10836_v38  ;;  %v5387_v45 = vadd.f32 %v5386_v35, %v5342_v34 }
 0x3c7   :  { %v5500_v38 = vpop.f32.mrf.mxu1 }
 0x3c8   :  { %6448 = vmatpush.msra.mxu0 %v10847_v28  ;;  %v5542_v28 = vadd.f32 %v5541_v30, %v5497_v50 }
 0x3c9   :  { %6451 = vmatmul.f32.vlgmr.msra.gmra.mxu0 %v11632_v59  ;;  %v5459_v4 = vpop.f32.mrf.mxu0  ;;  %v5549_v62 = vpop.f32.mrf.mxu2 }
 0x3ca   :  { %6501 = vmatmul.f32.gmra.mxu1 %v11633_v57  ;;  %v5460_v24 = vadd.f32 %v5459_v4, %v5387_v45  ;;  %v5651_v12 = vadd.f32 %v5650_v10, %v5542_v28 }
 0x3cb   :  { %v5654_v23 = vpop.f32.mrf.mxu3 }
 0x3cc   :  { %6574 = vmatmul.f32.gmra.mxu2 %v11626_v48  ;;  %v5501_v25 = vadd.f32 %v5500_v38, %v5460_v24 }
 0x3ce   :  { %6615 = vmatmul.f32.gmra.mxu3 %v11626_v48  ;;  %v5550_v18 = vadd.f32 %v5549_v62, %v5501_v25 }
 0x3d0   :  { %v5655_v17 = vadd.f32 %v5654_v23, %v5550_v18 }
 0x3d1   :  { %6456 = vmatmul.f32.gmra.mxu0 %v11635_v53 }
 0x3d3   :  { %v5752_v16 = vpop.f32.mrf.mxu1 }
 0x3db   :  { %v5827_v31 = vpop.f32.mrf.mxu2 }
 0x3dc   :  { %v5758_v51 = vpop.f32.mrf.mxu1 }
 0x3dd   :  { %v5708_v41 = vpop.f32.mrf.mxu0 }
 0x3de   :  { %v5709_v54 = vadd.f32 %v5708_v41, %v5651_v12  ;;  %v5868_v22 = vpop.f32.mrf.mxu3 }
 0x3e0   :  { %v5753_v29 = vadd.f32 %v5752_v16, %v5709_v54 }
 0x3e2   :  { %v5828_v21 = vadd.f32 %v5827_v31, %v5753_v29 }
 0x3e4   :  { %v5869_v14 = vadd.f32 %v5868_v22, %v5828_v21 }
 0x3e5   :  { %v5831_v36 = vpop.f32.mrf.mxu2 }
 0x3e6   :  { %6625 = vst [vmem:[#allocation5 + $0x30] sm:$0xff] %v5869_v14  ;;  %v5713_v13 = vpop.f32.mrf.mxu0 }
 0x3e7   :  { %v5714_v27 = vadd.f32 %v5713_v13, %v5655_v17 }
 0x3e8   :  { %v5872_v40 = vpop.f32.mrf.mxu3 }
 0x3e9   :  { %v5759_v60 = vadd.f32 %v5758_v51, %v5714_v27 }
 0x3eb   :  { %v5832_v46 = vadd.f32 %v5831_v36, %v5759_v60 }
 0x3ed   :  { %v5873_v33 = vadd.f32 %v5872_v40, %v5832_v46 }
 0x3ef   :  { %6633 = vst [vmem:[#allocation5 + $0x70] sm:$0xff] %v5873_v33 }
 0x3f7   :  { %v6022_v52 = vpop.f32.mrf.mxu1 }
 0x3ff   :  { %v6080_v32 = vpop.f32.mrf.mxu2 }
 0x400   :  { %v6026_v7 = vpop.f32.mrf.mxu1 }
 0x401   :  { %v5913_v47 = vpop.f32.mrf.mxu0 }
 0x402   :  { %v6124_v19 = vpop.f32.mrf.mxu3  ;;  %v5914_v15 = vadd.f32 %v5913_v47, %v11630_v1 }
 0x404   :  { %v6023_v58 = vadd.f32 %v6022_v52, %v5914_v15 }
 0x406   :  { %v6081_v11 = vadd.f32 %v6080_v32, %v6023_v58 }
 0x408   :  { %v6125_v6 = vadd.f32 %v6124_v19, %v6081_v11 }
 0x409   :  { %v6085_v39 = vpop.f32.mrf.mxu2 }
 0x40a   :  { %v5921_v48 = vpop.f32.mrf.mxu0 }
 0x40b   :  { %v5922_v37 = vadd.f32 %v5921_v48, %v11634_v61 }
 0x40c   :  { %v6130_v49 = vpop.f32.mrf.mxu3 }
 0x40d   :  { %v6027_v5 = vadd.f32 %v6026_v7, %v5922_v37 }
 0x40f   :  { %v6086_v9 = vadd.f32 %v6085_v39, %v6027_v5 }
 0x411   :  { %v6131_v1 = vadd.f32 %v6130_v49, %v6086_v9 }
 0x41b   :  { %v6240_v3 = vpop.f32.mrf.mxu1 }
 0x423   :  { %v6285_v56 = vpop.f32.mrf.mxu2 }
 0x424   :  { %v6244_v59 = vpop.f32.mrf.mxu1 }
 0x425   :  { %v6199_v8 = vpop.f32.mrf.mxu0 }
 0x426   :  { %v6394_v26 = vpop.f32.mrf.mxu3  ;;  %v6200_v2 = vadd.f32 %v6199_v8, %v6125_v6 }
 0x428   :  { %v6241_v35 = vadd.f32 %v6240_v3, %v6200_v2 }
 0x42a   :  { %v6286_v20 = vadd.f32 %v6285_v56, %v6241_v35 }
 0x42c   :  { %v6395_v43 = vadd.f32 %v6394_v26, %v6286_v20 }
 0x42d   :  { %v6293_v57 = vpop.f32.mrf.mxu2 }
 0x42e   :  { %v6203_v44 = vpop.f32.mrf.mxu0 }
 0x42f   :  { %v6204_v63 = vadd.f32 %v6203_v44, %v6131_v1 }
 0x430   :  { %v6398_v0 = vpop.f32.mrf.mxu3 }
 0x431   :  { %v6245_v30 = vadd.f32 %v6244_v59, %v6204_v63 }
 0x433   :  { %v6294_v53 = vadd.f32 %v6293_v57, %v6245_v30 }
 0x435   :  { %v6399_v38 = vadd.f32 %v6398_v0, %v6294_v53 }
 0x43f   :  { %v6496_v42 = vpop.f32.mrf.mxu1 }
 0x446   :  { %v6452_v61 = vpop.f32.mrf.mxu0 }
 0x447   :  { %v6453_v55 = vadd.f32 %v6452_v61, %v6395_v43  ;;  %v6571_v10 = vpop.f32.mrf.mxu2  ;;  %v6502_v24 = vpop.f32.mrf.mxu1 }
 0x449   :  { %v6497_v34 = vadd.f32 %v6496_v42, %v6453_v55  ;;  %v6612_v50 = vpop.f32.mrf.mxu3 }
 0x44b   :  { %v6572_v4 = vadd.f32 %v6571_v10, %v6497_v34 }
 0x44d   :  { %v6613_v45 = vadd.f32 %v6612_v50, %v6572_v4 }
 0x44e   :  { %v6457_v28 = vpop.f32.mrf.mxu0 }
 0x44f   :  { %6626 = vst [vmem:[#allocation5 + $0x38] sm:$0xff] %v6613_v45  ;;  %v6458_v62 = vadd.f32 %v6457_v28, %v6399_v38  ;;  %v6575_v12 = vpop.f32.mrf.mxu2 }
 0x451   :  { %v6503_v23 = vadd.f32 %v6502_v24, %v6458_v62  ;;  %v6616_v41 = vpop.f32.mrf.mxu3 }
 0x453   :  { %v6576_v25 = vadd.f32 %v6575_v12, %v6503_v23 }
 0x455   :  { %v6617_v16 = vadd.f32 %v6616_v41, %v6576_v25 }
 0x457   :  { %6634 = vst [vmem:[#allocation5 + $0x78] sm:$0xff] %v6617_v16 }
 0x458   :  { %6647 = dma.vmem_to_hbm [thread:$0]  %s6640_s5, 2048, %s6642_s8, [#allocation4], %s6713_s20, %s6713_s20, %s6714_s21  }
 0x459   :  { %6710 = dma.done.wait [#allocation4], 2048  }
 0x45a   :  { %6711 = vsyncadd [#allocation4], 4294965248 }
 0x45b   :  { %6652 = vsyncpa [#allocation3], 1 }
 0x45c   :  { %6653 = vsyncpa [#allocation4], 1 }

</bundles_post_ra>
